<compile_context>
chip_gen: v7x
topology: tpu7x:2x2x1
jax: 0.10.0
libtpu: 0.0.40
codegen_flags: <defaults>
</compile_context>

<pallas_src>
import jax
import jax.numpy as jnp
from jax import lax
from jax.experimental import pallas as pl
from jax.experimental.pallas import tpu as pltpu

K = 4            # conv kernel size (fixed by the module)
NEG_SLOPE = 0.2  # LeakyReLU slope
BN_EPS = 1e-5


def _round_up(x, m):
    return ((x + m - 1) // m) * m


# ----------------------------------------------------------------------------
# Fused Pallas kernel: LeakyReLU -> Conv4x4/s2 -> LeakyReLU -> ConvT4x4/s2 (+ BN partials)
# ----------------------------------------------------------------------------
def _unet_inner_kernel(x_ref, wd_ref, wu_ref, u_ref, stats_ref, dp_ref):
    """One batch element per grid step.

    x_ref    : (1, OH+1, OW+1, 4*Cin)   bf16  space-to-depth LeakyReLU'd padded input
    wd_ref   : (4, 4*Cin, Cmid_pad)     bf16  down-conv weight, tap-major (resident)
    wu_ref   : (16, Cmid_pad, Cout_pad) bf16  up-conv weight, (phase, tap)-major (resident)
    u_ref    : (1, 4, OH*OW, Cout_pad)  bf16  pre-BN up-conv output, phase-major
    stats_ref: (1, 2, Cout_pad)         f32   per-batch-element [sum ; sum of squares]
    dp_ref   : (OH+2, OW+2, Cmid_pad)   bf16  VMEM scratch: zero-padded mid activation
    """
    OH = x_ref.shape[1] - 1
    OW = x_ref.shape[2] - 1
    cin4 = x_ref.shape[3]
    cmid = dp_ref.shape[2]
    cout = u_ref.shape[3]

    # ---- down: 4x4/stride-2 conv == 2x2/stride-1 conv on the space-to-depth input ----
    acc_d = jnp.zeros((OH * OW, cmid), jnp.float32)
    for du in range(2):
        for dv in range(2):
            tap = x_ref[0, du:du + OH, dv:dv + OW, :].reshape(OH * OW, cin4)
            acc_d = acc_d + jnp.dot(tap, wd_ref[2 * du + dv],
                                    preferred_element_type=jnp.float32)
    # fused uprelu; cast to bf16 once for the MXU up-conv
    d = jnp.where(acc_d >= 0, acc_d, NEG_SLOPE * acc_d).astype(jnp.bfloat16)

    # zero-padded (halo = 1) mid activation lives only in VMEM -- never touches HBM
    dp_ref[...] = jnp.zeros_like(dp_ref)
    dp_ref[1:OH + 1, 1:OW + 1, :] = d.reshape(OH, OW, cmid)

    # ---- up: ConvTranspose(4,2,1) == 4 sub-pixel phases, each 2x2 dense taps of dp ----
    s1 = jnp.zeros((1, cout), jnp.float32)
    s2 = jnp.zeros((1, cout), jnp.float32)
    for p in range(4):                       # phase p = 2*r + c -> output pixel (2oh+r, 2ow+c)
        r, c = p // 2, p % 2
        acc_u = jnp.zeros((OH * OW, cout), jnp.float32)
        for ui in range(2):
            for vi in range(2):
                tap = dp_ref[r + ui:r + ui + OH, c + vi:c + vi + OW, :]
                acc_u = acc_u + jnp.dot(tap.reshape(OH * OW, cmid),
                                        wu_ref[4 * p + 2 * ui + vi],
                                        preferred_element_type=jnp.float32)
        u_ref[0, p] = acc_u.astype(u_ref.dtype)
        s1 = s1 + jnp.sum(acc_u, axis=0, keepdims=True)          # BN partials from f32
        s2 = s2 + jnp.sum(acc_u * acc_u, axis=0, keepdims=True)
    stats_ref[0, 0:1, :] = s1
    stats_ref[0, 1:2, :] = s2


# ----------------------------------------------------------------------------
# Forward pass
# ----------------------------------------------------------------------------
def unet_innermost_forward(x, w_down, w_up_t, gamma, beta):
    """x: (N, Cin, H, W) NCHW f32.
    w_down : (inner_nc, Cin, 4, 4)       nn.Conv2d weight
    w_up_t : (inner_nc, outer_nc, 4, 4)  nn.ConvTranspose2d weight
    gamma/beta : (outer_nc,)             BatchNorm2d affine parameters."""
    N, cin, H, W = x.shape
    inner_nc = w_down.shape[0]
    outer_nc = w_up_t.shape[1]
    OH, OW = H // 2, W // 2
    cmid = _round_up(inner_nc, 128)
    cout = _round_up(outer_nc, 128)

    # ---- input: LeakyReLU + pad + space-to-depth (one fused XLA layout pass over x) ----
    a = jnp.where(x >= 0, x, NEG_SLOPE * x).transpose(0, 2, 3, 1)            # (N,H,W,Cin)
    ap = jnp.pad(a, ((0, 0), (1, 1), (1, 1), (0, 0)))
    xs2d = (ap.reshape(N, OH + 1, 2, OW + 1, 2, cin)
              .transpose(0, 1, 3, 2, 4, 5)
              .reshape(N, OH + 1, OW + 1, 4 * cin)
              .astype(jnp.bfloat16))

    # ---- down-conv weight: tap (u,v) x (sub-row a, sub-col b, ic) x oc, one-shot build ----
    wd = (w_down.transpose(2, 3, 1, 0)                 # (kh, kw, ic, oc)
                .reshape(2, 2, 2, 2, cin, inner_nc)    # (u, a, v, b, ic, oc): kh=2u+a, kw=2v+b
                .transpose(0, 2, 1, 3, 4, 5)           # (u, v, a, b, ic, oc)
                .reshape(4, 4 * cin, inner_nc))
    wd = jnp.pad(wd, ((0, 0), (0, 0), (0, cmid - inner_nc))).astype(jnp.bfloat16)

    # ---- up-conv weight: per (phase r,c) x (tap ui,vi) dense (ic, oc) slabs, one-shot ----
    # ConvT(4,2,1): output (2oh+r, 2ow+c) reads dpad[oh+r+ui, ow+c+vi] with kernel tap
    # (kh, kw) = (3-2ui-r, 3-2vi-c).
    wt_rev = w_up_t.transpose(2, 3, 0, 1)[::-1, ::-1]            # [a,b] = Wt[:, :, 3-a, 3-b]
    wu = (wt_rev.reshape(2, 2, 2, 2, inner_nc, outer_nc)         # (ui, r, vi, c, ic, oc)
                .transpose(1, 3, 0, 2, 4, 5)                     # (r, c, ui, vi, ic, oc)
                .reshape(16, inner_nc, outer_nc))
    wu = jnp.pad(wu, ((0, 0), (0, cmid - inner_nc),
                      (0, cout - outer_nc))).astype(jnp.bfloat16)

    # Explicit VMEM budget: resident weights + double-buffered in/out blocks + scratch.
    # (v5e's 16 MiB default scoped limit is too small for 512-channel weights; keep the
    #  total well inside v7x's 64 MiB physical VMEM.)
    blk_in = (OH + 1) * (OW + 1) * 4 * cin * 2
    blk_u = 4 * OH * OW * cout * 2
    vmem_needed = (wd.size * 2 + wu.size * 2 + 2 * blk_in
                   + 2 * (blk_u + 2 * cout * 4)
                   + (OH + 2) * (OW + 2) * cmid * 2 + (2 << 20))
    vmem_limit = int(min(max(vmem_needed, 8 << 20), 96 << 20))

    u_phases, stats = pl.pallas_call(
        _unet_inner_kernel,
        out_shape=(jax.ShapeDtypeStruct((N, 4, OH * OW, cout), jnp.bfloat16),
                   jax.ShapeDtypeStruct((N, 2, cout), jnp.float32)),
        grid=(N,),
        in_specs=[pl.BlockSpec((1, OH + 1, OW + 1, 4 * cin), lambda n: (n, 0, 0, 0)),
                  pl.BlockSpec((4, 4 * cin, cmid), lambda n: (0, 0, 0)),     # resident weight
                  pl.BlockSpec((16, cmid, cout), lambda n: (0, 0, 0))],      # resident weight
        out_specs=(pl.BlockSpec((1, 4, OH * OW, cout), lambda n: (n, 0, 0, 0)),
                   pl.BlockSpec((1, 2, cout), lambda n: (n, 0, 0))),
        scratch_shapes=[pltpu.VMEM((OH + 2, OW + 2, cmid), jnp.bfloat16)],
        compiler_params=pltpu.CompilerParams(dimension_semantics=("parallel",),
                                             vmem_limit_bytes=vmem_limit),
    )(xs2d, wd, wu)

    # ---- BatchNorm finalize: tiny per-channel scalar math (batch statistics) ----
    # TODO(synk): torch BatchNorm2d in train mode also updates running_mean/var (unbiased);
    #             only the normalized forward output is reproduced here.
    count = float(N * H * W)                                    # N * 2OH * 2OW per channel
    s1 = jnp.sum(stats[:, 0, :outer_nc], axis=0)
    s2 = jnp.sum(stats[:, 1, :outer_nc], axis=0)
    mean = s1 / count
    var = jnp.maximum(s2 / count - mean * mean, 0.0)            # clamp E[x^2]-E[x]^2 cancel
    scale = gamma * lax.rsqrt(var + BN_EPS)
    shift = beta - mean * scale

    # ---- BN apply + sub-pixel un-shuffle + NCHW + skip concat: one fused XLA pass ----
    u = u_phases[:, :, :, :outer_nc].astype(jnp.float32)
    y = u * scale.reshape(1, 1, 1, -1) + shift.reshape(1, 1, 1, -1)
    y = (y.reshape(N, 2, 2, OH, OW, outer_nc)
          .transpose(0, 3, 1, 4, 2, 5)                          # (N, OH, r, OW, c, oc)
          .reshape(N, H, W, outer_nc)
          .transpose(0, 3, 1, 2))                               # NCHW
    # NOTE: torch's inplace LeakyReLU(0.2, True) technically mutates x before the concat;
    #       the conventional skip semantics (concatenate the original x) are kept here.
    return jnp.concatenate([x, y], axis=1)


# ----------------------------------------------------------------------------
# Reference (XLA convs).  It mirrors the bf16 MXU-input cast (f32 accumulation), so the
# comparison isolates the Pallas structure; residual diff is accumulation order + the bf16
# storage of the pre-BN activation.
# ----------------------------------------------------------------------------
def reference_forward(x, w_down, w_up_t, gamma, beta):
    a = jnp.where(x >= 0, x, NEG_SLOPE * x)
    d = lax.conv_general_dilated(a.astype(jnp.bfloat16), w_down.astype(jnp.bfloat16),
                                 window_strides=(2, 2), padding=((1, 1), (1, 1)),
                                 dimension_numbers=('NCHW', 'OIHW', 'NCHW'),
                                 preferred_element_type=jnp.float32)
    d = jnp.where(d >= 0, d, NEG_SLOPE * d)
    w_eq = jnp.flip(w_up_t, axis=(2, 3)).transpose(1, 0, 2, 3)
    u = lax.conv_general_dilated(d.astype(jnp.bfloat16), w_eq.astype(jnp.bfloat16),
                                 window_strides=(1, 1), padding=((2, 2), (2, 2)),
                                 lhs_dilation=(2, 2),
                                 dimension_numbers=('NCHW', 'OIHW', 'NCHW'),
                                 preferred_element_type=jnp.float32)
    mean = u.mean(axis=(0, 2, 3), keepdims=True)
    var = ((u - mean) ** 2).mean(axis=(0, 2, 3), keepdims=True)
    u = ((u - mean) * lax.rsqrt(var + BN_EPS) * gamma.reshape(1, -1, 1, 1)
         + beta.reshape(1, -1, 1, 1))
    return jnp.concatenate([x, u], axis=1)


if __name__ == "__main__":
    key = jax.random.PRNGKey(0)
    k1, k2, k3 = jax.random.split(key, 3)

    N, outer_nc, inner_nc, H, W = 2, 4, 8, 16, 16
    input_nc = outer_nc                         # module default: input_nc = outer_nc

    x = jax.random.normal(k1, (N, input_nc, H, W), jnp.float32)
    w_down = 0.1 * jax.random.normal(k2, (inner_nc, input_nc, K, K), jnp.float32)
    w_up_t = 0.1 * jax.random.normal(k3, (inner_nc, outer_nc, K, K), jnp.float32)
    gamma = jnp.ones((outer_nc,), jnp.float32)  # BatchNorm2d default affine init
    beta = jnp.zeros((outer_nc,), jnp.float32)

    fwd = jax.jit(unet_innermost_forward)
    out = jax.block_until_ready(fwd(x, w_down, w_up_t, gamma, beta))

    ref = reference_forward(x, w_down, w_up_t, gamma, beta)
    assert out.shape == (N, input_nc + outer_nc, H, W), out.shape
    max_err = float(jnp.max(jnp.abs(out - ref)))
    assert jnp.allclose(out, ref, rtol=2e-2, atol=2e-2), max_err

    print("KERNEL_OK")
</pallas_src>

<mosaic_0001>
module attributes {stable_mosaic.version = 11 : i64} {
  func.func @_unet_inner_kernel(%arg0: i32, %arg1: memref<1x9x9x16xbf16, #tpu.memory_space<vmem>>, %arg2: memref<4x16x128xbf16, #tpu.memory_space<vmem>>, %arg3: memref<16x128x128xbf16, #tpu.memory_space<vmem>>, %arg4: memref<1x4x64x128xbf16, #tpu.memory_space<vmem>>, %arg5: memref<1x2x128xf32, #tpu.memory_space<vmem>>, %arg6: memref<10x10x128xbf16, #tpu.memory_space<vmem>>) attributes {dimension_semantics = [#tpu.dimension_semantics<parallel>], iteration_bounds = array<i64: 2>, scalar_prefetch = 0 : i64, scratch_operands = 1 : i64, tpu.core_type = #tpu.core_type<tc>, window_params = [{transform_indices = @transform_0, window_bounds = array<i64: 1, 9, 9, 16>}, {pipeline_mode = #tpu.pipeline_mode<synchronous>, transform_indices = @transform_1, window_bounds = array<i64: 4, 16, 128>}, {pipeline_mode = #tpu.pipeline_mode<synchronous>, transform_indices = @transform_2, window_bounds = array<i64: 16, 128, 128>}, {transform_indices = @transform_3, window_bounds = array<i64: 1, 4, 64, 128>}, {transform_indices = @transform_4, window_bounds = array<i64: 1, 2, 128>}]} {
    %cst = arith.constant 0.000000e+00 : f32
    %0 = vector.broadcast %cst : f32 to vector<64x128xf32>
    %c0 = arith.constant 0 : index
    %c0_0 = arith.constant 0 : index
    %c0_1 = arith.constant 0 : index
    %c0_2 = arith.constant 0 : index
    %1 = vector.load %arg1[%c0, %c0_0, %c0_1, %c0_2] : memref<1x9x9x16xbf16, #tpu.memory_space<vmem>>, vector<1x8x8x16xbf16>
    %2 = vector.shape_cast %1 : vector<1x8x8x16xbf16> to vector<8x8x16xbf16>
    %3 = vector.shape_cast %2 : vector<8x8x16xbf16> to vector<64x16xbf16>
    %c0_3 = arith.constant 0 : index
    %c0_4 = arith.constant 0 : index
    %c0_5 = arith.constant 0 : index
    %4 = vector.load %arg2[%c0_3, %c0_4, %c0_5] : memref<4x16x128xbf16, #tpu.memory_space<vmem>>, vector<1x16x128xbf16>
    %5 = vector.shape_cast %4 : vector<1x16x128xbf16> to vector<16x128xbf16>
    %cst_6 = arith.constant dense<0.000000e+00> : vector<64x128xf32>
    %6 = tpu.matmul %3, %5, %cst_6 {dimension_numbers = #tpu.dot_dimension_numbers<[1], [0], [0], [1], [0, 0, 1, 1], [], []>} : vector<64x16xbf16>, vector<16x128xbf16>, vector<64x128xf32> -> vector<64x128xf32>
    %7 = arith.addf %0, %6 : vector<64x128xf32>
    %c0_7 = arith.constant 0 : index
    %c0_8 = arith.constant 0 : index
    %c1 = arith.constant 1 : index
    %c0_9 = arith.constant 0 : index
    %8 = vector.load %arg1[%c0_7, %c0_8, %c1, %c0_9] : memref<1x9x9x16xbf16, #tpu.memory_space<vmem>>, vector<1x8x8x16xbf16>
    %9 = vector.shape_cast %8 : vector<1x8x8x16xbf16> to vector<8x8x16xbf16>
    %10 = vector.shape_cast %9 : vector<8x8x16xbf16> to vector<64x16xbf16>
    %c1_10 = arith.constant 1 : index
    %c0_11 = arith.constant 0 : index
    %c0_12 = arith.constant 0 : index
    %11 = vector.load %arg2[%c1_10, %c0_11, %c0_12] : memref<4x16x128xbf16, #tpu.memory_space<vmem>>, vector<1x16x128xbf16>
    %12 = vector.shape_cast %11 : vector<1x16x128xbf16> to vector<16x128xbf16>
    %cst_13 = arith.constant dense<0.000000e+00> : vector<64x128xf32>
    %13 = tpu.matmul %10, %12, %cst_13 {dimension_numbers = #tpu.dot_dimension_numbers<[1], [0], [0], [1], [0, 0, 1, 1], [], []>} : vector<64x16xbf16>, vector<16x128xbf16>, vector<64x128xf32> -> vector<64x128xf32>
    %14 = arith.addf %7, %13 : vector<64x128xf32>
    %c0_14 = arith.constant 0 : index
    %c1_15 = arith.constant 1 : index
    %c0_16 = arith.constant 0 : index
    %c0_17 = arith.constant 0 : index
    %15 = vector.load %arg1[%c0_14, %c1_15, %c0_16, %c0_17] : memref<1x9x9x16xbf16, #tpu.memory_space<vmem>>, vector<1x8x8x16xbf16>
    %16 = vector.shape_cast %15 : vector<1x8x8x16xbf16> to vector<8x8x16xbf16>
    %17 = vector.shape_cast %16 : vector<8x8x16xbf16> to vector<64x16xbf16>
    %c2 = arith.constant 2 : index
    %c0_18 = arith.constant 0 : index
    %c0_19 = arith.constant 0 : index
    %18 = vector.load %arg2[%c2, %c0_18, %c0_19] : memref<4x16x128xbf16, #tpu.memory_space<vmem>>, vector<1x16x128xbf16>
    %19 = vector.shape_cast %18 : vector<1x16x128xbf16> to vector<16x128xbf16>
    %cst_20 = arith.constant dense<0.000000e+00> : vector<64x128xf32>
    %20 = tpu.matmul %17, %19, %cst_20 {dimension_numbers = #tpu.dot_dimension_numbers<[1], [0], [0], [1], [0, 0, 1, 1], [], []>} : vector<64x16xbf16>, vector<16x128xbf16>, vector<64x128xf32> -> vector<64x128xf32>
    %21 = arith.addf %14, %20 : vector<64x128xf32>
    %c0_21 = arith.constant 0 : index
    %c1_22 = arith.constant 1 : index
    %c1_23 = arith.constant 1 : index
    %c0_24 = arith.constant 0 : index
    %22 = vector.load %arg1[%c0_21, %c1_22, %c1_23, %c0_24] : memref<1x9x9x16xbf16, #tpu.memory_space<vmem>>, vector<1x8x8x16xbf16>
    %23 = vector.shape_cast %22 : vector<1x8x8x16xbf16> to vector<8x8x16xbf16>
    %24 = vector.shape_cast %23 : vector<8x8x16xbf16> to vector<64x16xbf16>
    %c3 = arith.constant 3 : index
    %c0_25 = arith.constant 0 : index
    %c0_26 = arith.constant 0 : index
    %25 = vector.load %arg2[%c3, %c0_25, %c0_26] : memref<4x16x128xbf16, #tpu.memory_space<vmem>>, vector<1x16x128xbf16>
    %26 = vector.shape_cast %25 : vector<1x16x128xbf16> to vector<16x128xbf16>
    %cst_27 = arith.constant dense<0.000000e+00> : vector<64x128xf32>
    %27 = tpu.matmul %24, %26, %cst_27 {dimension_numbers = #tpu.dot_dimension_numbers<[1], [0], [0], [1], [0, 0, 1, 1], [], []>} : vector<64x16xbf16>, vector<16x128xbf16>, vector<64x128xf32> -> vector<64x128xf32>
    %28 = arith.addf %21, %27 : vector<64x128xf32>
    %cst_28 = arith.constant 0.000000e+00 : f32
    %29 = vector.broadcast %cst_28 : f32 to vector<64x128xf32>
    %30 = arith.cmpf oge, %28, %29 : vector<64x128xf32>
    %cst_29 = arith.constant 2.000000e-01 : f32
    %31 = vector.broadcast %cst_29 : f32 to vector<64x128xf32>
    %32 = arith.mulf %31, %28 : vector<64x128xf32>
    %33 = arith.select %30, %28, %32 : vector<64x128xi1>, vector<64x128xf32>
    %34 = arith.truncf %33 : vector<64x128xf32> to vector<64x128xbf16>
    %cst_30 = arith.constant 0.000000e+00 : bf16
    %35 = vector.broadcast %cst_30 : bf16 to vector<10x10x128xbf16>
    %c0_31 = arith.constant 0 : index
    %c0_32 = arith.constant 0 : index
    %c0_33 = arith.constant 0 : index
    %36 = vector.load %arg6[%c0_31, %c0_32, %c0_33] : memref<10x10x128xbf16, #tpu.memory_space<vmem>>, vector<10x10x128xbf16>
    tpu.vector_store %arg6[%c0_31, %c0_32, %c0_33], %35 {strides = array<i32>} : memref<10x10x128xbf16, #tpu.memory_space<vmem>>, vector<10x10x128xbf16>,
    %37 = vector.shape_cast %34 : vector<64x128xbf16> to vector<8x8x128xbf16>
    %c1_34 = arith.constant 1 : index
    %c1_35 = arith.constant 1 : index
    %c0_36 = arith.constant 0 : index
    %38 = vector.load %arg6[%c1_34, %c1_35, %c0_36] : memref<10x10x128xbf16, #tpu.memory_space<vmem>>, vector<8x8x128xbf16>
    tpu.vector_store %arg6[%c1_34, %c1_35, %c0_36], %37 {strides = array<i32>} : memref<10x10x128xbf16, #tpu.memory_space<vmem>>, vector<8x8x128xbf16>,
    %cst_37 = arith.constant 0.000000e+00 : f32
    %39 = vector.broadcast %cst_37 : f32 to vector<1x128xf32>
    %cst_38 = arith.constant 0.000000e+00 : f32
    %40 = vector.broadcast %cst_38 : f32 to vector<1x128xf32>
    %cst_39 = arith.constant 0.000000e+00 : f32
    %41 = vector.broadcast %cst_39 : f32 to vector<64x128xf32>
    %c0_40 = arith.constant 0 : index
    %c0_41 = arith.constant 0 : index
    %c0_42 = arith.constant 0 : index
    %42 = vector.load %arg6[%c0_40, %c0_41, %c0_42] : memref<10x10x128xbf16, #tpu.memory_space<vmem>>, vector<8x8x128xbf16>
    %43 = vector.shape_cast %42 : vector<8x8x128xbf16> to vector<64x128xbf16>
    %c0_43 = arith.constant 0 : index
    %c0_44 = arith.constant 0 : index
    %c0_45 = arith.constant 0 : index
    %44 = vector.load %arg3[%c0_43, %c0_44, %c0_45] : memref<16x128x128xbf16, #tpu.memory_space<vmem>>, vector<1x128x128xbf16>
    %45 = vector.shape_cast %44 : vector<1x128x128xbf16> to vector<128x128xbf16>
    %cst_46 = arith.constant dense<0.000000e+00> : vector<64x128xf32>
    %46 = tpu.matmul %43, %45, %cst_46 {dimension_numbers = #tpu.dot_dimension_numbers<[1], [0], [0], [1], [0, 0, 1, 1], [], []>} : vector<64x128xbf16>, vector<128x128xbf16>, vector<64x128xf32> -> vector<64x128xf32>
    %47 = arith.addf %41, %46 : vector<64x128xf32>
    %c0_47 = arith.constant 0 : index
    %c1_48 = arith.constant 1 : index
    %c0_49 = arith.constant 0 : index
    %48 = vector.load %arg6[%c0_47, %c1_48, %c0_49] : memref<10x10x128xbf16, #tpu.memory_space<vmem>>, vector<8x8x128xbf16>
    %49 = vector.shape_cast %48 : vector<8x8x128xbf16> to vector<64x128xbf16>
    %c1_50 = arith.constant 1 : index
    %c0_51 = arith.constant 0 : index
    %c0_52 = arith.constant 0 : index
    %50 = vector.load %arg3[%c1_50, %c0_51, %c0_52] : memref<16x128x128xbf16, #tpu.memory_space<vmem>>, vector<1x128x128xbf16>
    %51 = vector.shape_cast %50 : vector<1x128x128xbf16> to vector<128x128xbf16>
    %cst_53 = arith.constant dense<0.000000e+00> : vector<64x128xf32>
    %52 = tpu.matmul %49, %51, %cst_53 {dimension_numbers = #tpu.dot_dimension_numbers<[1], [0], [0], [1], [0, 0, 1, 1], [], []>} : vector<64x128xbf16>, vector<128x128xbf16>, vector<64x128xf32> -> vector<64x128xf32>
    %53 = arith.addf %47, %52 : vector<64x128xf32>
    %c1_54 = arith.constant 1 : index
    %c0_55 = arith.constant 0 : index
    %c0_56 = arith.constant 0 : index
    %54 = vector.load %arg6[%c1_54, %c0_55, %c0_56] : memref<10x10x128xbf16, #tpu.memory_space<vmem>>, vector<8x8x128xbf16>
    %55 = vector.shape_cast %54 : vector<8x8x128xbf16> to vector<64x128xbf16>
    %c2_57 = arith.constant 2 : index
    %c0_58 = arith.constant 0 : index
    %c0_59 = arith.constant 0 : index
    %56 = vector.load %arg3[%c2_57, %c0_58, %c0_59] : memref<16x128x128xbf16, #tpu.memory_space<vmem>>, vector<1x128x128xbf16>
    %57 = vector.shape_cast %56 : vector<1x128x128xbf16> to vector<128x128xbf16>
    %cst_60 = arith.constant dense<0.000000e+00> : vector<64x128xf32>
    %58 = tpu.matmul %55, %57, %cst_60 {dimension_numbers = #tpu.dot_dimension_numbers<[1], [0], [0], [1], [0, 0, 1, 1], [], []>} : vector<64x128xbf16>, vector<128x128xbf16>, vector<64x128xf32> -> vector<64x128xf32>
    %59 = arith.addf %53, %58 : vector<64x128xf32>
    %c1_61 = arith.constant 1 : index
    %c1_62 = arith.constant 1 : index
    %c0_63 = arith.constant 0 : index
    %60 = vector.load %arg6[%c1_61, %c1_62, %c0_63] : memref<10x10x128xbf16, #tpu.memory_space<vmem>>, vector<8x8x128xbf16>
    %61 = vector.shape_cast %60 : vector<8x8x128xbf16> to vector<64x128xbf16>
    %c3_64 = arith.constant 3 : index
    %c0_65 = arith.constant 0 : index
    %c0_66 = arith.constant 0 : index
    %62 = vector.load %arg3[%c3_64, %c0_65, %c0_66] : memref<16x128x128xbf16, #tpu.memory_space<vmem>>, vector<1x128x128xbf16>
    %63 = vector.shape_cast %62 : vector<1x128x128xbf16> to vector<128x128xbf16>
    %cst_67 = arith.constant dense<0.000000e+00> : vector<64x128xf32>
    %64 = tpu.matmul %61, %63, %cst_67 {dimension_numbers = #tpu.dot_dimension_numbers<[1], [0], [0], [1], [0, 0, 1, 1], [], []>} : vector<64x128xbf16>, vector<128x128xbf16>, vector<64x128xf32> -> vector<64x128xf32>
    %65 = arith.addf %59, %64 : vector<64x128xf32>
    %66 = arith.truncf %65 : vector<64x128xf32> to vector<64x128xbf16>
    %c0_68 = arith.constant 0 : index
    %c0_69 = arith.constant 0 : index
    %c0_70 = arith.constant 0 : index
    %c0_71 = arith.constant 0 : index
    %67 = vector.load %arg4[%c0_68, %c0_69, %c0_70, %c0_71] : memref<1x4x64x128xbf16, #tpu.memory_space<vmem>>, vector<1x1x64x128xbf16>
    %68 = vector.shape_cast %67 : vector<1x1x64x128xbf16> to vector<64x128xbf16>
    %69 = vector.shape_cast %66 : vector<64x128xbf16> to vector<1x1x64x128xbf16>
    tpu.vector_store %arg4[%c0_68, %c0_69, %c0_70, %c0_71], %69 {strides = array<i32>} : memref<1x4x64x128xbf16, #tpu.memory_space<vmem>>, vector<1x1x64x128xbf16>,
    %cst_72 = arith.constant dense<0.000000e+00> : vector<128xf32>
    %70 = vector.multi_reduction <add>, %65, %cst_72 [0] : vector<64x128xf32> to vector<128xf32>
    %71 = vector.shape_cast %70 : vector<128xf32> to vector<1x128xf32>
    %72 = arith.addf %39, %71 : vector<1x128xf32>
    %73 = arith.mulf %65, %65 : vector<64x128xf32>
    %cst_73 = arith.constant dense<0.000000e+00> : vector<128xf32>
    %74 = vector.multi_reduction <add>, %73, %cst_73 [0] : vector<64x128xf32> to vector<128xf32>
    %75 = vector.shape_cast %74 : vector<128xf32> to vector<1x128xf32>
    %76 = arith.addf %40, %75 : vector<1x128xf32>
    %cst_74 = arith.constant 0.000000e+00 : f32
    %77 = vector.broadcast %cst_74 : f32 to vector<64x128xf32>
    %c0_75 = arith.constant 0 : index
    %c1_76 = arith.constant 1 : index
    %c0_77 = arith.constant 0 : index
    %78 = vector.load %arg6[%c0_75, %c1_76, %c0_77] : memref<10x10x128xbf16, #tpu.memory_space<vmem>>, vector<8x8x128xbf16>
    %79 = vector.shape_cast %78 : vector<8x8x128xbf16> to vector<64x128xbf16>
    %c4 = arith.constant 4 : index
    %c0_78 = arith.constant 0 : index
    %c0_79 = arith.constant 0 : index
    %80 = vector.load %arg3[%c4, %c0_78, %c0_79] : memref<16x128x128xbf16, #tpu.memory_space<vmem>>, vector<1x128x128xbf16>
    %81 = vector.shape_cast %80 : vector<1x128x128xbf16> to vector<128x128xbf16>
    %cst_80 = arith.constant dense<0.000000e+00> : vector<64x128xf32>
    %82 = tpu.matmul %79, %81, %cst_80 {dimension_numbers = #tpu.dot_dimension_numbers<[1], [0], [0], [1], [0, 0, 1, 1], [], []>} : vector<64x128xbf16>, vector<128x128xbf16>, vector<64x128xf32> -> vector<64x128xf32>
    %83 = arith.addf %77, %82 : vector<64x128xf32>
    %c0_81 = arith.constant 0 : index
    %c2_82 = arith.constant 2 : index
    %c0_83 = arith.constant 0 : index
    %84 = vector.load %arg6[%c0_81, %c2_82, %c0_83] : memref<10x10x128xbf16, #tpu.memory_space<vmem>>, vector<8x8x128xbf16>
    %85 = vector.shape_cast %84 : vector<8x8x128xbf16> to vector<64x128xbf16>
    %c5 = arith.constant 5 : index
    %c0_84 = arith.constant 0 : index
    %c0_85 = arith.constant 0 : index
    %86 = vector.load %arg3[%c5, %c0_84, %c0_85] : memref<16x128x128xbf16, #tpu.memory_space<vmem>>, vector<1x128x128xbf16>
    %87 = vector.shape_cast %86 : vector<1x128x128xbf16> to vector<128x128xbf16>
    %cst_86 = arith.constant dense<0.000000e+00> : vector<64x128xf32>
    %88 = tpu.matmul %85, %87, %cst_86 {dimension_numbers = #tpu.dot_dimension_numbers<[1], [0], [0], [1], [0, 0, 1, 1], [], []>} : vector<64x128xbf16>, vector<128x128xbf16>, vector<64x128xf32> -> vector<64x128xf32>
    %89 = arith.addf %83, %88 : vector<64x128xf32>
    %c1_87 = arith.constant 1 : index
    %c1_88 = arith.constant 1 : index
    %c0_89 = arith.constant 0 : index
    %90 = vector.load %arg6[%c1_87, %c1_88, %c0_89] : memref<10x10x128xbf16, #tpu.memory_space<vmem>>, vector<8x8x128xbf16>
    %91 = vector.shape_cast %90 : vector<8x8x128xbf16> to vector<64x128xbf16>
    %c6 = arith.constant 6 : index
    %c0_90 = arith.constant 0 : index
    %c0_91 = arith.constant 0 : index
    %92 = vector.load %arg3[%c6, %c0_90, %c0_91] : memref<16x128x128xbf16, #tpu.memory_space<vmem>>, vector<1x128x128xbf16>
    %93 = vector.shape_cast %92 : vector<1x128x128xbf16> to vector<128x128xbf16>
    %cst_92 = arith.constant dense<0.000000e+00> : vector<64x128xf32>
    %94 = tpu.matmul %91, %93, %cst_92 {dimension_numbers = #tpu.dot_dimension_numbers<[1], [0], [0], [1], [0, 0, 1, 1], [], []>} : vector<64x128xbf16>, vector<128x128xbf16>, vector<64x128xf32> -> vector<64x128xf32>
    %95 = arith.addf %89, %94 : vector<64x128xf32>
    %c1_93 = arith.constant 1 : index
    %c2_94 = arith.constant 2 : index
    %c0_95 = arith.constant 0 : index
    %96 = vector.load %arg6[%c1_93, %c2_94, %c0_95] : memref<10x10x128xbf16, #tpu.memory_space<vmem>>, vector<8x8x128xbf16>
    %97 = vector.shape_cast %96 : vector<8x8x128xbf16> to vector<64x128xbf16>
    %c7 = arith.constant 7 : index
    %c0_96 = arith.constant 0 : index
    %c0_97 = arith.constant 0 : index
    %98 = vector.load %arg3[%c7, %c0_96, %c0_97] : memref<16x128x128xbf16, #tpu.memory_space<vmem>>, vector<1x128x128xbf16>
    %99 = vector.shape_cast %98 : vector<1x128x128xbf16> to vector<128x128xbf16>
    %cst_98 = arith.constant dense<0.000000e+00> : vector<64x128xf32>
    %100 = tpu.matmul %97, %99, %cst_98 {dimension_numbers = #tpu.dot_dimension_numbers<[1], [0], [0], [1], [0, 0, 1, 1], [], []>} : vector<64x128xbf16>, vector<128x128xbf16>, vector<64x128xf32> -> vector<64x128xf32>
    %101 = arith.addf %95, %100 : vector<64x128xf32>
    %102 = arith.truncf %101 : vector<64x128xf32> to vector<64x128xbf16>
    %c0_99 = arith.constant 0 : index
    %c1_100 = arith.constant 1 : index
    %c0_101 = arith.constant 0 : index
    %c0_102 = arith.constant 0 : index
    %103 = vector.load %arg4[%c0_99, %c1_100, %c0_101, %c0_102] : memref<1x4x64x128xbf16, #tpu.memory_space<vmem>>, vector<1x1x64x128xbf16>
    %104 = vector.shape_cast %103 : vector<1x1x64x128xbf16> to vector<64x128xbf16>
    %105 = vector.shape_cast %102 : vector<64x128xbf16> to vector<1x1x64x128xbf16>
    tpu.vector_store %arg4[%c0_99, %c1_100, %c0_101, %c0_102], %105 {strides = array<i32>} : memref<1x4x64x128xbf16, #tpu.memory_space<vmem>>, vector<1x1x64x128xbf16>,
    %cst_103 = arith.constant dense<0.000000e+00> : vector<128xf32>
    %106 = vector.multi_reduction <add>, %101, %cst_103 [0] : vector<64x128xf32> to vector<128xf32>
    %107 = vector.shape_cast %106 : vector<128xf32> to vector<1x128xf32>
    %108 = arith.addf %72, %107 : vector<1x128xf32>
    %109 = arith.mulf %101, %101 : vector<64x128xf32>
    %cst_104 = arith.constant dense<0.000000e+00> : vector<128xf32>
    %110 = vector.multi_reduction <add>, %109, %cst_104 [0] : vector<64x128xf32> to vector<128xf32>
    %111 = vector.shape_cast %110 : vector<128xf32> to vector<1x128xf32>
    %112 = arith.addf %76, %111 : vector<1x128xf32>
    %cst_105 = arith.constant 0.000000e+00 : f32
    %113 = vector.broadcast %cst_105 : f32 to vector<64x128xf32>
    %c1_106 = arith.constant 1 : index
    %c0_107 = arith.constant 0 : index
    %c0_108 = arith.constant 0 : index
    %114 = vector.load %arg6[%c1_106, %c0_107, %c0_108] : memref<10x10x128xbf16, #tpu.memory_space<vmem>>, vector<8x8x128xbf16>
    %115 = vector.shape_cast %114 : vector<8x8x128xbf16> to vector<64x128xbf16>
    %c8 = arith.constant 8 : index
    %c0_109 = arith.constant 0 : index
    %c0_110 = arith.constant 0 : index
    %116 = vector.load %arg3[%c8, %c0_109, %c0_110] : memref<16x128x128xbf16, #tpu.memory_space<vmem>>, vector<1x128x128xbf16>
    %117 = vector.shape_cast %116 : vector<1x128x128xbf16> to vector<128x128xbf16>
    %cst_111 = arith.constant dense<0.000000e+00> : vector<64x128xf32>
    %118 = tpu.matmul %115, %117, %cst_111 {dimension_numbers = #tpu.dot_dimension_numbers<[1], [0], [0], [1], [0, 0, 1, 1], [], []>} : vector<64x128xbf16>, vector<128x128xbf16>, vector<64x128xf32> -> vector<64x128xf32>
    %119 = arith.addf %113, %118 : vector<64x128xf32>
    %c1_112 = arith.constant 1 : index
    %c1_113 = arith.constant 1 : index
    %c0_114 = arith.constant 0 : index
    %120 = vector.load %arg6[%c1_112, %c1_113, %c0_114] : memref<10x10x128xbf16, #tpu.memory_space<vmem>>, vector<8x8x128xbf16>
    %121 = vector.shape_cast %120 : vector<8x8x128xbf16> to vector<64x128xbf16>
    %c9 = arith.constant 9 : index
    %c0_115 = arith.constant 0 : index
    %c0_116 = arith.constant 0 : index
    %122 = vector.load %arg3[%c9, %c0_115, %c0_116] : memref<16x128x128xbf16, #tpu.memory_space<vmem>>, vector<1x128x128xbf16>
    %123 = vector.shape_cast %122 : vector<1x128x128xbf16> to vector<128x128xbf16>
    %cst_117 = arith.constant dense<0.000000e+00> : vector<64x128xf32>
    %124 = tpu.matmul %121, %123, %cst_117 {dimension_numbers = #tpu.dot_dimension_numbers<[1], [0], [0], [1], [0, 0, 1, 1], [], []>} : vector<64x128xbf16>, vector<128x128xbf16>, vector<64x128xf32> -> vector<64x128xf32>
    %125 = arith.addf %119, %124 : vector<64x128xf32>
    %c2_118 = arith.constant 2 : index
    %c0_119 = arith.constant 0 : index
    %c0_120 = arith.constant 0 : index
    %126 = vector.load %arg6[%c2_118, %c0_119, %c0_120] : memref<10x10x128xbf16, #tpu.memory_space<vmem>>, vector<8x8x128xbf16>
    %127 = vector.shape_cast %126 : vector<8x8x128xbf16> to vector<64x128xbf16>
    %c10 = arith.constant 10 : index
    %c0_121 = arith.constant 0 : index
    %c0_122 = arith.constant 0 : index
    %128 = vector.load %arg3[%c10, %c0_121, %c0_122] : memref<16x128x128xbf16, #tpu.memory_space<vmem>>, vector<1x128x128xbf16>
    %129 = vector.shape_cast %128 : vector<1x128x128xbf16> to vector<128x128xbf16>
    %cst_123 = arith.constant dense<0.000000e+00> : vector<64x128xf32>
    %130 = tpu.matmul %127, %129, %cst_123 {dimension_numbers = #tpu.dot_dimension_numbers<[1], [0], [0], [1], [0, 0, 1, 1], [], []>} : vector<64x128xbf16>, vector<128x128xbf16>, vector<64x128xf32> -> vector<64x128xf32>
    %131 = arith.addf %125, %130 : vector<64x128xf32>
    %c2_124 = arith.constant 2 : index
    %c1_125 = arith.constant 1 : index
    %c0_126 = arith.constant 0 : index
    %132 = vector.load %arg6[%c2_124, %c1_125, %c0_126] : memref<10x10x128xbf16, #tpu.memory_space<vmem>>, vector<8x8x128xbf16>
    %133 = vector.shape_cast %132 : vector<8x8x128xbf16> to vector<64x128xbf16>
    %c11 = arith.constant 11 : index
    %c0_127 = arith.constant 0 : index
    %c0_128 = arith.constant 0 : index
    %134 = vector.load %arg3[%c11, %c0_127, %c0_128] : memref<16x128x128xbf16, #tpu.memory_space<vmem>>, vector<1x128x128xbf16>
    %135 = vector.shape_cast %134 : vector<1x128x128xbf16> to vector<128x128xbf16>
    %cst_129 = arith.constant dense<0.000000e+00> : vector<64x128xf32>
    %136 = tpu.matmul %133, %135, %cst_129 {dimension_numbers = #tpu.dot_dimension_numbers<[1], [0], [0], [1], [0, 0, 1, 1], [], []>} : vector<64x128xbf16>, vector<128x128xbf16>, vector<64x128xf32> -> vector<64x128xf32>
    %137 = arith.addf %131, %136 : vector<64x128xf32>
    %138 = arith.truncf %137 : vector<64x128xf32> to vector<64x128xbf16>
    %c0_130 = arith.constant 0 : index
    %c2_131 = arith.constant 2 : index
    %c0_132 = arith.constant 0 : index
    %c0_133 = arith.constant 0 : index
    %139 = vector.load %arg4[%c0_130, %c2_131, %c0_132, %c0_133] : memref<1x4x64x128xbf16, #tpu.memory_space<vmem>>, vector<1x1x64x128xbf16>
    %140 = vector.shape_cast %139 : vector<1x1x64x128xbf16> to vector<64x128xbf16>
    %141 = vector.shape_cast %138 : vector<64x128xbf16> to vector<1x1x64x128xbf16>
    tpu.vector_store %arg4[%c0_130, %c2_131, %c0_132, %c0_133], %141 {strides = array<i32>} : memref<1x4x64x128xbf16, #tpu.memory_space<vmem>>, vector<1x1x64x128xbf16>,
    %cst_134 = arith.constant dense<0.000000e+00> : vector<128xf32>
    %142 = vector.multi_reduction <add>, %137, %cst_134 [0] : vector<64x128xf32> to vector<128xf32>
    %143 = vector.shape_cast %142 : vector<128xf32> to vector<1x128xf32>
    %144 = arith.addf %108, %143 : vector<1x128xf32>
    %145 = arith.mulf %137, %137 : vector<64x128xf32>
    %cst_135 = arith.constant dense<0.000000e+00> : vector<128xf32>
    %146 = vector.multi_reduction <add>, %145, %cst_135 [0] : vector<64x128xf32> to vector<128xf32>
    %147 = vector.shape_cast %146 : vector<128xf32> to vector<1x128xf32>
    %148 = arith.addf %112, %147 : vector<1x128xf32>
    %cst_136 = arith.constant 0.000000e+00 : f32
    %149 = vector.broadcast %cst_136 : f32 to vector<64x128xf32>
    %c1_137 = arith.constant 1 : index
    %c1_138 = arith.constant 1 : index
    %c0_139 = arith.constant 0 : index
    %150 = vector.load %arg6[%c1_137, %c1_138, %c0_139] : memref<10x10x128xbf16, #tpu.memory_space<vmem>>, vector<8x8x128xbf16>
    %151 = vector.shape_cast %150 : vector<8x8x128xbf16> to vector<64x128xbf16>
    %c12 = arith.constant 12 : index
    %c0_140 = arith.constant 0 : index
    %c0_141 = arith.constant 0 : index
    %152 = vector.load %arg3[%c12, %c0_140, %c0_141] : memref<16x128x128xbf16, #tpu.memory_space<vmem>>, vector<1x128x128xbf16>
    %153 = vector.shape_cast %152 : vector<1x128x128xbf16> to vector<128x128xbf16>
    %cst_142 = arith.constant dense<0.000000e+00> : vector<64x128xf32>
    %154 = tpu.matmul %151, %153, %cst_142 {dimension_numbers = #tpu.dot_dimension_numbers<[1], [0], [0], [1], [0, 0, 1, 1], [], []>} : vector<64x128xbf16>, vector<128x128xbf16>, vector<64x128xf32> -> vector<64x128xf32>
    %155 = arith.addf %149, %154 : vector<64x128xf32>
    %c1_143 = arith.constant 1 : index
    %c2_144 = arith.constant 2 : index
    %c0_145 = arith.constant 0 : index
    %156 = vector.load %arg6[%c1_143, %c2_144, %c0_145] : memref<10x10x128xbf16, #tpu.memory_space<vmem>>, vector<8x8x128xbf16>
    %157 = vector.shape_cast %156 : vector<8x8x128xbf16> to vector<64x128xbf16>
    %c13 = arith.constant 13 : index
    %c0_146 = arith.constant 0 : index
    %c0_147 = arith.constant 0 : index
    %158 = vector.load %arg3[%c13, %c0_146, %c0_147] : memref<16x128x128xbf16, #tpu.memory_space<vmem>>, vector<1x128x128xbf16>
    %159 = vector.shape_cast %158 : vector<1x128x128xbf16> to vector<128x128xbf16>
    %cst_148 = arith.constant dense<0.000000e+00> : vector<64x128xf32>
    %160 = tpu.matmul %157, %159, %cst_148 {dimension_numbers = #tpu.dot_dimension_numbers<[1], [0], [0], [1], [0, 0, 1, 1], [], []>} : vector<64x128xbf16>, vector<128x128xbf16>, vector<64x128xf32> -> vector<64x128xf32>
    %161 = arith.addf %155, %160 : vector<64x128xf32>
    %c2_149 = arith.constant 2 : index
    %c1_150 = arith.constant 1 : index
    %c0_151 = arith.constant 0 : index
    %162 = vector.load %arg6[%c2_149, %c1_150, %c0_151] : memref<10x10x128xbf16, #tpu.memory_space<vmem>>, vector<8x8x128xbf16>
    %163 = vector.shape_cast %162 : vector<8x8x128xbf16> to vector<64x128xbf16>
    %c14 = arith.constant 14 : index
    %c0_152 = arith.constant 0 : index
    %c0_153 = arith.constant 0 : index
    %164 = vector.load %arg3[%c14, %c0_152, %c0_153] : memref<16x128x128xbf16, #tpu.memory_space<vmem>>, vector<1x128x128xbf16>
    %165 = vector.shape_cast %164 : vector<1x128x128xbf16> to vector<128x128xbf16>
    %cst_154 = arith.constant dense<0.000000e+00> : vector<64x128xf32>
    %166 = tpu.matmul %163, %165, %cst_154 {dimension_numbers = #tpu.dot_dimension_numbers<[1], [0], [0], [1], [0, 0, 1, 1], [], []>} : vector<64x128xbf16>, vector<128x128xbf16>, vector<64x128xf32> -> vector<64x128xf32>
    %167 = arith.addf %161, %166 : vector<64x128xf32>
    %c2_155 = arith.constant 2 : index
    %c2_156 = arith.constant 2 : index
    %c0_157 = arith.constant 0 : index
    %168 = vector.load %arg6[%c2_155, %c2_156, %c0_157] : memref<10x10x128xbf16, #tpu.memory_space<vmem>>, vector<8x8x128xbf16>
    %169 = vector.shape_cast %168 : vector<8x8x128xbf16> to vector<64x128xbf16>
    %c15 = arith.constant 15 : index
    %c0_158 = arith.constant 0 : index
    %c0_159 = arith.constant 0 : index
    %170 = vector.load %arg3[%c15, %c0_158, %c0_159] : memref<16x128x128xbf16, #tpu.memory_space<vmem>>, vector<1x128x128xbf16>
    %171 = vector.shape_cast %170 : vector<1x128x128xbf16> to vector<128x128xbf16>
    %cst_160 = arith.constant dense<0.000000e+00> : vector<64x128xf32>
    %172 = tpu.matmul %169, %171, %cst_160 {dimension_numbers = #tpu.dot_dimension_numbers<[1], [0], [0], [1], [0, 0, 1, 1], [], []>} : vector<64x128xbf16>, vector<128x128xbf16>, vector<64x128xf32> -> vector<64x128xf32>
    %173 = arith.addf %167, %172 : vector<64x128xf32>
    %174 = arith.truncf %173 : vector<64x128xf32> to vector<64x128xbf16>
    %c0_161 = arith.constant 0 : index
    %c3_162 = arith.constant 3 : index
    %c0_163 = arith.constant 0 : index
    %c0_164 = arith.constant 0 : index
    %175 = vector.load %arg4[%c0_161, %c3_162, %c0_163, %c0_164] : memref<1x4x64x128xbf16, #tpu.memory_space<vmem>>, vector<1x1x64x128xbf16>
    %176 = vector.shape_cast %175 : vector<1x1x64x128xbf16> to vector<64x128xbf16>
    %177 = vector.shape_cast %174 : vector<64x128xbf16> to vector<1x1x64x128xbf16>
    tpu.vector_store %arg4[%c0_161, %c3_162, %c0_163, %c0_164], %177 {strides = array<i32>} : memref<1x4x64x128xbf16, #tpu.memory_space<vmem>>, vector<1x1x64x128xbf16>,
    %cst_165 = arith.constant dense<0.000000e+00> : vector<128xf32>
    %178 = vector.multi_reduction <add>, %173, %cst_165 [0] : vector<64x128xf32> to vector<128xf32>
    %179 = vector.shape_cast %178 : vector<128xf32> to vector<1x128xf32>
    %180 = arith.addf %144, %179 : vector<1x128xf32>
    %181 = arith.mulf %173, %173 : vector<64x128xf32>
    %cst_166 = arith.constant dense<0.000000e+00> : vector<128xf32>
    %182 = vector.multi_reduction <add>, %181, %cst_166 [0] : vector<64x128xf32> to vector<128xf32>
    %183 = vector.shape_cast %182 : vector<128xf32> to vector<1x128xf32>
    %184 = arith.addf %148, %183 : vector<1x128xf32>
    %c0_167 = arith.constant 0 : index
    %c0_168 = arith.constant 0 : index
    %c0_169 = arith.constant 0 : index
    %185 = vector.load %arg5[%c0_167, %c0_168, %c0_169] : memref<1x2x128xf32, #tpu.memory_space<vmem>>, vector<1x1x128xf32>
    %186 = vector.shape_cast %185 : vector<1x1x128xf32> to vector<1x128xf32>
    %187 = vector.shape_cast %180 : vector<1x128xf32> to vector<1x1x128xf32>
    tpu.vector_store %arg5[%c0_167, %c0_168, %c0_169], %187 {strides = array<i32>} : memref<1x2x128xf32, #tpu.memory_space<vmem>>, vector<1x1x128xf32>,
    %c0_170 = arith.constant 0 : index
    %c1_171 = arith.constant 1 : index
    %c0_172 = arith.constant 0 : index
    %188 = vector.load %arg5[%c0_170, %c1_171, %c0_172] : memref<1x2x128xf32, #tpu.memory_space<vmem>>, vector<1x1x128xf32>
    %189 = vector.shape_cast %188 : vector<1x1x128xf32> to vector<1x128xf32>
    %190 = vector.shape_cast %184 : vector<1x128xf32> to vector<1x1x128xf32>
    tpu.vector_store %arg5[%c0_170, %c1_171, %c0_172], %190 {strides = array<i32>} : memref<1x2x128xf32, #tpu.memory_space<vmem>>, vector<1x1x128xf32>,
    return
  }
  func.func @transform_0(%arg0: i32) -> (i32, i32, i32, i32) {
    %c0_i32 = arith.constant 0 : i32
    %c0_i32_0 = arith.constant 0 : i32
    %c0_i32_1 = arith.constant 0 : i32
    %c0_i32_2 = arith.constant 0 : i32
    return %arg0, %c0_i32, %c0_i32_0, %c0_i32_1 : i32, i32, i32, i32
  }
  func.func @transform_1(%arg0: i32) -> (i32, i32, i32) {
    %c0_i32 = arith.constant 0 : i32
    %c0_i32_0 = arith.constant 0 : i32
    %c0_i32_1 = arith.constant 0 : i32
    %c0_i32_2 = arith.constant 0 : i32
    return %c0_i32, %c0_i32_0, %c0_i32_1 : i32, i32, i32
  }
  func.func @transform_2(%arg0: i32) -> (i32, i32, i32) {
    %c0_i32 = arith.constant 0 : i32
    %c0_i32_0 = arith.constant 0 : i32
    %c0_i32_1 = arith.constant 0 : i32
    %c0_i32_2 = arith.constant 0 : i32
    return %c0_i32, %c0_i32_0, %c0_i32_1 : i32, i32, i32
  }
  func.func @transform_3(%arg0: i32) -> (i32, i32, i32, i32) {
    %c0_i32 = arith.constant 0 : i32
    %c0_i32_0 = arith.constant 0 : i32
    %c0_i32_1 = arith.constant 0 : i32
    %c0_i32_2 = arith.constant 0 : i32
    return %arg0, %c0_i32, %c0_i32_0, %c0_i32_1 : i32, i32, i32, i32
  }
  func.func @transform_4(%arg0: i32) -> (i32, i32, i32) {
    %c0_i32 = arith.constant 0 : i32
    %c0_i32_0 = arith.constant 0 : i32
    %c0_i32_1 = arith.constant 0 : i32
    return %arg0, %c0_i32, %c0_i32_0 : i32, i32, i32
  }
}

</mosaic_0001>

<bundles_post_ra>
// kernel: unet_innermost_forward.1
= control target key start
LH: loop header
LB: loop body
LE: loop exit
PB: predicated region body
PF: predicated region fallthrough
CT: control target
= control target key end

     0   :  { %s6904_s15 = smov 0   ;;  %s8044_s0 = inlined_call_operand.vmem [shape: bf16[2,9,9,16], index: 0, kind: input, shape index: {}]   ;;  %s8045_s1 = inlined_call_operand.vmem [shape: bf16[4,16,128], index: 1, kind: input, shape index: {}]   ;;  %s8046_s2 = inlined_call_operand.vmem [shape: bf16[16,128,128], index: 2, kind: input, shape index: {}]   ;;  %s8047_s3 = inlined_call_operand.vmem [shape: bf16[2,4,64,128], index: 3, kind: output, shape index: {0}]   ;;  %s8048_s4 = inlined_call_operand.vmem [shape: f32[2,2,128], index: 4, kind: output, shape index: {1}]  }
   0x1 LB: > { %s5199_s16 = sadd.s32 4294967295, %s6876_s15   ;;  %p5203_p0 = scmp.ge.s32.totalorder %s6876_s15, 1  ;;  %s6876_s15 = sphi %s6904_s15, %s15_s15  }
   0x2   : > { %p165_p1 = scmp.lt.s32.totalorder %s6876_s15, 3 }
   0x4   : > { %p166_p2 = pnand %p5203_p0, %p165_p1 }
   0x5   : > { %v6706_v0 = vld [vmem:[%s8045_s1 + $0x8] sm:$0xff] (!%p166_p2)   ;;  %p195_p3 = scmp.lt.s32.totalorder (!%p166_p2), %s5199_s16, 1  ;;  %v6918_v1 = vld [vmem:[%s8045_s1] sm:$0xff] (!%p166_p2)   ;;  %vm228_vm0 = vsmask.f32 (!%p166_p2), 3328  ;;  %vm364_vm2 = vcmask (!%p166_p2), 130048  }
   0x6   : > { %169 = sbr.rel (%p166_p2) target bundleno = 842 (0x34a), region = 32  ;;  %6152 = vmatprep.subr.bf16.mxu0 (!%p166_p2), %v6706_v0  ;;  %vm229_vm1 = vsmask.f32 (!%p166_p2), 7440  ;;  %vm1051_vm4 = vcmask (!%p166_p2), 1043456   ;;  %vm1052_vm5 = vsmask.f32 (!%p166_p2), 7938 }
   0x7   : > { %6153 = vmatpush3.bf16.msra.mxu0 (!%p166_p2), %v6706_v0  ;;  %vm6958_vm3 = vmor (!%p166_p2), %vm228_vm0, %vm229_vm1  ;;  %vm1058_vm6 = vsmask.f32 (!%p166_p2), 256  ;;  %vm1057_vm8 = vcmask (!%p166_p2), 1040384  }
   0x8   : > { %6162 = vmatprep.subr.bf16.mxu0 (!%p166_p2), %v6918_v1  ;;  %vm7159_vm12 = vmand (!%p166_p2), %vm1051_vm4, %vm1052_vm5  ;;  %vm2230_vm4 = vcmask (!%p166_p2), 1046532  }
   0x9   : > { %vm7165_vm13 = vmand (!%p166_p2), %vm1057_vm8, %vm1058_vm6 }
   0xd   : > { %s8058_s16 = smov (!%p195_p3, %s5199_s16), 1 }
   0xe   : > { %s6696_s21 = smul.u32 72, %s8058_s16  ;;  %s5207_s25 = sshll.u32 %s8058_s16, 1 }
   0xf   : > { %s208_s28 = scalar_lea.vmem %s8048_s4, %s5207_s25 }
  0x10   : > { %s6927_s24 = scalar_lea.vmem %s8044_s0, %s6696_s21  ;;  %s5804_s21 = sshll.u32 %s8058_s16, 7 }
  0x11   : > { %v6930_v2 = vld [vmem:[%s6927_s24] sm:$0xf]  ;;  %v6933_v3 = vld [vmem:[%s6927_s24 + $0x8] sm:$0xf]  ;;  %v220_v4 = vld [vmem:[%s6927_s24 + $0x4] sm:$0x1] }
  0x12   : > { %v221_v5 = vld [vmem:[%s6927_s24 + $0xc] sm:$0x1]  ;;  %v232_v6 = vshrl.u32 %v6930_v2, 16  ;;  %v235_v7 = vshll.u32 %v6930_v2, 16  ;;  %v241_v8 = vshll.u32 %v220_v4, 16  ;;  %v246_v9 = vshrl.u32 %v6933_v3, 16 }
  0x13   : > { %v249_v10 = vshll.u32 %v6933_v3, 16  ;;  %v255_v11 = vshll.u32 %v221_v5, 16  ;;  %v6942_v12 = vld [vmem:[%s6927_s24 + $0x10] sm:$0xf]  ;;  %v6945_v13 = vld [vmem:[%s6927_s24 + $0x18] sm:$0xf] }
  0x14   : > { %v234_v14 = vrot.slane %v232_v6, 4  ;;  %v237_v15 = vrot.slane %v235_v7, 5  ;;  %v243_v16 = vrot.slane %v241_v8, 5  ;;  %v248_v17 = vrot.slane %v246_v9, 4  ;;  %v222_v18 = vld [vmem:[%s6927_s24 + $0x14] sm:$0x1] }
  0x15   : > { %v251_v19 = vrot.slane %v249_v10, 5  ;;  %v257_v20 = vrot.slane %v255_v11, 5  ;;  %v223_v21 = vld [vmem:[%s6927_s24 + $0x1c] sm:$0x1]  ;;  %v260_v22 = vshrl.u32 %v6942_v12, 16  ;;  %v263_v23 = vshll.u32 %v6942_v12, 16 }
  0x16   : > { %v238_v24 = vor.u32 %v237_v15, %v234_v14  ;;  %v269_v25 = vshll.u32 %v222_v18, 16  ;;  %v274_v26 = vshrl.u32 %v6945_v13, 16  ;;  %v277_v27 = vshll.u32 %v6945_v13, 16  ;;  %v6954_v28 = vld [vmem:[%s6927_s24 + $0x20] sm:$0xf]  ;;  %v6993_v11 = vld [vmem:[%s8045_s1 + $0x10] sm:$0xff]  }
  0x17   : > { %v252_v30 = vor.u32 %v251_v19, %v248_v17  ;;  %v262_v31 = vrot.slane %v260_v22, 4  ;;  %v265_v32 = vrot.slane %v263_v23, 5  ;;  %v283_v33 = vshll.u32 %v223_v21, 16  ;;  %v6963_v34 = vld [vmem:[%s6927_s24 + $0x28] sm:$0xf] }
  0x18   : > { %v239_v35 = vrot.slane %v238_v24, 4  ;;  %v271_v36 = vrot.slane %v269_v25, 5  ;;  %v276_v37 = vrot.slane %v274_v26, 4  ;;  %v279_v38 = vrot.slane %v277_v27, 5  ;;  %v224_v39 = vld [vmem:[%s6927_s24 + $0x24] sm:$0x1] }
  0x19   : > { %v253_v40 = vrot.slane %v252_v30, 4  ;;  %v266_v41 = vor.u32 %v265_v32, %v262_v31  ;;  %v285_v42 = vrot.slane %v283_v33, 5  ;;  %v288_v43 = vshrl.u32 %v6954_v28, 16  ;;  %v225_v46 = vld [vmem:[%s6927_s24 + $0x2c] sm:$0x1] }
  0x1a   : > { %v244_v44 = vsel %vm6958_vm3, %v239_v35, %v243_v16  ;;  %v280_v45 = vor.u32 %v279_v38, %v276_v37  ;;  %v291_v47 = vshll.u32 %v6954_v28, 16  ;;  %v297_v48 = vshll.u32 %v224_v39, 16  ;;  %v6975_v53 = vld [vmem:[%s6927_s24 + $0x30] sm:$0xf]  ;;  %v6978_v57 = vld [vmem:[%s6927_s24 + $0x38] sm:$0xf] }
  0x1b   : > { %v258_v49 = vsel %vm6958_vm3, %v253_v40, %v257_v20  ;;  %v267_v50 = vrot.slane %v266_v41, 4  ;;  %v290_v51 = vrot.slane %v288_v43, 4  ;;  %v302_v52 = vshrl.u32 %v6963_v34, 16  ;;  %v226_v58 = vld [vmem:[%s6927_s24 + $0x34] sm:$0x1] }
  0x1c   : > { %v5210_v54 = vcombine.low %v244_v44, %v258_v49  ;;  %v281_v55 = vrot.slane %v280_v45, 4  ;;  %v293_v56 = vrot.slane %v291_v47, 5  ;;  %v305_v61 = vshll.u32 %v6963_v34, 16  ;;  %v227_v4 = vld [vmem:[%s6927_s24 + $0x3c] sm:$0x1] }
  0x1d   : > { %v272_v59 = vsel %vm6958_vm3, %v267_v50, %v271_v36  ;;  %v304_v60 = vrot.slane %v302_v52, 4  ;;  %v311_v62 = vshll.u32 %v225_v46, 16  ;;  %v316_v5 = vshrl.u32 %v6975_v53, 16  ;;  %v5248_v35 = vld [vmem:[%s6927_s24 + $0xc] sm:$0x1] }
  0x1e   : > { %6154 = vmatprep.mubr.msk.bf16.mxu0 %vm364_vm2, %v5210_v54  ;;  %v286_v63 = vsel %vm6958_vm3, %v281_v55, %v285_v42  ;;  %v294_v0 = vor.u32 %v293_v56, %v290_v51  ;;  %v319_v6 = vshll.u32 %v6975_v53, 16  ;;  %v299_v8 = vrot.slane %v297_v48, 5  ;;  %v5249_v38 = vld [vmem:[%s6927_s24 + $0x10] sm:$0xf]  ;;  %v5250_v39 = vld [vmem:[%s6927_s24 + $0x14] sm:$0x1] }
  0x1f   : > { %v5211_v7 = vcombine.low %v272_v59, %v286_v63  ;;  %v307_v9 = vrot.slane %v305_v61, 5  ;;  %v325_v10 = vshll.u32 %v226_v58, 16  ;;  %v318_v15 = vrot.slane %v316_v5, 4  ;;  %v5251_v46 = vld [vmem:[%s6927_s24 + $0x18] sm:$0xf] }
  0x20   : > { %v295_v14 = vrot.slane %v294_v0, 4  ;;  %v321_v16 = vrot.slane %v319_v6, 5  ;;  %v330_v17 = vshrl.u32 %v6978_v57, 16  ;;  %v313_v19 = vrot.slane %v311_v62, 5  ;;  %v5253_v55 = vld [vmem:[%s6927_s24 + $0x20] sm:$0xf] }
  0x21   : > { %6155 = vmatmul.mubr.msk.bf16.vlgmr.msra.gmra.mrb[0].mxu0 %vm364_vm2, %v5211_v7  ;;  %v308_v18 = vor.u32 %v307_v9, %v304_v60  ;;  %v333_v20 = vshll.u32 %v6978_v57, 16  ;;  %v339_v21 = vshll.u32 %v227_v4, 16  ;;  %v327_v26 = vrot.slane %v325_v10, 5  ;;  %v5255_v59 = vld [vmem:[%s6927_s24 + $0x28] sm:$0xf] }
  0x22   : > { %6163 = vmatpush3.bf16.msra.mxu0 %v6918_v1  ;;  %v322_v22 = vor.u32 %v321_v16, %v318_v15  ;;  %v332_v23 = vrot.slane %v330_v17, 4  ;;  %v300_v24 = vsel %vm6958_vm3, %v295_v14, %v299_v8  ;;  %v5247_v1 = vld [vmem:[%s6927_s24 + $0x8] sm:$0xf]  ;;  %v5219_v37 = vcombine.low %v6930_v2, %v6933_v3  ;;  %v5252_v2 = vld [vmem:[%s6927_s24 + $0x1c] sm:$0x1] }
  0x23   : > { %v309_v25 = vrot.slane %v308_v18, 4  ;;  %v335_v27 = vrot.slane %v333_v20, 5  ;;  %6172 = vmatprep.subr.bf16.mxu0 %v6993_v11  ;;  %v341_v33 = vrot.slane %v339_v21, 5  ;;  %v685_v40 = vshrl.u32 %v5247_v1, 16  ;;  %v5254_v61 = vld [vmem:[%s6927_s24 + $0x24] sm:$0x1] }
  0x24   : > { %v323_v30 = vrot.slane %v322_v22, 4  ;;  %v688_v41 = vshll.u32 %v5247_v1, 16  ;;  %v699_v44 = vshrl.u32 %v5249_v38, 16  ;;  %v702_v45 = vshll.u32 %v5249_v38, 16  ;;  %v5257_v15 = vld [vmem:[%s6927_s24 + $0x30] sm:$0xf] }
  0x25   : > { %v314_v31 = vsel %vm6958_vm3, %v309_v25, %v313_v19  ;;  %v336_v32 = vor.u32 %v335_v27, %v332_v23  ;;  %v687_v47 = vrot.slane %v685_v40, 4  ;;  %v694_v49 = vshll.u32 %v5248_v35, 16  ;;  %v5256_v20 = vld [vmem:[%s6927_s24 + $0x2c] sm:$0x1]  ;;  %v5258_v21 = vld [vmem:[%s6927_s24 + $0x34] sm:$0x1] }
  0x26   : > { %v5212_v36 = vcombine.low %v300_v24, %v314_v31  ;;  %v328_v42 = vsel %vm6958_vm3, %v323_v30, %v327_v26  ;;  %v690_v48 = vrot.slane %v688_v41, 5  ;;  %v713_v3 = vshrl.u32 %v5251_v46, 16  ;;  %v5259_v24 = vld [vmem:[%s6927_s24 + $0x38] sm:$0xf]  ;;  %v5262_v38 = vld [vmem:[%s6927_s24 + $0x44] sm:$0x1] }
  0x27   : > { %v337_v43 = vrot.slane %v336_v32, 4  ;;  %v701_v51 = vrot.slane %v699_v44, 4  ;;  %v704_v52 = vrot.slane %v702_v45, 5  ;;  %v708_v54 = vshll.u32 %v5250_v39, 16  ;;  %v6714_v26 = vld [vmem:[%s8045_s1 + $0x18] sm:$0xff]  }
  0x28   : > { %6158 = vmatprep.mubr.msk.bf16.mxu0 %vm364_vm2, %v5212_v36  ;;  %v691_v58 = vor.u32 %v690_v48, %v687_v47  ;;  %v716_v62 = vshll.u32 %v5251_v46, 16  ;;  %v722_v63 = vshll.u32 %v5252_v2, 16  ;;  %v727_v0 = vshrl.u32 %v5253_v55, 16  ;;  %v5260_v32 = vld [vmem:[%s6927_s24 + $0x3c] sm:$0x1] }
  0x29   : > { %v342_v50 = vsel %vm6958_vm3, %v337_v43, %v341_v33  ;;  %v705_v60 = vor.u32 %v704_v52, %v701_v51  ;;  %v7021_v4 = vrot.slane %v694_v49, 5  ;;  %v715_v5 = vrot.slane %v713_v3, 4  ;;  %v5261_v33 = vld [vmem:[%s6927_s24 + $0x40] sm:$0xf]  ;;  %v6713_v51 = vld [vmem:[%s6927_s24 + $0x8] ss:$8 sps:$4 sm:$0xff]  }
  0x2a   : > { %v5213_v56 = vcombine.low %v328_v42, %v342_v50  ;;  %v730_v6 = vshll.u32 %v5253_v55, 16  ;;  %v741_v7 = vshrl.u32 %v5255_v59, 16  ;;  %v7024_v8 = vrot.slane %v691_v58, 4 }
  0x2b   : > { %v7026_v9 = vrot.slane %v708_v54, 5  ;;  %v718_v10 = vrot.slane %v716_v62, 5  ;;  %v729_v14 = vrot.slane %v727_v0, 4  ;;  %v7029_v16 = vrot.slane %v705_v60, 4  ;;  %v6715_v0 = vld [vmem:[%s6927_s24 + $0x18] ss:$8 sps:$4 sm:$0xff]  }
  0x2c   : > { %6159 = vmatmul.mubr.msk.bf16.gmra.mrb[4].mxu0 %vm364_vm2, %v5213_v56  ;;  %v7031_v17 = vrot.slane %v722_v63, 5  ;;  %v732_v18 = vrot.slane %v730_v6, 5  ;;  %v736_v19 = vshll.u32 %v5254_v61, 16  ;;  %v743_v22 = vrot.slane %v741_v7, 4 }
  0x2d   : > { %6164 = vmatprep.mubr.msk.bf16.mxu0 %vm364_vm2, %v5219_v37  ;;  %v744_v23 = vshll.u32 %v5255_v59, 16  ;;  %v5220_v25 = vcombine.low %v6942_v12, %v6945_v13  ;;  %v719_v27 = vor.u32 %v718_v10, %v715_v5  ;;  %v755_v30 = vshrl.u32 %v5257_v15, 16  ;;  %v6716_v5 = vld [vmem:[%s6927_s24 + $0x28] ss:$8 sps:$4 sm:$0xff]  }
  0x2e   : > { %v758_v31 = vshll.u32 %v5257_v15, 16  ;;  %v5221_v1 = vcombine.low %v6954_v28, %v6963_v34  ;;  %v733_v35 = vor.u32 %v732_v18, %v729_v14  ;;  %v750_v37 = vshll.u32 %v5256_v20, 16  ;;  %v6719_v20 = vld [vmem:[%s8046_s2 + $0x100] sm:$0xff]  }
  0x2f   : > { %v746_v36 = vrot.slane %v744_v23, 5  ;;  %v757_v39 = vrot.slane %v755_v30, 4  ;;  %v764_v41 = vshll.u32 %v5258_v21, 16  ;;  %v769_v12 = vshrl.u32 %v5259_v24, 16  ;;  %v6721_v23 = vld [vmem:[%s8046_s2 + $0x108] sm:$0xff]   ;;  %v6726_v30 = vld [vmem:[%s8046_s2 + $0x60] sm:$0xff]  }
  0x30   : > { %v760_v40 = vrot.slane %v758_v31, 5  ;;  %v738_v13 = vrot.slane %v736_v19, 5  ;;  %v772_v43 = vshll.u32 %v5259_v24, 16  ;;  %v720_v44 = vrot.slane %v719_v27, 4  ;;  %v6718_v19 = vld [vmem:[%s8046_s2 + $0x40] sm:$0xff]   ;;  %v6722_v24 = vld [vmem:[%s8046_s2 + $0x50] sm:$0xff]  }
  0x31   : > { %v747_v42 = vor.u32 %v746_v36, %v743_v22  ;;  %v771_v46 = vrot.slane %v769_v12, 4  ;;  %v752_v28 = vrot.slane %v750_v37, 5  ;;  %v778_v47 = vshll.u32 %v5260_v32, 16  ;;  %6192 = vmatprep.subr.bf16.mxu1 %v6718_v19  ;;  %v6720_v22 = vld [vmem:[%s8046_s2 + $0x48] sm:$0xff]   ;;  %v6725_v27 = vld [vmem:[%s8046_s2 + $0x118] sm:$0xff]   ;;  %v6727_v31 = vld [vmem:[%s8046_s2 + $0x120] sm:$0xff]  }
  0x32   : > { %v761_v45 = vor.u32 %v760_v40, %v757_v39  ;;  %v774_v34 = vrot.slane %v772_v43, 5  ;;  %v783_v48 = vshrl.u32 %v5261_v33, 16  ;;  %v734_v49 = vrot.slane %v733_v35, 4  ;;  %6193 = vmatpush3.bf16.msra.mxu1 %v6718_v19  ;;  %v6728_v32 = vld [vmem:[%s8046_s2 + $0x68] sm:$0xff]   ;;  %v6731_v35 = vld [vmem:[%s8046_s2 + $0x130] sm:$0xff]   ;;  %v6732_v36 = vld [vmem:[%s8046_s2 + $0x78] sm:$0xff]  }
  0x33   : > { %v766_v2 = vrot.slane %v764_v41, 5  ;;  %v786_v3 = vshll.u32 %v5261_v33, 16  ;;  %v792_v50 = vshll.u32 %v5262_v38, 16  ;;  %v748_v52 = vrot.slane %v747_v42, 4  ;;  %6194 = vmatprep.subr.bf16.mxu1 %v6720_v22  ;;  %v6729_v33 = vld [vmem:[%s8046_s2 + $0x128] sm:$0xff]   ;;  %v6733_v37 = vld [vmem:[%s8046_s2 + $0x138] sm:$0xff]  }
  0x34   : > { %6165 = vmatmul.mubr.msk.bf16.vlgmr.msra.gmra.mrb[0].mxu0 %vm364_vm2, %v5220_v25  ;;  %v785_v54 = vrot.slane %v783_v48, 4  ;;  %v5222_v55 = vcombine.low %v6975_v53, %v6978_v57  ;;  %v775_v56 = vor.u32 %v774_v34, %v771_v46  ;;  %v780_v59 = vrot.slane %v778_v47, 5  ;;  %v6717_v53 = vld [vmem:[%s6927_s24 + $0x38] ss:$8 sps:$4 sm:$0xff]   ;;  %v6723_v25 = vld [vmem:[%s8046_s2 + $0x110] sm:$0xff]   ;;  %s8009_s24 = scalar_lea.vmem %s8047_s3, %s5804_s21 }
  0x35   : > { %6173 = vmatpush3.bf16.msra.mxu0 %v6993_v11  ;;  %6168 = vmatprep.mubr.msk.bf16.mxu0 %vm364_vm2, %v5221_v1  ;;  %v762_v11 = vrot.slane %v761_v45, 4  ;;  %v788_v58 = vrot.slane %v786_v3, 5  ;;  %v794_v60 = vrot.slane %v792_v50, 5  ;;  %v697_v57 = vsel %vm6958_vm3, %v7024_v8, %v7021_v4  ;;  %v6730_v1 = vld [vmem:[%s8046_s2 + $0x70] sm:$0xff]   ;;  %v7136_v38 = vld [vmem:[%s8046_s2] sm:$0xff]  }
  0x36   : > { %6182 = vmatprep.subr.bf16.mxu0 %v6714_v26  ;;  %v776_v62 = vrot.slane %v775_v56, 4  ;;  %v711_v6 = vsel %vm6958_vm3, %v7029_v16, %v7026_v9  ;;  %v725_v10 = vsel %vm6958_vm3, %v720_v44, %v7031_v17  ;;  %v739_v14 = vsel %vm6958_vm3, %v734_v49, %v738_v13  ;;  %6195 = vmatpush3.bf16.msra.mxu1 %v6720_v22  ;;  %v7141_v39 = vld [vmem:[%s8046_s2 + $0x180] sm:$0xff]  }
  0x37   : > { %v789_v61 = vor.u32 %v788_v58, %v785_v54  ;;  %v5265_v7 = vcombine.low %v697_v57, %v711_v6  ;;  %v753_v4 = vsel %vm6958_vm3, %v748_v52, %v752_v28  ;;  %v767_v8 = vsel %vm6958_vm3, %v762_v11, %v766_v2  ;;  %6196 = vmatprep.subr.bf16.mxu1 %v6722_v24 }
  0x38   : > { %v5266_v15 = vcombine.low %v725_v10, %v739_v14  ;;  %v5267_v9 = vcombine.low %v753_v4, %v767_v8  ;;  %v781_v16 = vsel %vm6958_vm3, %v776_v62, %v780_v59  ;;  %v6878_v21 = vmov 0  }
  0x39   : > { %v790_v63 = vrot.slane %v789_v61, 4  ;;  %936 = vst [vmem:[#allocation2 + $0x18] sm:$0xf] %v6878_v21  ;;  %937 = vst [vmem:[#allocation2 + $0x1c] sm:$0x1] %v6878_v21 }
  0x3a   : > { %930 = vst [vmem:[#allocation2] sm:$0xf] %v6878_v21  ;;  %931 = vst [vmem:[#allocation2 + $0x4] sm:$0x1] %v6878_v21  ;;  %6197 = vmatpush3.bf16.msra.mxu1 %v6722_v24 }
  0x3b   : > { %v795_v17 = vsel %vm6958_vm3, %v790_v63, %v794_v60  ;;  %932 = vst [vmem:[#allocation2 + $0x8] sm:$0xf] %v6878_v21  ;;  %933 = vst [vmem:[#allocation2 + $0xc] sm:$0x1] %v6878_v21 }
  0x3c   : > { %6169 = vmatmul.mubr.msk.bf16.gmra.mrb[4].mxu0 %vm364_vm2, %v5222_v55  ;;  %v5268_v18 = vcombine.low %v781_v16, %v795_v17  ;;  %934 = vst [vmem:[#allocation2 + $0x10] sm:$0xf] %v6878_v21  ;;  %935 = vst [vmem:[#allocation2 + $0x14] sm:$0x1] %v6878_v21 }
  0x3d   : > { %6174 = vmatprep.mubr.msk.bf16.mxu0 %vm364_vm2, %v6713_v51  ;;  %938 = vst [vmem:[#allocation2 + $0x20] sm:$0xf] %v6878_v21  ;;  %939 = vst [vmem:[#allocation2 + $0x24] sm:$0x1] %v6878_v21 }
  0x3e   : > { %940 = vst [vmem:[#allocation2 + $0x28] sm:$0xf] %v6878_v21  ;;  %941 = vst [vmem:[#allocation2 + $0x2c] sm:$0x1] %v6878_v21 }
  0x3f   : > { %942 = vst [vmem:[#allocation2 + $0x30] sm:$0xf] %v6878_v21  ;;  %943 = vst [vmem:[#allocation2 + $0x34] sm:$0x1] %v6878_v21 }
  0x40   : > { %944 = vst [vmem:[#allocation2 + $0x38] sm:$0xf] %v6878_v21  ;;  %945 = vst [vmem:[#allocation2 + $0x3c] sm:$0x1] %v6878_v21  ;;  %v1069_v14 = vld [vmem:[#allocation2 + $0x18] sm:$0xf] }
  0x41   : > { %946 = vst [vmem:[#allocation2 + $0x40] sm:$0xf] %v6878_v21  ;;  %947 = vst [vmem:[#allocation2 + $0x44] sm:$0x1] %v6878_v21  ;;  %v7145_v40 = vld [vmem:[#allocation2] sm:$0xf] }
  0x42   : > { %948 = vst [vmem:[#allocation2 + $0x48] sm:$0xf] %v6878_v21  ;;  %949 = vst [vmem:[#allocation2 + $0x4c] sm:$0x1] %v6878_v21  ;;  %v2060_v41 = vld [vmem:[#allocation2] sm:$0xf] }
  0x43   : > { %v1138_v12 = vshrl.u32 %v7145_v40, 16  ;;  %v1141_v13 = vshll.u32 %v7145_v40, 16  ;;  %v2077_v42 = vshrl.u32 %v2060_v41, 16  ;;  %v2080_v43 = vshll.u32 %v2060_v41, 16  ;;  %v1129_v44 = vld [vmem:[#allocation2 + $0x4] sm:$0x1] }
  0x44   : > { %6175 = vmatmul.mubr.msk.bf16.vlgmr.msra.gmra.mrb[0].mxu0 %vm364_vm2, %v6715_v0  ;;  %v1147_v48 = vshll.u32 %v1129_v44, 16  ;;  %v2061_v50 = vld [vmem:[#allocation2 + $0x4] sm:$0x1]  ;;  %v1072_v4 = vld [vmem:[#allocation2 + $0x1c] sm:$0x1] }
  0x45   : > { %6183 = vmatpush3.bf16.msra.mxu0 %v6714_v26  ;;  %6178 = vmatprep.mubr.msk.bf16.mxu0 %vm364_vm2, %v6716_v5  ;;  %v6724_v26 = vld [vmem:[%s8046_s2 + $0x58] sm:$0xff]   ;;  %v1140_v45 = vrot.slane %v1138_v12, 4  ;;  %v1143_v46 = vrot.slane %v1141_v13, 5  ;;  %v2079_v28 = vrot.slane %v2077_v42, 4  ;;  %v2082_v34 = vrot.slane %v2080_v43, 5 }
  0x46   : > { %6312 = vmatprep.subr.bf16.mxu0 %v6719_v20  ;;  %6198 = vmatprep.subr.bf16.mxu1 %v6724_v26  ;;  %v2086_v54 = vshll.u32 %v2061_v50, 16  ;;  %v7151_v5 = vrot.slane %v1147_v48, 5  ;;  %v1054_v19 = vld [vmem:[#allocation2 + $0x8] sm:$0xf]  ;;  %v1078_v12 = vld [vmem:[#allocation2 + $0x24] sm:$0x1] }
  0x47   : > { %6199 = vmatpush3.bf16.msra.mxu1 %v6724_v26  ;;  %v1144_v3 = vor.u32 %v1143_v46, %v1140_v45  ;;  %v2083_v58 = vor.u32 %v2082_v34, %v2079_v28  ;;  %v1075_v26 = vld [vmem:[#allocation2 + $0x20] sm:$0xf]  ;;  %v1063_v28 = vld [vmem:[#allocation2 + $0x10] sm:$0xf]  ;;  %v1066_v34 = vld [vmem:[#allocation2 + $0x14] sm:$0x1] }
  0x48   : > { %6200 = vmatprep.subr.bf16.mxu1 %v6726_v30 }
  0x49   : > { %v7149_v0 = vrot.slane %v1144_v3, 4 }
  0x4b   : > { %6201 = vmatpush3.bf16.msra.mxu1 %v6726_v30 }
  0x4c   : > { %6179 = vmatmul.mubr.msk.bf16.gmra.mrb[4].mxu0 %vm364_vm2, %v6717_v53  ;;  %6202 = vmatprep.subr.bf16.mxu1 %v6728_v32 }
  0x4d   : > { %6184 = vmatprep.mubr.msk.bf16.mxu0 %vm364_vm2, %v5265_v7  ;;  %v7153_v7 = vrot.slane %v2086_v54, 5 }
  0x4f   : > { %6203 = vmatpush3.bf16.msra.mxu1 %v6728_v32 }
  0x50   : > { %6204 = vmatprep.subr.bf16.mxu1 %v6730_v1 }
  0x53   : > { %6205 = vmatpush3.bf16.msra.mxu1 %v6730_v1 }
  0x54   : > { %6185 = vmatmul.mubr.msk.bf16.vlgmr.msra.gmra.mrb[0].mxu0 %vm364_vm2, %v5266_v15  ;;  %6206 = vmatprep.subr.bf16.mxu1 %v6732_v36 }
  0x55   : > { %6188 = vmatprep.mubr.msk.bf16.mxu0 %vm364_vm2, %v5267_v9  ;;  %6313 = vmatpush3.bf16.msra.mxu0 %v6719_v20  ;;  %v7155_v9 = vrot.slane %v2083_v58, 4  ;;  %v1060_v20 = vld [vmem:[#allocation2 + $0xc] sm:$0x1] }
  0x56   : > { %6314 = vmatprep.subr.bf16.mxu0 %v6721_v23 }
  0x57   : > { %6207 = vmatpush3.bf16.msra.mxu1 %v6732_v36 }
  0x58   : > { %6216 = vmatprep.subr.bf16.mxu1 %v7136_v38 }
  0x59   : > { %6315 = vmatpush3.bf16.msra.mxu0 %v6721_v23 }
  0x5a   : > { %6316 = vmatprep.subr.bf16.mxu0 %v6723_v25 }
  0x5c   : > { %6189 = vmatmul.mubr.msk.bf16.gmra.mrb[4].mxu0 %vm364_vm2, %v5268_v18  ;;  %vm2229_vm2 = vcmask 1042432  }
  0x5d   : > { %6317 = vmatpush3.bf16.msra.mxu0 %v6723_v25  ;;  %vm7390_vm5 = vmor %vm2229_vm2, %vm2230_vm4 }
  0x5e   : > { %6318 = vmatprep.subr.bf16.mxu0 %v6725_v27 }
  0x61   : > { %6319 = vmatpush3.bf16.msra.mxu0 %v6725_v27 }
  0x62   : > { %6320 = vmatprep.subr.bf16.mxu0 %v6727_v31 }
  0x65   : > { %6321 = vmatpush3.bf16.msra.mxu0 %v6727_v31 }
  0x66   : > { %6322 = vmatprep.subr.bf16.mxu0 %v6729_v33 }
  0x69   : > { %6323 = vmatpush3.bf16.msra.mxu0 %v6729_v33 }
  0x6a   : > { %6324 = vmatprep.subr.bf16.mxu0 %v6731_v35 }
  0x6d   : > { %6325 = vmatpush3.bf16.msra.mxu0 %v6731_v35 }
  0x6e   : > { %6326 = vmatprep.subr.bf16.mxu0 %v6733_v37 }
  0x71   : > { %6327 = vmatpush3.bf16.msra.mxu0 %v6733_v37 }
  0x72   : > { %6336 = vmatprep.subr.bf16.mxu0 %v7141_v39 }
 0x127   : > { %v6186_v47 = vpop.f32.mrb[0].mxu0 }
 0x128   : > { %vm904_vm7 = vcmp.ge.f32.partialorder %v6186_v47, 0.0  ;;  %v912_v49 = vmul.f32 0.2, %v6186_v47  ;;  %v863_v2 = vpop.f32.mrb[1].mxu0 }
 0x129   : > { %vm902_vm9 = vcmp.ge.f32.partialorder %v863_v2, 0.0  ;;  %v910_v51 = vmul.f32 0.2, %v863_v2  ;;  %v6187_v52 = vpop.f32.mrb[2].mxu0 }
 0x12a   : > { %v920_v55 = vsel %vm904_vm7, %v6186_v47, %v912_v49  ;;  %vm905_vm10 = vcmp.ge.f32.partialorder %v6187_v52, 0.0  ;;  %v913_v11 = vmul.f32 0.2, %v6187_v52  ;;  %v866_v56 = vpop.f32.mrb[3].mxu0 }
 0x12b   : > { %v5807_v59 = vpack.c.bf16 %v920_v55, %v920_v55  ;;  %v918_v60 = vsel %vm902_vm9, %v863_v2, %v910_v51  ;;  %vm903_vm11 = vcmp.ge.f32.partialorder %v866_v56, 0.0  ;;  %v911_v61 = vmul.f32 0.2, %v866_v56 }
 0x12c   : > { %v5805_v62 = vpack.c.bf16 %v918_v60, %v918_v60  ;;  %v921_v63 = vsel %vm905_vm10, %v6187_v52, %v913_v11 }
 0x12d   : > { %v987_v53 = vshrl.u32 %v5807_v59, 16  ;;  %v5808_v57 = vpack.c.bf16 %v921_v63, %v921_v63  ;;  %v919_v6 = vsel %vm903_vm11, %v866_v56, %v911_v61  ;;  %v990_v10 = vshll.u32 %v5807_v59, 16 }
 0x12e   : > { %v971_v8 = vshrl.u32 %v5805_v62, 16  ;;  %v5806_v15 = vpack.c.bf16 %v919_v6, %v919_v6  ;;  %v974_v18 = vshll.u32 %v5805_v62, 16  ;;  %v1093_v62 = vld [vmem:[#allocation2 + $0x38] sm:$0xf] }
 0x12f   : > { %v989_v16 = vrot.slane %v987_v53, 7  ;;  %v995_v21 = vshrl.u32 %v5808_v57, 16  ;;  %v998_v22 = vshll.u32 %v5808_v57, 16  ;;  %v6190_v23 = vpop.f32.mrb[4].mxu0 }
 0x130   : > { %v973_v25 = vrot.slane %v971_v8, 7  ;;  %v979_v27 = vshrl.u32 %v5806_v15, 16  ;;  %v982_v30 = vshll.u32 %v5806_v15, 16  ;;  %vm908_vm14 = vcmp.ge.f32.partialorder %v6190_v23, 0.0  ;;  %v879_v31 = vpop.f32.mrb[5].mxu0 }
 0x131   : > { %v992_v32 = vor.u32 %v990_v10, %v989_v16  ;;  %v993_v33 = vrot.slane %v989_v16, 4  ;;  %v997_v1 = vrot.slane %v995_v21, 7  ;;  %v916_v35 = vmul.f32 0.2, %v6190_v23  ;;  %v6191_v36 = vpop.f32.mrb[6].mxu0 }
 0x132   : > { %v976_v37 = vor.u32 %v974_v18, %v973_v25  ;;  %v977_v41 = vrot.slane %v973_v25, 4  ;;  %v981_v13 = vrot.slane %v979_v27, 7  ;;  %vm906_vm15 = vcmp.ge.f32.partialorder %v879_v31, 0.0  ;;  %v882_v42 = vpop.f32.mrb[7].mxu0  ;;  %v1096_v10 = vld [vmem:[#allocation2 + $0x3c] sm:$0x1] }
 0x133   : > { %v1070_v43 = vsel %vm7159_vm12, %v992_v32, %v1069_v14  ;;  %v1073_v44 = vsel %vm7165_vm13, %v993_v33, %v1072_v4  ;;  %v1000_v45 = vor.u32 %v998_v22, %v997_v1  ;;  %v1001_v46 = vrot.slane %v997_v1, 4  ;;  %v1081_v15 = vld [vmem:[#allocation2 + $0x28] sm:$0xf]  ;;  %v1084_v16 = vld [vmem:[#allocation2 + $0x2c] sm:$0x1] }
 0x134   : > { %1071 = vst [vmem:[#allocation2 + $0x18] sm:$0xf] %v1070_v43  ;;  %1074 = vst [vmem:[#allocation2 + $0x1c] sm:$0x1] %v1073_v44  ;;  %v1055_v47 = vsel %vm7159_vm12, %v976_v37, %v1054_v19  ;;  %v1061_v48 = vsel %vm7165_vm13, %v977_v41, %v1060_v20  ;;  %v984_v49 = vor.u32 %v982_v30, %v981_v13  ;;  %v985_v2 = vrot.slane %v981_v13, 4 }
 0x135   : > { %1056 = vst [vmem:[#allocation2 + $0x8] sm:$0xf] %v1055_v47  ;;  %1062 = vst [vmem:[#allocation2 + $0xc] sm:$0x1] %v1061_v48  ;;  %v1076_v3 = vsel %vm7159_vm12, %v1000_v45, %v1075_v26  ;;  %v1079_v50 = vsel %vm7165_vm13, %v1001_v46, %v1078_v12  ;;  %v924_v51 = vsel %vm908_vm14, %v6190_v23, %v916_v35  ;;  %v914_v52 = vmul.f32 0.2, %v879_v31 }
 0x136   : > { %1077 = vst [vmem:[#allocation2 + $0x20] sm:$0xf] %v1076_v3  ;;  %1080 = vst [vmem:[#allocation2 + $0x24] sm:$0x1] %v1079_v50  ;;  %v1064_v54 = vsel %vm7159_vm12, %v984_v49, %v1063_v28  ;;  %v1067_v55 = vsel %vm7165_vm13, %v985_v2, %v1066_v34  ;;  %v5811_v11 = vpack.c.bf16 %v924_v51, %v924_v51  ;;  %vm909_vm0 = vcmp.ge.f32.partialorder %v6191_v36, 0.0 }
 0x137   : > { %1065 = vst [vmem:[#allocation2 + $0x10] sm:$0xf] %v1064_v54  ;;  %1068 = vst [vmem:[#allocation2 + $0x14] sm:$0x1] %v1067_v55  ;;  %v922_v56 = vsel %vm906_vm15, %v879_v31, %v914_v52  ;;  %v917_v58 = vmul.f32 0.2, %v6191_v36  ;;  %v1150_v19 = vsel %vm6958_vm3, %v7149_v0, %v7151_v5  ;;  %v2089_v20 = vsel %vm6958_vm3, %v7155_v9, %v7153_v7 }
 0x138   : > { %vm907_vm1 = vcmp.ge.f32.partialorder %v882_v42, 0.0  ;;  %v915_v59 = vmul.f32 0.2, %v882_v42  ;;  %v1019_v60 = vshrl.u32 %v5811_v11, 16  ;;  %v5809_v61 = vpack.c.bf16 %v922_v56, %v922_v56  ;;  %v1099_v41 = vld [vmem:[#allocation2 + $0x40] sm:$0xf] }
 0x139   : > { %v925_v63 = vsel %vm909_vm0, %v6191_v36, %v917_v58  ;;  %v1022_v6 = vshll.u32 %v5811_v11, 16  ;;  %v1102_v12 = vld [vmem:[#allocation2 + $0x44] sm:$0x1]  ;;  %v1087_v44 = vld [vmem:[#allocation2 + $0x30] sm:$0xf] }
 0x13a   : > { %v923_v53 = vsel %vm907_vm1, %v882_v42, %v915_v59  ;;  %v1021_v57 = vrot.slane %v1019_v60, 7  ;;  %v1003_v14 = vshrl.u32 %v5809_v61, 16  ;;  %v5812_v4 = vpack.c.bf16 %v925_v63, %v925_v63  ;;  %v1090_v47 = vld [vmem:[#allocation2 + $0x34] sm:$0x1] }
 0x13b   : > { %v1006_v8 = vshll.u32 %v5809_v61, 16  ;;  %v5810_v18 = vpack.c.bf16 %v923_v53, %v923_v53  ;;  %v7207_v2 = vld [vmem:[#allocation2 + $0x18] sm:$0xf] }
 0x13c   : > { %v1024_v21 = vor.u32 %v1022_v6, %v1021_v57  ;;  %v1025_v22 = vrot.slane %v1021_v57, 4  ;;  %v1005_v23 = vrot.slane %v1003_v14, 7  ;;  %v1027_v25 = vshrl.u32 %v5812_v4, 16  ;;  %v7195_v26 = vld [vmem:[#allocation2 + $0x8] sm:$0xf] }
 0x13d   : > { %v1030_v27 = vshll.u32 %v5812_v4, 16  ;;  %v1011_v30 = vshrl.u32 %v5810_v18, 16  ;;  %v1014_v31 = vshll.u32 %v5810_v18, 16  ;;  %v1130_v32 = vld [vmem:[#allocation2 + $0xc] sm:$0x1]  ;;  %v1152_v33 = vshrl.u32 %v7195_v26, 16 }
 0x13e   : > { %v1094_v1 = vsel %vm7159_vm12, %v1024_v21, %v1093_v62  ;;  %v1097_v35 = vsel %vm7165_vm13, %v1025_v22, %v1096_v10  ;;  %v1008_v36 = vor.u32 %v1006_v8, %v1005_v23  ;;  %v1009_v37 = vrot.slane %v1005_v23, 4  ;;  %v2062_v13 = vld [vmem:[#allocation2 + $0x8] sm:$0xf]  ;;  %v2063_v54 = vld [vmem:[#allocation2 + $0xc] sm:$0x1] }
 0x13f   : > { %1095 = vst [vmem:[#allocation2 + $0x38] sm:$0xf] %v1094_v1  ;;  %1098 = vst [vmem:[#allocation2 + $0x3c] sm:$0x1] %v1097_v35  ;;  %v1029_v42 = vrot.slane %v1027_v25, 7  ;;  %v1013_v43 = vrot.slane %v1011_v30, 7 }
 0x140   : > { %v1154_v45 = vrot.slane %v1152_v33, 4  ;;  %v1155_v46 = vshll.u32 %v7195_v26, 16  ;;  %v1082_v28 = vsel %vm7159_vm12, %v1008_v36, %v1081_v15  ;;  %v1085_v34 = vsel %vm7165_vm13, %v1009_v37, %v1084_v16  ;;  %v7209_v55 = vld [vmem:[#allocation2 + $0x10] sm:$0xf]  ;;  %v1131_v60 = vld [vmem:[#allocation2 + $0x14] sm:$0x1] }
 0x141   : > { %v1161_v48 = vshll.u32 %v1130_v32, 16  ;;  %v2091_v49 = vshrl.u32 %v2062_v13, 16  ;;  %1083 = vst [vmem:[#allocation2 + $0x28] sm:$0xf] %v1082_v28  ;;  %1086 = vst [vmem:[#allocation2 + $0x2c] sm:$0x1] %v1085_v34  ;;  %v1032_v3 = vor.u32 %v1030_v27, %v1029_v42  ;;  %v1016_v51 = vor.u32 %v1014_v31, %v1013_v43 }
 0x142   : > { %v1033_v50 = vrot.slane %v1029_v42, 4  ;;  %v1017_v52 = vrot.slane %v1013_v43, 4  ;;  %v1157_v11 = vrot.slane %v1155_v46, 5  ;;  %v2094_v59 = vshll.u32 %v2062_v13, 16  ;;  %v1132_v14 = vld [vmem:[#allocation2 + $0x1c] sm:$0x1] }
 0x143   : > { %v1163_v56 = vrot.slane %v1161_v48, 5  ;;  %v2093_v58 = vrot.slane %v2091_v49, 4  ;;  %v1100_v61 = vsel %vm7159_vm12, %v1032_v3, %v1099_v41  ;;  %v1088_v63 = vsel %vm7159_vm12, %v1016_v51, %v1087_v44  ;;  %v2064_v18 = vld [vmem:[#allocation2 + $0x10] sm:$0xf]  ;;  %v2065_v32 = vld [vmem:[#allocation2 + $0x14] sm:$0x1] }
 0x144   : > { %v1103_v62 = vsel %vm7165_vm13, %v1033_v50, %v1102_v12  ;;  %v1091_v53 = vsel %vm7165_vm13, %v1017_v52, %v1090_v47  ;;  %1101 = vst [vmem:[#allocation2 + $0x40] sm:$0xf] %v1100_v61  ;;  %1089 = vst [vmem:[#allocation2 + $0x30] sm:$0xf] %v1088_v63  ;;  %v1158_v57 = vor.u32 %v1157_v11, %v1154_v45  ;;  %v2096_v6 = vrot.slane %v2094_v59, 5 }
 0x145   : > { %1104 = vst [vmem:[#allocation2 + $0x44] sm:$0x1] %v1103_v62  ;;  %1092 = vst [vmem:[#allocation2 + $0x34] sm:$0x1] %v1091_v53  ;;  %v2100_v10 = vshll.u32 %v2063_v54, 16  ;;  %v1166_v4 = vshrl.u32 %v7209_v55, 16 }
 0x146   : > { %v1169_v8 = vshll.u32 %v7209_v55, 16  ;;  %v1175_v15 = vshll.u32 %v1131_v60, 16  ;;  %v1180_v16 = vshrl.u32 %v7207_v2, 16  ;;  %v1183_v17 = vshll.u32 %v7207_v2, 16  ;;  %v2066_v13 = vld [vmem:[#allocation2 + $0x18] sm:$0xf] }
 0x147   : > { %v1159_v24 = vrot.slane %v1158_v57, 4  ;;  %v2097_v21 = vor.u32 %v2096_v6, %v2093_v58  ;;  %v2102_v22 = vrot.slane %v2100_v10, 5  ;;  %v1168_v23 = vrot.slane %v1166_v4, 4  ;;  %v2067_v42 = vld [vmem:[#allocation2 + $0x1c] sm:$0x1]  ;;  %v6736_v60 = vld [vmem:[%s8046_s2 + $0x8] sm:$0xff]  }
 0x148   : > { %v1171_v25 = vrot.slane %v1169_v8, 5  ;;  %v1177_v27 = vrot.slane %v1175_v15, 5  ;;  %v1182_v30 = vrot.slane %v1180_v16, 4  ;;  %v1185_v31 = vrot.slane %v1183_v17, 5  ;;  %v7232_v34 = vld [vmem:[#allocation2 + $0x20] sm:$0xf] }
 0x149   : > { %v1164_v33 = vsel %vm6958_vm3, %v1159_v24, %v1163_v56  ;;  %v2098_v1 = vrot.slane %v2097_v21, 4  ;;  %v1189_v35 = vshll.u32 %v1132_v14, 16  ;;  %v2105_v36 = vshrl.u32 %v2064_v18, 16  ;;  %v1133_v50 = vld [vmem:[#allocation2 + $0x24] sm:$0x1] }
 0x14a   : > { %v5298_v37 = vcombine.low %v1150_v19, %v1164_v33  ;;  %v1172_v41 = vor.u32 %v1171_v25, %v1168_v23  ;;  %v1186_v12 = vor.u32 %v1185_v31, %v1182_v30  ;;  %v2108_v43 = vshll.u32 %v2064_v18, 16  ;;  %v7243_v11 = vld [vmem:[#allocation2 + $0x28] sm:$0xf]  ;;  %v2068_v9 = vld [vmem:[#allocation2 + $0x20] sm:$0xf] }
 0x14b   : > { %v2103_v44 = vsel %vm6958_vm3, %v2098_v1, %v2102_v22  ;;  %v1191_v45 = vrot.slane %v1189_v35, 5  ;;  %v2107_v46 = vrot.slane %v2105_v36, 4  ;;  %v2114_v28 = vshll.u32 %v2065_v32, 16  ;;  %v1134_v61 = vld [vmem:[#allocation2 + $0x2c] sm:$0x1] }
 0x14c   : > { %6208 = vmatprep.mubr.bf16.mxu1 %v5298_v37  ;;  %v5438_v0 = vcombine.low %v2089_v20, %v2103_v44  ;;  %v1173_v5 = vrot.slane %v1172_v41, 4  ;;  %v1187_v19 = vrot.slane %v1186_v12, 4  ;;  %v2110_v47 = vrot.slane %v2108_v43, 5  ;;  %v2069_v8 = vld [vmem:[#allocation2 + $0x24] sm:$0x1] }
 0x14d   : > { %v2119_v48 = vshrl.u32 %v2066_v13, 16  ;;  %v2122_v49 = vshll.u32 %v2066_v13, 16  ;;  %v2128_v3 = vshll.u32 %v2067_v42, 16  ;;  %v1194_v7 = vshrl.u32 %v7232_v34, 16  ;;  %v2070_v18 = vld [vmem:[#allocation2 + $0x28] sm:$0xf] }
 0x14e   : > { %6328 = vmatprep.mubr.bf16.mxu0 %v5438_v0  ;;  %v1178_v51 = vsel %vm6958_vm3, %v1173_v5, %v1177_v27  ;;  %v1192_v52 = vsel %vm6958_vm3, %v1187_v19, %v1191_v45  ;;  %v2111_v54 = vor.u32 %v2110_v47, %v2107_v46  ;;  %v2116_v56 = vrot.slane %v2114_v28, 5  ;;  %v6738_v27 = vld [vmem:[%s8046_s2 + $0x10] sm:$0xff]   ;;  %v2071_v31 = vld [vmem:[#allocation2 + $0x2c] sm:$0x1]  ;;  %v6741_v19 = vld [vmem:[%s8046_s2 + $0x18] sm:$0xff]  }
 0x14f   : > { %v5299_v20 = vcombine.low %v1178_v51, %v1192_v52  ;;  %v2121_v58 = vrot.slane %v2119_v48, 4  ;;  %v2124_v59 = vrot.slane %v2122_v49, 5  ;;  %v1196_v63 = vrot.slane %v1194_v7, 4  ;;  %v7260_v41 = vld [vmem:[#allocation2 + $0x30] sm:$0xf]  ;;  %v6737_v13 = vld [vmem:[%s8046_s2 + $0x188] sm:$0xff]  }
 0x150   : > { %v2112_v62 = vrot.slane %v2111_v54, 4  ;;  %v1197_v53 = vshll.u32 %v7232_v34, 16  ;;  %v1203_v57 = vshll.u32 %v1133_v50, 16  ;;  %v2130_v10 = vrot.slane %v2128_v3, 5  ;;  %v1135_v45 = vld [vmem:[#allocation2 + $0x34] sm:$0x1] }
 0x151   : > { %6209 = vmatmul.mubr.bf16.vlgmr.msra.gmra.mrb[0].mxu1 %v5299_v20  ;;  %v2125_v6 = vor.u32 %v2124_v59, %v2121_v58  ;;  %v1208_v14 = vshrl.u32 %v7243_v11, 16  ;;  %v1211_v4 = vshll.u32 %v7243_v11, 16  ;;  %v1217_v17 = vshll.u32 %v1134_v61, 16  ;;  %v7268_v49 = vld [vmem:[#allocation2 + $0x38] sm:$0xf]  ;;  %v6739_v7 = vld [vmem:[%s8046_s2 + $0x190] sm:$0xff]  }
 0x152   : > { %6217 = vmatpush3.bf16.msra.mxu1 %v7136_v38  ;;  %v2117_v15 = vsel %vm6958_vm3, %v2112_v62, %v2116_v56  ;;  %v1199_v16 = vrot.slane %v1197_v53, 5  ;;  %v2133_v24 = vshrl.u32 %v2068_v9, 16  ;;  %v1205_v22 = vrot.slane %v1203_v57, 5  ;;  %v2072_v56 = vld [vmem:[#allocation2 + $0x30] sm:$0xf]  ;;  %v6743_v62 = vld [vmem:[%s8046_s2 + $0x20] sm:$0xff]  }
 0x153   : > { %v2126_v21 = vrot.slane %v2125_v6, 4  ;;  %6218 = vmatprep.subr.bf16.mxu1 %v6736_v60  ;;  %v1210_v23 = vrot.slane %v1208_v14, 4  ;;  %v1213_v25 = vrot.slane %v1211_v4, 5  ;;  %v2136_v38 = vshll.u32 %v2068_v9, 16  ;;  %v1136_v9 = vld [vmem:[#allocation2 + $0x3c] sm:$0x1] }
 0x154   : > { %v1200_v30 = vor.u32 %v1199_v16, %v1196_v63  ;;  %v2135_v32 = vrot.slane %v2133_v24, 4  ;;  %v2142_v33 = vshll.u32 %v2069_v8, 16  ;;  %v2147_v36 = vshrl.u32 %v2070_v18, 16 }
 0x155   : > { %v2131_v1 = vsel %vm6958_vm3, %v2126_v21, %v2130_v10  ;;  %v1214_v35 = vor.u32 %v1213_v25, %v1210_v23  ;;  %v2150_v37 = vshll.u32 %v2070_v18, 16  ;;  %v1219_v43 = vrot.slane %v1217_v17, 5  ;;  %v2074_v10 = vld [vmem:[#allocation2 + $0x38] sm:$0xf]  ;;  %v2539_v21 = vld [vmem:[#allocation2 + $0x8] sm:$0xf] }
 0x156   : > { %v5439_v12 = vcombine.low %v2117_v15, %v2131_v1  ;;  %6219 = vmatpush3.bf16.msra.mxu1 %v6736_v60  ;;  %v1201_v42 = vrot.slane %v1200_v30, 4  ;;  %v2138_v44 = vrot.slane %v2136_v38, 5  ;;  %v2149_v28 = vrot.slane %v2147_v36, 4  ;;  %v6745_v36 = vld [vmem:[%s8046_s2 + $0x28] sm:$0xff]  }
 0x157   : > { %v1215_v46 = vrot.slane %v1214_v35, 4  ;;  %v2152_v0 = vrot.slane %v2150_v37, 5  ;;  %v2156_v5 = vshll.u32 %v2071_v31, 16  ;;  %6220 = vmatprep.subr.bf16.mxu1 %v6738_v27  ;;  %v2144_v48 = vrot.slane %v2142_v33, 5  ;;  %v6742_v31 = vld [vmem:[%s8046_s2 + $0x198] sm:$0xff]  }
 0x158   : > { %6329 = vmatmul.mubr.bf16.vlgmr.msra.gmra.mrb[8].mxu0 %v5439_v12  ;;  %v2139_v47 = vor.u32 %v2138_v44, %v2135_v32  ;;  %v1222_v3 = vshrl.u32 %v7260_v41, 16  ;;  %v1225_v50 = vshll.u32 %v7260_v41, 16  ;;  %v1206_v51 = vsel %vm6958_vm3, %v1201_v42, %v1205_v22  ;;  %v2541_v35 = vld [vmem:[#allocation2 + $0x10] sm:$0xf] }
 0x159   : > { %6337 = vmatpush3.bf16.msra.mxu0 %v7141_v39  ;;  %v1220_v52 = vsel %vm6958_vm3, %v1215_v46, %v1219_v43  ;;  %v2153_v54 = vor.u32 %v2152_v0, %v2149_v28  ;;  %v1231_v20 = vshll.u32 %v1135_v45, 16  ;;  %v2073_v39 = vld [vmem:[#allocation2 + $0x34] sm:$0x1]  ;;  %v2158_v53 = vrot.slane %v2156_v5, 5  ;;  %v7297_v46 = vld [vmem:[#allocation2 + $0xc] sm:$0x1] }
 0x15a   : > { %6338 = vmatprep.subr.bf16.mxu0 %v6737_v13  ;;  %v5300_v58 = vcombine.low %v1206_v51, %v1220_v52  ;;  %v2140_v59 = vrot.slane %v2139_v47, 4  ;;  %v1224_v60 = vrot.slane %v1222_v3, 4  ;;  %v1227_v61 = vrot.slane %v1225_v50, 5  ;;  %6221 = vmatpush3.bf16.msra.mxu1 %v6738_v27  ;;  %v2075_v27 = vld [vmem:[#allocation2 + $0x3c] sm:$0x1]  ;;  %v6744_v47 = vld [vmem:[%s8046_s2 + $0x1a0] sm:$0xff]  }
 0x15b   : > { %v2154_v63 = vrot.slane %v2153_v54, 4  ;;  %v1236_v57 = vshrl.u32 %v7268_v49, 16  ;;  %v1239_v6 = vshll.u32 %v7268_v49, 16  ;;  %6222 = vmatprep.subr.bf16.mxu1 %v6741_v19  ;;  %v1245_v8 = vshll.u32 %v1136_v9, 16  ;;  %v7299_v0 = vld [vmem:[#allocation2 + $0x14] sm:$0x1] }
 0x15c   : > { %6212 = vmatprep.mubr.bf16.mxu1 %v5300_v58  ;;  %v2145_v14 = vsel %vm6958_vm3, %v2140_v59, %v2144_v48  ;;  %v1228_v4 = vor.u32 %v1227_v61, %v1224_v60  ;;  %v2161_v15 = vshrl.u32 %v2072_v56, 16  ;;  %v2164_v24 = vshll.u32 %v2072_v56, 16  ;;  %v6747_v52 = vld [vmem:[%s8046_s2 + $0x30] sm:$0xff]   ;;  %v2543_v54 = vld [vmem:[#allocation2 + $0x18] sm:$0xf] }
 0x15d   : > { %6339 = vmatpush3.bf16.msra.mxu0 %v6737_v13  ;;  %v2159_v16 = vsel %vm6958_vm3, %v2154_v63, %v2158_v53  ;;  %v1238_v17 = vrot.slane %v1236_v57, 4  ;;  %v1241_v18 = vrot.slane %v1239_v6, 5  ;;  %v1233_v25 = vrot.slane %v1231_v20, 5  ;;  %v6746_v6 = vld [vmem:[%s8046_s2 + $0x1a8] sm:$0xff]  }
 0x15e   : > { %v5440_v22 = vcombine.low %v2145_v14, %v2159_v16  ;;  %6340 = vmatprep.subr.bf16.mxu0 %v6739_v7  ;;  %v1229_v23 = vrot.slane %v1228_v4, 4  ;;  %v2163_v30 = vrot.slane %v2161_v15, 4  ;;  %6223 = vmatpush3.bf16.msra.mxu1 %v6741_v19  ;;  %v2166_v38 = vrot.slane %v2164_v24, 5  ;;  %v7323_v16 = vld [vmem:[#allocation2 + $0x1c] sm:$0x1] }
 0x15f   : > { %v1242_v32 = vor.u32 %v1241_v18, %v1238_v17  ;;  %v2170_v33 = vshll.u32 %v2073_v39, 16  ;;  %v2175_v1 = vshrl.u32 %v2074_v10, 16  ;;  %6224 = vmatprep.subr.bf16.mxu1 %v6743_v62  ;;  %v1247_v12 = vrot.slane %v1245_v8, 5  ;;  %v2545_v39 = vld [vmem:[#allocation2 + $0x20] sm:$0xf] }
 0x160   : > { %6332 = vmatprep.mubr.bf16.mxu0 %v5440_v22  ;;  %v1234_v37 = vsel %vm6958_vm3, %v1229_v23, %v1233_v25  ;;  %v2178_v13 = vshll.u32 %v2074_v10, 16  ;;  %v2167_v43 = vor.u32 %v2166_v38, %v2163_v30  ;;  %v2184_v45 = vshll.u32 %v2075_v27, 16  ;;  %v2547_v25 = vld [vmem:[#allocation2 + $0x28] sm:$0xf]  ;;  %v6748_v30 = vld [vmem:[%s8046_s2 + $0x1b0] sm:$0xff]  }
 0x161   : > { %v1243_v42 = vrot.slane %v1242_v32, 4  ;;  %v2177_v44 = vrot.slane %v2175_v1, 4  ;;  %6341 = vmatpush3.bf16.msra.mxu0 %v6739_v7  ;;  %v2556_v5 = vshrl.u32 %v2539_v21, 16  ;;  %v2559_v19 = vshll.u32 %v2539_v21, 16  ;;  %v7325_v21 = vld [vmem:[#allocation2 + $0x24] sm:$0x1] }
 0x162   : > { %v2180_v28 = vrot.slane %v2178_v13, 5  ;;  %6342 = vmatprep.subr.bf16.mxu0 %v6742_v31  ;;  %6225 = vmatpush3.bf16.msra.mxu1 %v6743_v62  ;;  %v2168_v3 = vrot.slane %v2167_v43, 4  ;;  %v2172_v50 = vrot.slane %v2170_v33, 5  ;;  %v2570_v51 = vshrl.u32 %v2541_v35, 16  ;;  %v2549_v38 = vld [vmem:[#allocation2 + $0x30] sm:$0xf] }
 0x163   : > { %v1248_v48 = vsel %vm6958_vm3, %v1243_v42, %v1247_v12  ;;  %6226 = vmatprep.subr.bf16.mxu1 %v6745_v36  ;;  %v2558_v20 = vrot.slane %v2556_v5, 4  ;;  %v2561_v56 = vrot.slane %v2559_v19, 5  ;;  %v2186_v58 = vrot.slane %v2184_v45, 5  ;;  %v7336_v42 = vld [vmem:[#allocation2 + $0x2c] sm:$0x1] }
 0x164   : > { %v5301_v7 = vcombine.low %v1234_v37, %v1248_v48  ;;  %v2181_v9 = vor.u32 %v2180_v28, %v2177_v44  ;;  %v5310_v59 = vcombine.low %v7145_v40, %v7195_v26  ;;  %v2572_v60 = vrot.slane %v2570_v51, 4  ;;  %v6749_v40 = vld [vmem:[%s8046_s2 + $0x38] sm:$0xff]   ;;  %v7346_v48 = vld [vmem:[#allocation2 + $0x34] sm:$0x1] }
 0x165   : > { %v2573_v61 = vshll.u32 %v2541_v35, 16  ;;  %6343 = vmatpush3.bf16.msra.mxu0 %v6742_v31  ;;  %v2173_v62 = vsel %vm6958_vm3, %v2168_v3, %v2172_v50  ;;  %v2562_v53 = vor.u32 %v2561_v56, %v2558_v20  ;;  %v2565_v57 = vshll.u32 %v7297_v46, 16  ;;  %v2551_v51 = vld [vmem:[#allocation2 + $0x38] sm:$0xf]  ;;  %v2553_v20 = vld [vmem:[#allocation2 + $0x40] sm:$0xf] }
 0x166   : > { %6213 = vmatmul.mubr.bf16.gmra.mrb[4].mxu1 %v5301_v7  ;;  %v2182_v63 = vrot.slane %v2181_v9, 4  ;;  %6344 = vmatprep.subr.bf16.mxu0 %v6744_v47  ;;  %v2579_v10 = vshll.u32 %v7299_v0, 16  ;;  %v2584_v14 = vshrl.u32 %v2543_v54, 16  ;;  %v2587_v4 = vshll.u32 %v2543_v54, 16 }
 0x167   : > { %6232 = vmatprep.mubr.bf16.mxu1 %v5310_v59  ;;  %v2575_v26 = vrot.slane %v2573_v61, 5  ;;  %6227 = vmatpush3.bf16.msra.mxu1 %v6745_v36  ;;  %v2563_v15 = vrot.slane %v2562_v53, 4  ;;  %v2598_v17 = vshrl.u32 %v2545_v39, 16  ;;  %v2567_v27 = vrot.slane %v2565_v57, 5  ;;  %v6752_v36 = vld [vmem:[%s8046_s2 + $0x80] sm:$0xff]   ;;  %v6755_v61 = vld [vmem:[%s8046_s2 + $0x88] sm:$0xff]  }
 0x168   : > { %v2187_v8 = vsel %vm6958_vm3, %v2182_v63, %v2186_v58  ;;  %6228 = vmatprep.subr.bf16.mxu1 %v6747_v52  ;;  %v2586_v22 = vrot.slane %v2584_v14, 4  ;;  %v2589_v23 = vrot.slane %v2587_v4, 5  ;;  %v2601_v32 = vshll.u32 %v2545_v39, 16  ;;  %v6753_v57 = vld [vmem:[%s8046_s2 + $0x1c0] sm:$0xff]  }
 0x169   : > { %v5441_v18 = vcombine.low %v2173_v62, %v2187_v8  ;;  %v2576_v24 = vor.u32 %v2575_v26, %v2572_v60  ;;  %6345 = vmatpush3.bf16.msra.mxu0 %v6744_v47  ;;  %v2600_v31 = vrot.slane %v2598_v17, 4  ;;  %v2581_v1 = vrot.slane %v2579_v10, 5  ;;  %v7360_v10 = vld [vmem:[#allocation2 + $0x44] sm:$0x1]  ;;  %v7367_v17 = vld [vmem:[#allocation2 + $0x3c] sm:$0x1] }
 0x16a   : > { %6346 = vmatprep.subr.bf16.mxu0 %v6746_v6  ;;  %v5311_v35 = vcombine.low %v7209_v55, %v7207_v2  ;;  %v2590_v37 = vor.u32 %v2589_v23, %v2586_v22  ;;  %v2603_v12 = vrot.slane %v2601_v32, 5  ;;  %v2607_v13 = vshll.u32 %v7325_v21, 16  ;;  %v6750_v2 = vld [vmem:[%s8046_s2 + $0x1b8] sm:$0xff]   ;;  %v6756_v32 = vld [vmem:[%s8046_s2 + $0x1c8] sm:$0xff]  }
 0x16b   : > { %6333 = vmatmul.mubr.bf16.gmra.mrb[12].mxu0 %v5441_v18  ;;  %v2577_v33 = vrot.slane %v2576_v24, 4  ;;  %6229 = vmatpush3.bf16.msra.mxu1 %v6747_v52  ;;  %v2612_v43 = vshrl.u32 %v2547_v25, 16  ;;  %v2615_v44 = vshll.u32 %v2547_v25, 16  ;;  %v2568_v45 = vsel %vm6958_vm3, %v2563_v15, %v2567_v27  ;;  %v6758_v15 = vld [vmem:[%s8046_s2 + $0x90] sm:$0xff]  }
 0x16c   : > { %6230 = vmatprep.subr.bf16.mxu1 %v6749_v40  ;;  %v2593_v55 = vshll.u32 %v7323_v16, 16  ;;  %v2626_v5 = vshrl.u32 %v2549_v38, 16  ;;  %v2604_v47 = vor.u32 %v2603_v12, %v2600_v31  ;;  %v5312_v52 = vcombine.low %v7232_v34, %v7243_v11 }
 0x16d   : > { %v2582_v28 = vsel %vm6958_vm3, %v2577_v33, %v2581_v1  ;;  %6347 = vmatpush3.bf16.msra.mxu0 %v6746_v6  ;;  %v2614_v3 = vrot.slane %v2612_v43, 4  ;;  %v2617_v50 = vrot.slane %v2615_v44, 5  ;;  %v2621_v54 = vshll.u32 %v7336_v42, 16 }
 0x16e   : > { %v5466_v19 = vcombine.low %v2568_v45, %v2582_v28  ;;  %6348 = vmatprep.subr.bf16.mxu0 %v6748_v30  ;;  %v2628_v7 = vrot.slane %v2626_v5, 4  ;;  %v2629_v9 = vshll.u32 %v2549_v38, 16  ;;  %v2591_v56 = vrot.slane %v2590_v37, 4  ;;  %v2821_v37 = vld [vmem:[#allocation2 + $0x8] sm:$0xe] }
 0x16f   : > { %6231 = vmatpush3.bf16.msra.mxu1 %v6749_v40  ;;  %v2605_v58 = vrot.slane %v2604_v47, 4  ;;  %v2609_v59 = vrot.slane %v2607_v13, 5  ;;  %v2618_v60 = vor.u32 %v2617_v50, %v2614_v3  ;;  %v2635_v62 = vshll.u32 %v7346_v48, 16  ;;  %v6760_v47 = vld [vmem:[#allocation2 + $0x8] ss:$8 sps:$4 sm:$0xff]  }
 0x170   : > { %6352 = vmatprep.mubr.bf16.mxu0 %v5466_v19  ;;  %6240 = vmatprep.subr.bf16.mxu1 %v6752_v36  ;;  %v2631_v39 = vrot.slane %v2629_v9, 5  ;;  %v2640_v34 = vshrl.u32 %v2551_v51, 16  ;;  %v2643_v11 = vshll.u32 %v2551_v51, 16  ;;  %v2595_v63 = vrot.slane %v2593_v55, 5  ;;  %v6761_v55 = vld [vmem:[%s8046_s2 + $0x98] sm:$0xff]   ;;  %v6763_v9 = vld [vmem:[%s8046_s2 + $0xa0] sm:$0xff]  }
 0x171   : > { %6349 = vmatpush3.bf16.msra.mxu0 %v6748_v30  ;;  %v2610_v53 = vsel %vm6958_vm3, %v2605_v58, %v2609_v59  ;;  %v2654_v6 = vshrl.u32 %v2553_v20, 16  ;;  %v2619_v40 = vrot.slane %v2618_v60, 4  ;;  %v2657_v24 = vshll.u32 %v2553_v20, 16  ;;  %v2822_v30 = vld [vmem:[#allocation2 + $0x10] sm:$0xe]  ;;  %v6764_v58 = vld [vmem:[%s8046_s2 + $0x1e0] sm:$0xff]  }
 0x172   : > { %6350 = vmatprep.subr.bf16.mxu0 %v6750_v2  ;;  %6233 = vmatmul.mubr.bf16.vlgmr.msra.gmra.mrb[0].mxu1 %v5311_v35  ;;  %v2632_v26 = vor.u32 %v2631_v39, %v2628_v7  ;;  %v2642_v14 = vrot.slane %v2640_v34, 4  ;;  %v2645_v4 = vrot.slane %v2643_v11, 5  ;;  %v2596_v8 = vsel %vm6958_vm3, %v2591_v56, %v2595_v63  ;;  %v6762_v7 = vld [vmem:[%s8046_s2 + $0x1d8] sm:$0xff]   ;;  %v6765_v56 = vld [vmem:[%s8046_s2 + $0xa8] sm:$0xff]   ;;  %v1704_v59 = vld [vmem:[#allocation2 + $0x10] sm:$0xf] }
 0x173   : > { %6236 = vmatprep.mubr.bf16.mxu1 %v5312_v52  ;;  %6241 = vmatpush3.bf16.msra.mxu1 %v6752_v36  ;;  %v2656_v18 = vrot.slane %v2654_v6, 4  ;;  %v2623_v22 = vrot.slane %v2621_v54, 5  ;;  %v2637_v25 = vrot.slane %v2635_v62, 5  ;;  %v5467_v31 = vcombine.low %v2596_v8, %v2610_v53  ;;  %v6767_v60 = vld [vmem:[%s8046_s2 + $0xb0] sm:$0xff]   ;;  %v1702_v39 = vld [vmem:[#allocation2 + $0x8] sm:$0xf] }
 0x174   : > { %6242 = vmatprep.subr.bf16.mxu1 %v6755_v61  ;;  %v2633_v23 = vrot.slane %v2632_v26, 4  ;;  %v2646_v27 = vor.u32 %v2645_v4, %v2642_v14  ;;  %v2659_v38 = vrot.slane %v2657_v24, 5  ;;  %v2663_v33 = vshll.u32 %v7360_v10, 16  ;;  %v6769_v11 = vld [vmem:[%s8046_s2 + $0xb8] sm:$0xff]   ;;  %v6772_v26 = vld [vmem:[%s8046_s2 + $0xc0] sm:$0xff]  }
 0x175   : > { %6351 = vmatpush3.bf16.msra.mxu0 %v6750_v2  ;;  %v2624_v1 = vsel %vm6958_vm3, %v2619_v40, %v2623_v22  ;;  %v2649_v36 = vshll.u32 %v7367_v17, 16  ;;  %v5479_v43 = vrot.slane %v2822_v30, 9  ;;  %v2851_v44 = vrot.slane %v7299_v0, 5  ;;  %v6759_v2 = vld [vmem:[%s8046_s2 + $0x1d0] sm:$0xff]   ;;  %v2824_v14 = vld [vmem:[#allocation2 + $0x20] sm:$0xe] }
 0x176   : > { %6360 = vmatprep.subr.bf16.mxu0 %v6753_v57  ;;  %v2638_v35 = vsel %vm6958_vm3, %v2633_v23, %v2637_v25  ;;  %v2660_v13 = vor.u32 %v2659_v38, %v2656_v18  ;;  %v5313_v45 = vcombine.low %v7260_v41, %v7268_v49  ;;  %v2647_v28 = vrot.slane %v2646_v27, 4  ;;  %v2823_v4 = vld [vmem:[#allocation2 + $0x18] sm:$0xe]  ;;  %v2826_v8 = vld [vmem:[#allocation2 + $0x30] sm:$0xe] }
 0x177   : > { %6243 = vmatpush3.bf16.msra.mxu1 %v6755_v61  ;;  %v5468_v12 = vcombine.low %v2624_v1, %v2638_v35  ;;  %v2665_v19 = vrot.slane %v2663_v33, 5  ;;  %v5478_v3 = vrot.slane %v2821_v37, 9  ;;  %v2847_v0 = vrot.slane %v7297_v46, 5  ;;  %v6766_v61 = vld [vmem:[%s8046_s2 + $0x1e8] sm:$0xff]   ;;  %v6770_v24 = vld [vmem:[%s8046_s2 + $0x1f8] sm:$0xff]   ;;  %v6849_v41 = vld [vmem:[%s8046_s2 + $0x2b0] sm:$0xff]  }
 0x178   : > { %6353 = vmatmul.mubr.bf16.vlgmr.msra.gmra.mrb[8].mxu0 %v5467_v31  ;;  %6244 = vmatprep.subr.bf16.mxu1 %v6758_v15  ;;  %v2661_v5 = vrot.slane %v2660_v13, 4  ;;  %v2651_v50 = vrot.slane %v2649_v36, 5  ;;  %v2852_v51 = vsel %vm7390_vm5, %v5479_v43, %v2851_v44  ;;  %v1733_v62 = vshrl.u32 %v1704_v59, 16  ;;  %v1705_v22 = vld [vmem:[#allocation2 + $0x14] sm:$0x1]  ;;  %v6773_v36 = vld [vmem:[%s8046_s2 + $0x340] sm:$0xff]  }
 0x179   : > { %6361 = vmatpush3.bf16.msra.mxu0 %v6753_v57  ;;  %6356 = vmatprep.mubr.bf16.mxu0 %v5468_v12  ;;  %v2848_v54 = vsel %vm7390_vm5, %v5478_v3, %v2847_v0  ;;  %v1736_v34 = vshll.u32 %v1704_v59, 16  ;;  %v1719_v63 = vshrl.u32 %v1702_v39, 16  ;;  %v1722_v53 = vshll.u32 %v1702_v39, 16  ;;  %v6768_v57 = vld [vmem:[%s8046_s2 + $0x1f0] sm:$0xff]   ;;  %v2825_v27 = vld [vmem:[#allocation2 + $0x28] sm:$0xe] }
 0x17a   : > { %6362 = vmatprep.subr.bf16.mxu0 %v6756_v32  ;;  %6237 = vmatmul.mubr.bf16.gmra.mrb[4].mxu1 %v5313_v45  ;;  %v2666_v49 = vsel %vm6958_vm3, %v2661_v5, %v2665_v19  ;;  %v2652_v46 = vsel %vm6958_vm3, %v2647_v28, %v2651_v50  ;;  %v5502_v20 = vcombine.low %v2848_v54, %v2852_v51  ;;  %v1735_v6 = vrot.slane %v1733_v62, 4  ;;  %v1703_v1 = vld [vmem:[#allocation2 + $0xc] sm:$0x1]  ;;  %v6771_v35 = vld [vmem:[#allocation2 + $0x18] ss:$8 sps:$4 sm:$0xff]  }
 0x17b   : > { %6245 = vmatpush3.bf16.msra.mxu1 %v6758_v15  ;;  %6256 = vmatprep.mubr.bf16.mxu1 %v6760_v47  ;;  %v5469_v52 = vcombine.low %v2652_v46, %v2666_v49  ;;  %v1738_v40 = vrot.slane %v1736_v34, 5  ;;  %v1721_v15 = vrot.slane %v1719_v63, 4  ;;  %v1724_v18 = vrot.slane %v1722_v53, 5  ;;  %v6774_v13 = vld [vmem:[#allocation2 + $0x28] ss:$8 sps:$4 sm:$0xff]  }
 0x17c   : > { %6246 = vmatprep.subr.bf16.mxu1 %v6761_v55  ;;  %v5481_v23 = vrot.slane %v2824_v14, 9  ;;  %v2859_v25 = vrot.slane %v7325_v21, 5  ;;  %v5480_v31 = vrot.slane %v2823_v4, 9  ;;  %v5483_v38 = vrot.slane %v2826_v8, 9  ;;  %v6775_v21 = vld [vmem:[%s8046_s2 + $0xc8] sm:$0xff]  }
 0x17d   : > { %6363 = vmatpush3.bf16.msra.mxu0 %v6756_v32  ;;  %v1739_v30 = vor.u32 %v1738_v40, %v1735_v6  ;;  %v2855_v32 = vrot.slane %v7323_v16, 5  ;;  %v2867_v33 = vrot.slane %v7346_v48, 5  ;;  %v1725_v37 = vor.u32 %v1724_v18, %v1721_v15  ;;  %v2828_v48 = vld [vmem:[#allocation2 + $0x40] sm:$0xe]  ;;  %v2827_v5 = vld [vmem:[#allocation2 + $0x38] sm:$0xe] }
 0x17e   : > { %6364 = vmatprep.subr.bf16.mxu0 %v6759_v2  ;;  %v1742_v12 = vshll.u32 %v1705_v22, 16  ;;  %v5482_v16 = vrot.slane %v2825_v27, 9  ;;  %v2863_v43 = vrot.slane %v7336_v42, 5  ;;  %v2860_v44 = vsel %vm7390_vm5, %v5481_v23, %v2859_v25  ;;  %v7448_v19 = vld [vmem:[#allocation2 + $0x14] sm:$0x1]  ;;  %v6776_v46 = vld [vmem:[%s8046_s2 + $0x348] sm:$0xff]  }
 0x17f   : > { %6247 = vmatpush3.bf16.msra.mxu1 %v6761_v55  ;;  %v1728_v45 = vshll.u32 %v1703_v1, 16  ;;  %v1740_v28 = vrot.slane %v1739_v30, 4  ;;  %v2868_v55 = vsel %vm7390_vm5, %v5483_v38, %v2867_v33  ;;  %v5485_v42 = vrot.slane %v2828_v48, 9  ;;  %v4212_v50 = vld [vmem:[#allocation2 + $0x10] sm:$0xe]  ;;  %v6781_v18 = vld [vmem:[%s8046_s2 + $0x358] sm:$0xff]  }
 0x180   : > { %6357 = vmatmul.mubr.bf16.gmra.mrb[12].mxu0 %v5469_v52  ;;  %6248 = vmatprep.subr.bf16.mxu1 %v6763_v9  ;;  %v2875_v47 = vrot.slane %v7360_v10, 5  ;;  %v1726_v3 = vrot.slane %v1725_v37, 4  ;;  %v1744_v0 = vrot.slane %v1742_v12, 5  ;;  %v2864_v51 = vsel %vm7390_vm5, %v5482_v16, %v2863_v43  ;;  %v6778_v52 = vld [vmem:[%s8046_s2 + $0xd0] sm:$0xff]   ;;  %v7459_v54 = vld [vmem:[#allocation2 + $0xc] sm:$0x1] }
 0x181   : > { %6365 = vmatpush3.bf16.msra.mxu0 %v6759_v2  ;;  %6376 = vmatprep.mubr.bf16.mxu0 %v5502_v20  ;;  %v2856_v2 = vsel %vm7390_vm5, %v5480_v31, %v2855_v32  ;;  %v1730_v10 = vrot.slane %v1728_v45, 5  ;;  %v4211_v20 = vld [vmem:[#allocation2 + $0x8] sm:$0xe]  ;;  %v2871_v59 = vrot.slane %v7367_v17, 5  ;;  %v6777_v39 = vld [vmem:[#allocation2 + $0x38] ss:$8 sps:$4 sm:$0xff]  }
 0x182   : > { %6366 = vmatprep.subr.bf16.mxu0 %v6762_v7  ;;  %v5503_v49 = vcombine.low %v2856_v2, %v2860_v44  ;;  %v2876_v62 = vsel %vm7390_vm5, %v5485_v42, %v2875_v47  ;;  %v6779_v17 = vld [vmem:[%s8046_s2 + $0x350] sm:$0xff]   ;;  %v5674_v53 = vrot.slane %v4211_v20, 9  ;;  %v1708_v40 = vld [vmem:[#allocation2 + $0x20] sm:$0xf]  ;;  %v1710_v30 = vld [vmem:[#allocation2 + $0x28] sm:$0xf] }
 0x183   : > { %6249 = vmatpush3.bf16.msra.mxu1 %v6763_v9  ;;  %v1745_v9 = vsel %vm6958_vm3, %v1740_v28, %v1744_v0  ;;  %v1731_v34 = vsel %vm6958_vm3, %v1726_v3, %v1730_v10  ;;  %v1712_v8 = vld [vmem:[#allocation2 + $0x30] sm:$0xf]  ;;  %v6782_v22 = vld [vmem:[%s8046_s2 + $0xe0] sm:$0xff]   ;;  %v1761_v25 = vshrl.u32 %v1708_v40, 16  ;;  %v1764_v27 = vshll.u32 %v1708_v40, 16  ;;  %v6788_v40 = vld [vmem:[%s8046_s2 + $0xf8] sm:$0xff]  }
 0x184   : > { %6250 = vmatprep.subr.bf16.mxu1 %v6765_v56  ;;  %v5366_v63 = vcombine.low %v1731_v34, %v1745_v9  ;;  %v1789_v38 = vshrl.u32 %v1712_v8, 16  ;;  %v1792_v33 = vshll.u32 %v1712_v8, 16  ;;  %v7488_v1 = vld [vmem:[#allocation2] sm:$0xe]  ;;  %v1778_v37 = vshll.u32 %v1710_v30, 16  ;;  %v6786_v42 = vld [vmem:[%s8046_s2 + $0xf0] sm:$0xff]  }
 0x185   : > { %6367 = vmatpush3.bf16.msra.mxu0 %v6762_v7  ;;  %v5504_v7 = vcombine.low %v2864_v51, %v2868_v55  ;;  %v6783_v12 = vld [vmem:[%s8046_s2 + $0x360] sm:$0xff]   ;;  %v1766_v16 = vrot.slane %v1764_v27, 5  ;;  %v5402_v43 = vrot.slane %v7488_v1, 9  ;;  %v7503_v3 = vld [vmem:[#allocation2 + $0x1c] sm:$0x1]  ;;  %v6787_v34 = vld [vmem:[%s8046_s2 + $0x370] sm:$0xff]  }
 0x186   : > { %6368 = vmatprep.subr.bf16.mxu0 %v6764_v58  ;;  %v7497_v48 = vld [vmem:[#allocation2 + $0x4] sm:$0x1]  ;;  %v1791_v2 = vrot.slane %v1789_v38, 4  ;;  %v1794_v55 = vrot.slane %v1792_v33, 5  ;;  %v1713_v20 = vld [vmem:[#allocation2 + $0x34] sm:$0x1] }
 0x187   : > { %6251 = vmatpush3.bf16.msra.mxu1 %v6765_v56  ;;  %v1706_v56 = vld [vmem:[#allocation2 + $0x18] sm:$0xf]  ;;  %v2234_v44 = vrot.slane %v7497_v48, 5  ;;  %v1709_v45 = vld [vmem:[#allocation2 + $0x24] sm:$0x1]  ;;  %v1798_v8 = vshll.u32 %v1713_v20, 16 }
 0x188   : > { %6252 = vmatprep.subr.bf16.mxu1 %v6767_v60  ;;  %v1747_v6 = vshrl.u32 %v1706_v56, 16  ;;  %v7505_v0 = vld [vmem:[#allocation2 + $0x24] sm:$0x1]  ;;  %v1770_v9 = vshll.u32 %v1709_v45, 16  ;;  %v4092_v1 = vshll.u32 %v7459_v54, 16 }
 0x189   : > { %6369 = vmatpush3.bf16.msra.mxu0 %v6764_v58  ;;  %v5484_v58 = vrot.slane %v2827_v5, 9  ;;  %v1716_v5 = vld [vmem:[#allocation2 + $0x40] sm:$0xf]  ;;  %v1717_v33 = vld [vmem:[#allocation2 + $0x44] sm:$0x1]  ;;  %v1800_v45 = vrot.slane %v1798_v8, 5 }
 0x18a   : > { %6370 = vmatprep.subr.bf16.mxu0 %v6766_v61  ;;  %v1749_v23 = vrot.slane %v1747_v6, 4  ;;  %v4068_v6 = vld [vmem:[#allocation2 + $0x10] sm:$0xf] }
 0x18b   : > { %6253 = vmatpush3.bf16.msra.mxu1 %v6767_v60  ;;  %v5675_v60 = vrot.slane %v4212_v50, 9  ;;  %v2872_v14 = vsel %vm7390_vm5, %v5484_v58, %v2871_v59  ;;  %v4214_v50 = vld [vmem:[#allocation2 + $0x20] sm:$0xe]  ;;  %v1820_v58 = vshll.u32 %v1716_v5, 16 }
 0x18c   : > { %6254 = vmatprep.subr.bf16.mxu1 %v6769_v11  ;;  %v5505_v15 = vcombine.low %v2872_v14, %v2876_v62  ;;  %v1795_v62 = vor.u32 %v1794_v55, %v1791_v2  ;;  %v4245_v14 = vrot.slane %v7503_v3, 5 }
 0x18d   : > { %6371 = vmatpush3.bf16.msra.mxu0 %v6766_v61  ;;  %v4241_v61 = vrot.slane %v7448_v19, 5 }
 0x18e   : > { %6372 = vmatprep.subr.bf16.mxu0 %v6768_v57  ;;  %v1796_v38 = vrot.slane %v1795_v62, 4  ;;  %v6791_v62 = vld [vmem:[%s8046_s2 + $0x300] sm:$0xff]  }
 0x18f   : > { %6255 = vmatpush3.bf16.msra.mxu1 %v6769_v11  ;;  %v6780_v11 = vld [vmem:[%s8046_s2 + $0xd8] sm:$0xff]   ;;  %v4242_v4 = vsel %vm7390_vm5, %v5675_v60, %v4241_v61  ;;  %v5677_v60 = vrot.slane %v4214_v50, 9  ;;  %v4249_v61 = vrot.slane %v7505_v0, 5 }
 0x190   : > { %6264 = vmatprep.subr.bf16.mxu1 %v6772_v26 }
 0x191   : > { %6373 = vmatpush3.bf16.msra.mxu0 %v6768_v57  ;;  %v4237_v57 = vrot.slane %v7459_v54, 5  ;;  %v6795_v54 = vld [vmem:[%s8046_s2 + $0x310] sm:$0xff]  }
 0x192   : > { %6374 = vmatprep.subr.bf16.mxu0 %v6770_v24  ;;  %6257 = vmatmul.mubr.bf16.vlgmr.msra.gmra.mrb[0].mxu1 %v6771_v35  ;;  %v6784_v35 = vld [vmem:[%s8046_s2 + $0xe8] sm:$0xff]  }
 0x193   : > { %6260 = vmatprep.mubr.bf16.mxu1 %v6774_v13  ;;  %6265 = vmatpush3.bf16.msra.mxu1 %v6772_v26  ;;  %v1750_v26 = vshll.u32 %v1706_v56, 16  ;;  %v1763_v13 = vrot.slane %v1761_v25, 4  ;;  %v1817_v56 = vshrl.u32 %v1716_v5, 16  ;;  %v1822_v25 = vrot.slane %v1820_v58, 5  ;;  %v1715_v5 = vld [vmem:[#allocation2 + $0x3c] sm:$0x1] }
 0x194   : > { %6266 = vmatprep.subr.bf16.mxu1 %v6775_v21 }
 0x195   : > { %6375 = vmatpush3.bf16.msra.mxu0 %v6770_v24  ;;  %v4238_v24 = vsel %vm7390_vm5, %v5674_v53, %v4237_v57  ;;  %v1752_v32 = vrot.slane %v1750_v26, 5  ;;  %v1767_v10 = vor.u32 %v1766_v16, %v1763_v13  ;;  %v4100_v13 = vshll.u32 %v4068_v6, 16 }
 0x196   : > { %6480 = vmatprep.subr.bf16.mxu0 %v6773_v36  ;;  %v5698_v31 = vcombine.low %v4238_v24, %v4242_v4  ;;  %v7525_v24 = vld [vmem:[#allocation2 + $0x2c] sm:$0x1] }
 0x197   : > { %6267 = vmatpush3.bf16.msra.mxu1 %v6775_v21  ;;  %v1775_v21 = vshrl.u32 %v1710_v30, 16  ;;  %v1753_v28 = vor.u32 %v1752_v32, %v1749_v23  ;;  %v1819_v23 = vrot.slane %v1817_v56, 4  ;;  %v6790_v30 = vld [vmem:[%s8046_s2 + $0x140] sm:$0xff]   ;;  %v4102_v56 = vrot.slane %v4100_v13, 5 }
 0x198   : > { %6377 = vmatmul.mubr.bf16.vlgmr.msra.gmra.mrb[8].mxu0 %v5503_v49  ;;  %6268 = vmatprep.subr.bf16.mxu1 %v6778_v52  ;;  %v7507_v49 = vld [vmem:[#allocation2 + $0x18] sm:$0xe] }
 0x199   : > { %6380 = vmatprep.mubr.bf16.mxu0 %v5504_v7  ;;  %6481 = vmatpush3.bf16.msra.mxu0 %v6773_v36  ;;  %v1707_v36 = vld [vmem:[#allocation2 + $0x1c] sm:$0x1]  ;;  %v1777_v51 = vrot.slane %v1775_v21, 4  ;;  %v6785_v7 = vld [vmem:[%s8046_s2 + $0x368] sm:$0xff]   ;;  %v7512_v59 = vrot.slane %v1753_v28, 4  ;;  %v5676_v26 = vrot.slane %v7507_v49, 9 }
 0x19a   : > { %6482 = vmatprep.subr.bf16.mxu0 %v6776_v46  ;;  %6261 = vmatmul.mubr.bf16.gmra.mrb[4].mxu1 %v6777_v39  ;;  %v1756_v47 = vshll.u32 %v1707_v36, 16  ;;  %v1711_v39 = vld [vmem:[#allocation2 + $0x2c] sm:$0x1]  ;;  %v6789_v36 = vld [vmem:[%s8046_s2 + $0x378] sm:$0xff]  }
 0x19b   : > { %6269 = vmatpush3.bf16.msra.mxu1 %v6778_v52  ;;  %6280 = vmatprep.mubr.bf16.mxu1 %v5366_v63  ;;  %v1714_v52 = vld [vmem:[#allocation2 + $0x38] sm:$0xf]  ;;  %v4216_v63 = vld [vmem:[#allocation2 + $0x30] sm:$0xe]  ;;  %v1784_v32 = vshll.u32 %v1711_v39, 16  ;;  %v1812_v39 = vshll.u32 %v1715_v5, 16 }
 0x19c   : > { %6270 = vmatprep.subr.bf16.mxu1 %v6780_v11  ;;  %v1803_v53 = vshrl.u32 %v1714_v52, 16  ;;  %v1806_v57 = vshll.u32 %v1714_v52, 16  ;;  %v5679_v28 = vrot.slane %v4216_v63, 9  ;;  %v4253_v52 = vrot.slane %v7525_v24, 5  ;;  %v4072_v5 = vld [vmem:[#allocation2 + $0x20] sm:$0xf] }
 0x19d   : > { %6483 = vmatpush3.bf16.msra.mxu0 %v6776_v46  ;;  %v1780_v46 = vrot.slane %v1778_v37, 5  ;;  %v1786_v49 = vrot.slane %v1784_v32, 5 }
 0x19e   : > { %6484 = vmatprep.subr.bf16.mxu0 %v6779_v17  ;;  %v1805_v21 = vrot.slane %v1803_v53, 4  ;;  %v1808_v37 = vrot.slane %v1806_v57, 5  ;;  %v4246_v57 = vsel %vm7390_vm5, %v5676_v26, %v4245_v14  ;;  %v6793_v26 = vld [vmem:[%s8046_s2 + $0x308] sm:$0xff]   ;;  %v1814_v14 = vrot.slane %v1812_v39, 5  ;;  %v6798_v39 = vld [vmem:[%s8046_s2 + $0x160] sm:$0xff]  }
 0x19f   : > { %6271 = vmatpush3.bf16.msra.mxu1 %v6780_v11  ;;  %v1758_v11 = vrot.slane %v1756_v47, 5  ;;  %v1781_v4 = vor.u32 %v1780_v46, %v1777_v51  ;;  %v1801_v51 = vsel %vm6958_vm3, %v1796_v38, %v1800_v45 }
 0x1a0   : > { %6381 = vmatmul.mubr.bf16.gmra.mrb[12].mxu0 %v5505_v15  ;;  %6272 = vmatprep.subr.bf16.mxu1 %v6782_v22  ;;  %v1768_v15 = vrot.slane %v1767_v10, 4  ;;  %v1809_v10 = vor.u32 %v1808_v37, %v1805_v21 }
 0x1a1   : > { %6485 = vmatpush3.bf16.msra.mxu0 %v6779_v17  ;;  %6496 = vmatprep.mubr.bf16.mxu0 %v5698_v31  ;;  %v7518_v17 = vld [vmem:[#allocation2 + $0x34] sm:$0x1]  ;;  %v1759_v27 = vsel %vm6958_vm3, %v7512_v59, %v1758_v11  ;;  %v7535_v31 = vsel %vm7390_vm5, %v5677_v60, %v4249_v61  ;;  %v1782_v16 = vrot.slane %v1781_v4, 4  ;;  %v6792_v61 = vld [vmem:[%s8046_s2 + $0x148] sm:$0xff]  }
 0x1a2   : > { %6486 = vmatprep.subr.bf16.mxu0 %v6781_v18  ;;  %v4257_v2 = vrot.slane %v7518_v17, 5  ;;  %v6863_v4 = vld [vmem:[#allocation2 + $0xc] sm:$0x1]  ;;  %v5699_v32 = vcombine.low %v4246_v57, %v7535_v31 }
 0x1a3   : > { %6273 = vmatpush3.bf16.msra.mxu1 %v6782_v22  ;;  %v4215_v22 = vld [vmem:[#allocation2 + $0x28] sm:$0xe]  ;;  %v1787_v59 = vsel %vm6958_vm3, %v1782_v16, %v1786_v49  ;;  %v2238_v8 = vrot.slane %v6863_v4, 5  ;;  %v6865_v4 = vld [vmem:[#allocation2 + $0x1c] sm:$0x1] }
 0x1a4   : > { %6274 = vmatprep.subr.bf16.mxu1 %v6784_v35  ;;  %v5678_v46 = vrot.slane %v4215_v22, 9  ;;  %v4258_v60 = vsel %vm7390_vm5, %v5679_v28, %v4257_v2  ;;  %v5368_v11 = vcombine.low %v1787_v59, %v1801_v51  ;;  %v4094_v51 = vrot.slane %v4092_v1, 5  ;;  %v6797_v59 = vld [vmem:[%s8046_s2 + $0x318] sm:$0xff]  }
 0x1a5   : > { %6487 = vmatpush3.bf16.msra.mxu0 %v6781_v18  ;;  %v1772_v18 = vrot.slane %v1770_v9, 5  ;;  %v1826_v9 = vshll.u32 %v1717_v33, 16  ;;  %v2235_v33 = vsel %vm7390_vm5, %v5402_v43, %v2234_v44 }
 0x1a6   : > { %6488 = vmatprep.subr.bf16.mxu0 %v6783_v12 }
 0x1a7   : > { %6275 = vmatpush3.bf16.msra.mxu1 %v6784_v35  ;;  %v4066_v35 = vld [vmem:[#allocation2 + $0x8] sm:$0xf]  ;;  %v1773_v55 = vsel %vm6958_vm3, %v1768_v15, %v1772_v18  ;;  %v4254_v15 = vsel %vm7390_vm5, %v5678_v46, %v4253_v52  ;;  %v1810_v18 = vrot.slane %v1809_v10, 4  ;;  %v1828_v22 = vrot.slane %v1826_v9, 5  ;;  %v2207_v46 = vld [vmem:[#allocation2 + $0x10] sm:$0xe] }
 0x1a8   : > { %6276 = vmatprep.subr.bf16.mxu1 %v6786_v42  ;;  %v4083_v47 = vshrl.u32 %v4066_v35, 16  ;;  %v4086_v50 = vshll.u32 %v4066_v35, 16  ;;  %v5367_v58 = vcombine.low %v1759_v27, %v1773_v55  ;;  %v4070_v27 = vld [vmem:[#allocation2 + $0x18] sm:$0xf]  ;;  %v5700_v38 = vcombine.low %v4254_v15, %v4258_v60  ;;  %v7577_v35 = vld [vmem:[#allocation2 + $0x3c] sm:$0x1] }
 0x1a9   : > { %6489 = vmatpush3.bf16.msra.mxu0 %v6783_v12  ;;  %v4097_v12 = vshrl.u32 %v4068_v6, 16  ;;  %v4218_v6 = vld [vmem:[#allocation2 + $0x40] sm:$0xe]  ;;  %v4111_v16 = vshrl.u32 %v4070_v27, 16  ;;  %v1815_v43 = vsel %vm6958_vm3, %v1810_v18, %v1814_v14  ;;  %v4114_v45 = vshll.u32 %v4070_v27, 16  ;;  %v6796_v55 = vld [vmem:[%s8046_s2 + $0x158] sm:$0xff]  }
 0x1aa   : > { %6490 = vmatprep.subr.bf16.mxu0 %v6785_v7  ;;  %v4085_v63 = vrot.slane %v4083_v47, 4  ;;  %v4088_v53 = vrot.slane %v4086_v50, 5  ;;  %v5681_v21 = vrot.slane %v4218_v6, 9  ;;  %v2208_v10 = vld [vmem:[#allocation2 + $0x18] sm:$0xe]  ;;  %v6800_v27 = vld [vmem:[%s8046_s2 + $0x168] sm:$0xff]  }
 0x1ab   : > { %6277 = vmatpush3.bf16.msra.mxu1 %v6786_v42  ;;  %v1823_v42 = vor.u32 %v1822_v25, %v1819_v23  ;;  %v4099_v20 = vrot.slane %v4097_v12, 4  ;;  %v7560_v23 = vld [vmem:[#allocation2 + $0x44] sm:$0x1]  ;;  %v4106_v12 = vshll.u32 %v7448_v19, 16  ;;  %v4261_v19 = vrot.slane %v7577_v35, 5 }
 0x1ac   : > { %6278 = vmatprep.subr.bf16.mxu1 %v6788_v40  ;;  %v4089_v37 = vor.u32 %v4088_v53, %v4085_v63  ;;  %v4265_v13 = vrot.slane %v7560_v23, 5  ;;  %v4113_v52 = vrot.slane %v4111_v16, 4  ;;  %v4116_v9 = vrot.slane %v4114_v45, 5  ;;  %v6864_v53 = vld [vmem:[#allocation2 + $0x14] sm:$0x1] }
 0x1ad   : > { %6491 = vmatpush3.bf16.msra.mxu0 %v6785_v7  ;;  %v2206_v7 = vld [vmem:[#allocation2 + $0x8] sm:$0xe]  ;;  %v4103_v25 = vor.u32 %v4102_v56, %v4099_v20  ;;  %v4108_v50 = vrot.slane %v4106_v12, 5  ;;  %v4125_v20 = vshrl.u32 %v4072_v5, 16  ;;  %v4128_v56 = vshll.u32 %v4072_v5, 16 }
 0x1ae   : > { %6492 = vmatprep.subr.bf16.mxu0 %v6787_v34  ;;  %v4090_v47 = vrot.slane %v4089_v37, 4  ;;  %v4266_v49 = vsel %vm7390_vm5, %v5681_v21, %v4265_v13  ;;  %v5404_v63 = vrot.slane %v2207_v46, 9  ;;  %v2242_v57 = vrot.slane %v6864_v53, 5  ;;  %v7622_v45 = vld [vmem:[#allocation2 + $0x10] sm:$0xf] }
 0x1af   : > { %6279 = vmatpush3.bf16.msra.mxu1 %v6788_v40  ;;  %v5403_v40 = vrot.slane %v2206_v7, 9  ;;  %v4104_v44 = vrot.slane %v4103_v25, 4  ;;  %v5405_v6 = vrot.slane %v2208_v10, 9  ;;  %v4117_v15 = vor.u32 %v4116_v9, %v4113_v52  ;;  %v2209_v25 = vld [vmem:[#allocation2 + $0x20] sm:$0xe] }
 0x1b0   : > { %6288 = vmatprep.subr.bf16.mxu1 %v6790_v30  ;;  %v4127_v18 = vrot.slane %v4125_v20, 4  ;;  %v7616_v37 = vsel %vm7390_vm5, %v5404_v63, %v2242_v57  ;;  %v4134_v12 = vshll.u32 %v7505_v0, 16  ;;  %v5406_v13 = vrot.slane %v2209_v25, 9  ;;  %v4080_v46 = vld [vmem:[#allocation2 + $0x40] sm:$0xf] }
 0x1b1   : > { %6493 = vmatpush3.bf16.msra.mxu0 %v6787_v34  ;;  %v1824_v34 = vrot.slane %v1823_v42, 4  ;;  %v2239_v48 = vsel %vm7390_vm5, %v5403_v40, %v2238_v8  ;;  %v4109_v7 = vsel %vm6958_vm3, %v4104_v44, %v4108_v50  ;;  %v4076_v40 = vld [vmem:[#allocation2 + $0x30] sm:$0xf]  ;;  %v2246_v8 = vrot.slane %v6865_v4, 5  ;;  %v7646_v50 = vld [vmem:[#allocation2 + $0x8] sm:$0xf] }
 0x1b2   : > { %6494 = vmatprep.subr.bf16.mxu0 %v6789_v36  ;;  %6281 = vmatmul.mubr.bf16.vlgmr.msra.gmra.mrb[0].mxu1 %v5367_v58  ;;  %v5426_v42 = vcombine.low %v2235_v33, %v2239_v48  ;;  %v6799_v33 = vld [vmem:[%s8046_s2 + $0x320] sm:$0xff]   ;;  %v4156_v21 = vshll.u32 %v4076_v40, 16  ;;  %v7619_v16 = vrot.slane %v4117_v15, 4  ;;  %v4148_v44 = vshll.u32 %v7525_v24, 16  ;;  %v7639_v24 = vld [vmem:[#allocation2 + $0x30] sm:$0xe] }
 0x1b3   : > { %6284 = vmatprep.mubr.bf16.mxu1 %v5368_v11  ;;  %6289 = vmatpush3.bf16.msra.mxu1 %v6790_v30  ;;  %v6794_v30 = vld [vmem:[%s8046_s2 + $0x150] sm:$0xff]   ;;  %v1829_v31 = vsel %vm6958_vm3, %v1824_v34, %v1828_v22  ;;  %v4074_v11 = vld [vmem:[#allocation2 + $0x28] sm:$0xf]  ;;  %v4130_v22 = vrot.slane %v4128_v56, 5  ;;  %v6867_v48 = vld [vmem:[#allocation2 + $0x24] sm:$0x1]  ;;  %v7629_v0 = vsel %vm7390_vm5, %v5405_v6, %v2246_v8 }
 0x1b4   : > { %6290 = vmatprep.subr.bf16.mxu1 %v6792_v61  ;;  %v5369_v28 = vcombine.low %v1815_v43, %v1829_v31  ;;  %v4139_v14 = vshrl.u32 %v4074_v11, 16  ;;  %v4120_v31 = vshll.u32 %v7503_v3, 16  ;;  %v2250_v1 = vrot.slane %v6867_v48, 5  ;;  %v6802_v3 = vld [vmem:[%s8046_s2 + $0x170] sm:$0xff]   ;;  %v2212_v53 = vld [vmem:[#allocation2 + $0x38] sm:$0xe] }
 0x1b5   : > { %6495 = vmatpush3.bf16.msra.mxu0 %v6789_v36  ;;  %v4217_v36 = vld [vmem:[#allocation2 + $0x38] sm:$0xe]  ;;  %v4131_v43 = vor.u32 %v4130_v22, %v4127_v18  ;;  %v5427_v5 = vcombine.low %v7616_v37, %v7629_v0  ;;  %v3156_v52 = vshrl.u32 %v7622_v45, 16  ;;  %v7659_v56 = vrot.slane %v4148_v44, 5  ;;  %v6868_v25 = vld [vmem:[#allocation2 + $0x34] sm:$0x1] }
 0x1b6   : > { %6504 = vmatprep.subr.bf16.mxu0 %v6791_v62  ;;  %v5680_v2 = vrot.slane %v4217_v36, 9  ;;  %v4153_v36 = vshrl.u32 %v4076_v40, 16  ;;  %v5408_v57 = vrot.slane %v7639_v24, 9  ;;  %v4181_v6 = vshrl.u32 %v4080_v46, 16  ;;  %v4544_v18 = vld [vmem:[#allocation2 + $0x18] sm:$0xf] }
 0x1b7   : > { %6291 = vmatpush3.bf16.msra.mxu1 %v6792_v61  ;;  %v4095_v61 = vsel %vm6958_vm3, %v4090_v47, %v4094_v51  ;;  %v4158_v47 = vrot.slane %v4156_v21, 5  ;;  %v7650_v51 = vsel %vm7390_vm5, %v5406_v13, %v2250_v1  ;;  %v4132_v9 = vrot.slane %v4131_v43, 4  ;;  %v3134_v48 = vld [vmem:[#allocation2 + $0x14] sm:$0x1] }
 0x1b8   : > { %6497 = vmatmul.mubr.bf16.vlgmr.msra.gmra.mrb[16].mxu0 %v5699_v32  ;;  %6292 = vmatprep.subr.bf16.mxu1 %v6794_v30  ;;  %v4262_v58 = vsel %vm7390_vm5, %v5680_v2, %v4261_v19  ;;  %v5710_v34 = vcombine.low %v4095_v61, %v4109_v7  ;;  %v7635_v2 = vrot.slane %v4139_v14, 4  ;;  %v3159_v7 = vshll.u32 %v7622_v45, 16  ;;  %v6806_v14 = vld [vmem:[%s8046_s2 + $0x240] sm:$0xff]  }
 0x1b9   : > { %6500 = vmatprep.mubr.bf16.mxu0 %v5700_v38  ;;  %6505 = vmatpush3.bf16.msra.mxu0 %v6791_v62  ;;  %v5701_v60 = vcombine.low %v4262_v58, %v4266_v49  ;;  %v2210_v62 = vld [vmem:[#allocation2 + $0x28] sm:$0xe]  ;;  %v6866_v38 = vld [vmem:[#allocation2 + $0x2c] sm:$0x1]  ;;  %v4136_v49 = vrot.slane %v4134_v12, 5  ;;  %v4162_v61 = vshll.u32 %v7518_v17, 16 }
 0x1ba   : > { %6506 = vmatprep.subr.bf16.mxu0 %v6793_v26  ;;  %6285 = vmatmul.mubr.bf16.gmra.mrb[4].mxu1 %v5369_v28  ;;  %v5407_v32 = vrot.slane %v2210_v62, 9  ;;  %v4078_v58 = vld [vmem:[#allocation2 + $0x38] sm:$0xf]  ;;  %v3145_v62 = vshll.u32 %v7646_v50, 16  ;;  %v4184_v40 = vshll.u32 %v4080_v46, 16  ;;  %v3158_v15 = vrot.slane %v3156_v52, 4 }
 0x1bb   : > { %6293 = vmatpush3.bf16.msra.mxu1 %v6794_v30  ;;  %6304 = vmatprep.mubr.bf16.mxu1 %v5426_v42  ;;  %v4142_v30 = vshll.u32 %v4074_v11, 16  ;;  %v4155_v42 = vrot.slane %v4153_v36, 4  ;;  %v4542_v11 = vld [vmem:[#allocation2 + $0x10] sm:$0xf]  ;;  %v4167_v4 = vshrl.u32 %v4078_v58, 16  ;;  %v4170_v8 = vshll.u32 %v4078_v58, 16 }
 0x1bc   : > { %6294 = vmatprep.subr.bf16.mxu1 %v6796_v55  ;;  %v3161_v17 = vrot.slane %v3159_v7, 5  ;;  %v4137_v22 = vsel %vm6958_vm3, %v4132_v9, %v4136_v49  ;;  %v3147_v21 = vrot.slane %v3145_v62, 5  ;;  %v4183_v12 = vrot.slane %v4181_v6, 4  ;;  %v6808_v49 = vld [vmem:[%s8046_s2 + $0x248] sm:$0xff]   ;;  %v7688_v9 = vld [vmem:[#allocation2 + $0x18] sm:$0xf] }
 0x1bd   : > { %6507 = vmatpush3.bf16.msra.mxu0 %v6793_v26  ;;  %v2254_v26 = vrot.slane %v6866_v38, 5  ;;  %v7637_v19 = vrot.slane %v4142_v30, 5  ;;  %v4159_v63 = vor.u32 %v4158_v47, %v4155_v42  ;;  %v4562_v38 = vshll.u32 %v4542_v11, 16 }
 0x1be   : > { %6508 = vmatprep.subr.bf16.mxu0 %v6795_v54  ;;  %v5409_v30 = vrot.slane %v2212_v53, 9  ;;  %v4186_v13 = vrot.slane %v4184_v40, 5  ;;  %v4573_v1 = vshrl.u32 %v4544_v18, 16  ;;  %v4169_v44 = vrot.slane %v4167_v4, 4  ;;  %v6810_v4 = vld [vmem:[%s8046_s2 + $0x250] sm:$0xff]  }
 0x1bf   : > { %6295 = vmatpush3.bf16.msra.mxu1 %v6796_v55  ;;  %v7633_v28 = vsel %vm7390_vm5, %v5407_v32, %v2254_v26  ;;  %v6801_v55 = vld [vmem:[%s8046_s2 + $0x328] sm:$0xff]   ;;  %v4559_v32 = vshrl.u32 %v4542_v11, 16  ;;  %v6805_v26 = vld [vmem:[%s8046_s2 + $0x338] sm:$0xff]   ;;  %v4160_v43 = vrot.slane %v4159_v63, 4  ;;  %v4564_v42 = vrot.slane %v4562_v38, 5 }
 0x1c0   : > { %6501 = vmatmul.mubr.bf16.gmra.mrb[20].mxu0 %v5701_v60  ;;  %6296 = vmatprep.subr.bf16.mxu1 %v6798_v39  ;;  %v5428_v20 = vcombine.low %v7650_v51, %v7633_v28  ;;  %v4145_v60 = vor.u32 %v7637_v19, %v7635_v2  ;;  %v3162_v2 = vor.u32 %v3161_v17, %v3158_v15  ;;  %v4164_v47 = vrot.slane %v4162_v61, 5  ;;  %v7700_v63 = vld [vmem:[#allocation2 + $0x14] sm:$0x1] }
 0x1c1   : > { %6509 = vmatpush3.bf16.msra.mxu0 %v6795_v54  ;;  %6520 = vmatprep.mubr.bf16.mxu0 %v5710_v34  ;;  %v4122_v54 = vrot.slane %v4120_v31, 5  ;;  %v6803_v34 = vld [vmem:[%s8046_s2 + $0x330] sm:$0xff]   ;;  %v3165_v7 = vshll.u32 %v3134_v48, 16  ;;  %v4190_v53 = vshll.u32 %v7560_v23, 16  ;;  %v3170_v37 = vshrl.u32 %v7688_v9, 16  ;;  %v6809_v23 = vld [vmem:[%s8046_s2 + $0x388] sm:$0xff]  }
 0x1c2   : > { %6510 = vmatprep.subr.bf16.mxu0 %v6797_v59  ;;  %v4146_v24 = vrot.slane %v4145_v60, 4  ;;  %v4575_v60 = vrot.slane %v4573_v1, 4  ;;  %v3173_v0 = vshll.u32 %v7688_v9, 16  ;;  %v4176_v40 = vshll.u32 %v7577_v35, 16 }
 0x1c3   : > { %6297 = vmatpush3.bf16.msra.mxu1 %v6798_v39  ;;  %v4123_v10 = vsel %vm6958_vm3, %v7619_v16, %v4122_v54  ;;  %v3142_v39 = vshrl.u32 %v7646_v50, 16  ;;  %v4576_v16 = vshll.u32 %v4544_v18, 16  ;;  %v4561_v54 = vrot.slane %v4559_v32, 4 }
 0x1c4   : > { %6298 = vmatprep.subr.bf16.mxu1 %v6800_v27  ;;  %v5711_v19 = vcombine.low %v4123_v10, %v4137_v22  ;;  %v6807_v10 = vld [vmem:[%s8046_s2 + $0x380] sm:$0xff]   ;;  %v3167_v51 = vrot.slane %v3165_v7, 5  ;;  %v4568_v15 = vshll.u32 %v7700_v63, 16  ;;  %v3172_v38 = vrot.slane %v3170_v37, 4  ;;  %v6813_v7 = vld [vmem:[%s8046_s2 + $0x398] sm:$0xff]  }
 0x1c5   : > { %6511 = vmatpush3.bf16.msra.mxu0 %v6797_v59  ;;  %v6804_v59 = vld [vmem:[%s8046_s2 + $0x178] sm:$0xff]   ;;  %v3144_v36 = vrot.slane %v3142_v39, 4  ;;  %v4578_v61 = vrot.slane %v4576_v16, 5  ;;  %v4165_v39 = vsel %vm6958_vm3, %v4160_v43, %v4164_v47  ;;  %v4565_v6 = vor.u32 %v4564_v42, %v4561_v54  ;;  %v7745_v42 = vld [vmem:[#allocation2 + $0x24] sm:$0x1] }
 0x1c6   : > { %6512 = vmatprep.subr.bf16.mxu0 %v6799_v33  ;;  %v4570_v1 = vrot.slane %v4568_v15, 5  ;;  %v3135_v43 = vld [vmem:[#allocation2 + $0x1c] sm:$0x1]  ;;  %v4548_v47 = vld [vmem:[#allocation2 + $0x28] sm:$0xf] }
 0x1c7   : > { %6299 = vmatpush3.bf16.msra.mxu1 %v6800_v27  ;;  %v2258_v27 = vrot.slane %v6868_v25, 5  ;;  %v3148_v52 = vor.u32 %v3147_v21, %v3144_v36  ;;  %v4579_v17 = vor.u32 %v4578_v61, %v4575_v60  ;;  %v4566_v32 = vrot.slane %v4565_v6, 4  ;;  %v4546_v21 = vld [vmem:[#allocation2 + $0x20] sm:$0xf] }
 0x1c8   : > { %6300 = vmatprep.subr.bf16.mxu1 %v6802_v3  ;;  %v6814_v60 = vld [vmem:[%s8046_s2 + $0x260] sm:$0xff]   ;;  %v4596_v6 = vshll.u32 %v7745_v42, 16  ;;  %v4601_v37 = vshrl.u32 %v4548_v47, 16 }
 0x1c9   : > { %6513 = vmatpush3.bf16.msra.mxu0 %v6799_v33  ;;  %v6869_v33 = vld [vmem:[#allocation2 + $0x3c] sm:$0x1]  ;;  %v7686_v46 = vsel %vm7390_vm5, %v5408_v57, %v2258_v27  ;;  %v3149_v28 = vrot.slane %v3148_v52, 4  ;;  %v4192_v27 = vrot.slane %v4190_v53, 5  ;;  %v4580_v16 = vrot.slane %v4579_v17, 4 }
 0x1ca   : > { %6514 = vmatprep.subr.bf16.mxu0 %v6801_v55  ;;  %v2262_v31 = vrot.slane %v6869_v33, 5  ;;  %v7706_v57 = vld [vmem:[#allocation2 + $0x1c] sm:$0x1]  ;;  %v7772_v17 = vld [vmem:[#allocation2 + $0x2c] sm:$0x1] }
 0x1cb   : > { %6301 = vmatpush3.bf16.msra.mxu1 %v6802_v3  ;;  %v4172_v3 = vrot.slane %v4170_v8, 5  ;;  %v4582_v25 = vshll.u32 %v7706_v57, 16 }
 0x1cc   : > { %6302 = vmatprep.subr.bf16.mxu1 %v6804_v59  ;;  %v2263_v58 = vsel %vm7390_vm5, %v5409_v30, %v2262_v31  ;;  %v4178_v30 = vrot.slane %v4176_v40, 5  ;;  %v6812_v31 = vld [vmem:[%s8046_s2 + $0x258] sm:$0xff]  }
 0x1cd   : > { %6515 = vmatpush3.bf16.msra.mxu0 %v6801_v55  ;;  %v3133_v55 = vld [vmem:[#allocation2 + $0xc] sm:$0x1]  ;;  %v4173_v62 = vor.u32 %v4172_v3, %v4169_v44  ;;  %v4584_v3 = vrot.slane %v4582_v25, 5  ;;  %v6818_v25 = vld [vmem:[%s8046_s2 + $0x270] sm:$0xff]  }
 0x1ce   : > { %6516 = vmatprep.subr.bf16.mxu0 %v6803_v34  ;;  %v3151_v11 = vshll.u32 %v3133_v55, 16  ;;  %v4571_v55 = vsel %vm6958_vm3, %v4566_v32, %v4570_v1 }
 0x1cf   : > { %6303 = vmatpush3.bf16.msra.mxu1 %v6804_v59  ;;  %v4187_v59 = vor.u32 %v4186_v13, %v4183_v12  ;;  %v4174_v18 = vrot.slane %v4173_v62, 4  ;;  %v6811_v13 = vld [vmem:[%s8046_s2 + $0x390] sm:$0xff]  }
 0x1d0   : > { %6384 = vmatprep.subr.bf16.mxu1 %v6806_v14  ;;  %v3153_v35 = vrot.slane %v3151_v11, 5 }
 0x1d1   : > { %6517 = vmatpush3.bf16.msra.mxu0 %v6803_v34  ;;  %v3163_v34 = vrot.slane %v3162_v2, 4  ;;  %v4188_v8 = vrot.slane %v4187_v59, 4  ;;  %v4179_v44 = vsel %vm6958_vm3, %v4174_v18, %v4178_v30  ;;  %v3136_v2 = vld [vmem:[#allocation2 + $0x24] sm:$0x1]  ;;  %v4585_v59 = vsel %vm6958_vm3, %v4580_v16, %v4584_v3 }
 0x1d2   : > { %6518 = vmatprep.subr.bf16.mxu0 %v6805_v26  ;;  %6305 = vmatmul.mubr.bf16.vlgmr.msra.gmra.mrb[8].mxu1 %v5427_v5  ;;  %v4151_v5 = vsel %vm6958_vm3, %v4146_v24, %v7659_v56  ;;  %v7721_v56 = vld [vmem:[#allocation2 + $0x20] sm:$0xf]  ;;  %v3154_v33 = vsel %vm6958_vm3, %v3149_v28, %v3153_v35  ;;  %v7741_v24 = vld [vmem:[#allocation2 + $0x30] sm:$0xf]  ;;  %v3193_v61 = vshll.u32 %v3136_v2, 16  ;;  %v6816_v28 = vld [vmem:[%s8046_s2 + $0x268] sm:$0xff]  }
 0x1d3   : > { %6308 = vmatprep.mubr.bf16.mxu1 %v5428_v20  ;;  %6385 = vmatpush3.bf16.msra.mxu1 %v6806_v14  ;;  %v5712_v20 = vcombine.low %v4151_v5, %v4165_v39  ;;  %v3168_v22 = vsel %vm6958_vm3, %v3163_v34, %v3167_v51  ;;  %v5429_v14 = vcombine.low %v7686_v46, %v2263_v58  ;;  %v3184_v36 = vshrl.u32 %v7721_v56, 16  ;;  %v7755_v39 = vld [vmem:[#allocation2 + $0x28] sm:$0xf] }
 0x1d4   : > { %6386 = vmatprep.subr.bf16.mxu1 %v6808_v49  ;;  %v4193_v12 = vsel %vm6958_vm3, %v4188_v8, %v4192_v27  ;;  %v5562_v48 = vcombine.low %v3154_v33, %v3168_v22  ;;  %v4590_v46 = vshll.u32 %v4546_v21, 16  ;;  %v3212_v62 = vshrl.u32 %v7741_v24, 16  ;;  %v6815_v8 = vld [vmem:[%s8046_s2 + $0x3a0] sm:$0xff]   ;;  %v4552_v22 = vld [vmem:[#allocation2 + $0x38] sm:$0xf] }
 0x1d5   : > { %6519 = vmatpush3.bf16.msra.mxu0 %v6805_v26  ;;  %v3175_v26 = vrot.slane %v3173_v0, 5  ;;  %v5713_v52 = vcombine.low %v4179_v44, %v4193_v12  ;;  %v3186_v58 = vrot.slane %v3184_v36, 4  ;;  %v3215_v11 = vshll.u32 %v7741_v24, 16  ;;  %v3138_v36 = vld [vmem:[#allocation2 + $0x34] sm:$0x1]  ;;  %v6817_v44 = vld [vmem:[%s8046_s2 + $0x3a8] sm:$0xff]  }
 0x1d6   : > { %6528 = vmatprep.subr.bf16.mxu0 %v6807_v10  ;;  %v5738_v34 = vcombine.low %v4571_v55, %v4585_v59  ;;  %v4592_v40 = vrot.slane %v4590_v46, 5  ;;  %v4604_v51 = vshll.u32 %v4548_v47, 16  ;;  %v3214_v18 = vrot.slane %v3212_v62, 4  ;;  %v6820_v62 = vld [vmem:[%s8046_s2 + $0x278] sm:$0xff]  }
 0x1d7   : > { %6387 = vmatpush3.bf16.msra.mxu1 %v6808_v49  ;;  %v3176_v54 = vor.u32 %v3175_v26, %v3172_v38  ;;  %v4587_v49 = vshrl.u32 %v4546_v21, 16  ;;  %v3217_v35 = vrot.slane %v3215_v11, 5  ;;  %v7777_v32 = vrot.slane %v3193_v61, 5  ;;  %v6819_v61 = vld [vmem:[%s8046_s2 + $0x3b0] sm:$0xff]  }
 0x1d8   : > { %6521 = vmatmul.mubr.bf16.vlgmr.msra.gmra.mrb[16].mxu0 %v5711_v19  ;;  %6388 = vmatprep.subr.bf16.mxu1 %v6810_v4  ;;  %v3187_v19 = vshll.u32 %v7721_v56, 16  ;;  %v7779_v38 = vrot.slane %v4596_v6, 5  ;;  %v7781_v26 = vrot.slane %v4601_v37, 4  ;;  %v4629_v16 = vshrl.u32 %v4552_v22, 16 }
 0x1d9   : > { %6524 = vmatprep.mubr.bf16.mxu0 %v5712_v20  ;;  %6529 = vmatpush3.bf16.msra.mxu0 %v6807_v10  ;;  %v3179_v10 = vshll.u32 %v3135_v43, 16  ;;  %v7760_v0 = vrot.slane %v3176_v54, 4  ;;  %v4589_v5 = vrot.slane %v4587_v49, 4  ;;  %v3198_v20 = vshrl.u32 %v7755_v39, 16  ;;  %v7789_v43 = vld [vmem:[#allocation2 + $0x38] sm:$0xf] }
 0x1da   : > { %6530 = vmatprep.subr.bf16.mxu0 %v6809_v23  ;;  %6309 = vmatmul.mubr.bf16.gmra.mrb[12].mxu1 %v5429_v14  ;;  %v3189_v53 = vrot.slane %v3187_v19, 5  ;;  %v7783_v14 = vld [vmem:[#allocation2 + $0x40] sm:$0xf]  ;;  %v3218_v3 = vor.u32 %v3217_v35, %v3214_v18  ;;  %v4632_v2 = vshll.u32 %v4552_v22, 16  ;;  %v4610_v47 = vshll.u32 %v7772_v17, 16 }
 0x1db   : > { %6389 = vmatpush3.bf16.msra.mxu1 %v6810_v4  ;;  %6400 = vmatprep.mubr.bf16.mxu1 %v5562_v48  ;;  %v4550_v4 = vld [vmem:[#allocation2 + $0x30] sm:$0xf]  ;;  %v7770_v15 = vrot.slane %v3179_v10, 5  ;;  %v4593_v33 = vor.u32 %v4592_v40, %v4589_v5  ;;  %v3200_v48 = vrot.slane %v3198_v20, 4  ;;  %v3240_v19 = vshrl.u32 %v7783_v14, 16 }
 0x1dc   : > { %6390 = vmatprep.subr.bf16.mxu1 %v6812_v31  ;;  %v3190_v27 = vor.u32 %v3189_v53, %v3186_v58  ;;  %v4615_v21 = vshrl.u32 %v4550_v4, 16  ;;  %v4618_v12 = vshll.u32 %v4550_v4, 16  ;;  %v3243_v55 = vshll.u32 %v7783_v14, 16  ;;  %v7808_v5 = vld [vmem:[#allocation2 + $0x34] sm:$0x1] }
 0x1dd   : > { %6531 = vmatpush3.bf16.msra.mxu0 %v6809_v23  ;;  %v3201_v23 = vshll.u32 %v7755_v39, 16  ;;  %v3182_v30 = vsel %vm6958_vm3, %v7760_v0, %v7770_v15  ;;  %v3221_v46 = vshll.u32 %v3138_v36, 16  ;;  %v3226_v58 = vshrl.u32 %v7789_v43, 16  ;;  %v7810_v35 = vld [vmem:[#allocation2 + $0x3c] sm:$0x1] }
 0x1de   : > { %6532 = vmatprep.subr.bf16.mxu0 %v6811_v13  ;;  %v3191_v54 = vrot.slane %v3190_v27, 4  ;;  %v4620_v10 = vrot.slane %v4618_v12, 5  ;;  %v3229_v59 = vshll.u32 %v7789_v43, 16  ;;  %v7805_v11 = vrot.slane %v4593_v33, 4  ;;  %v3140_v12 = vld [vmem:[#allocation2 + $0x44] sm:$0x1] }
 0x1df   : > { %6391 = vmatpush3.bf16.msra.mxu1 %v6812_v31  ;;  %v3137_v31 = vld [vmem:[#allocation2 + $0x2c] sm:$0x1]  ;;  %v3203_v1 = vrot.slane %v3201_v23, 5  ;;  %v4631_v6 = vrot.slane %v4629_v16, 4  ;;  %v3219_v37 = vrot.slane %v3218_v3, 4  ;;  %v4634_v40 = vrot.slane %v4632_v2, 5 }
 0x1e0   : > { %6525 = vmatmul.mubr.bf16.gmra.mrb[20].mxu0 %v5713_v52  ;;  %6392 = vmatprep.subr.bf16.mxu1 %v6814_v60  ;;  %v3207_v49 = vshll.u32 %v3137_v31, 16  ;;  %v4554_v52 = vld [vmem:[#allocation2 + $0x40] sm:$0xf]  ;;  %v3223_v18 = vrot.slane %v3221_v46, 5  ;;  %v3228_v27 = vrot.slane %v3226_v58, 4  ;;  %v3196_v33 = vsel %vm6958_vm3, %v3191_v54, %v7777_v32 }
 0x1e1   : > { %6533 = vmatpush3.bf16.msra.mxu0 %v6811_v13  ;;  %6544 = vmatprep.mubr.bf16.mxu0 %v5738_v34  ;;  %v4606_v13 = vrot.slane %v4604_v51, 5  ;;  %v3204_v53 = vor.u32 %v3203_v1, %v3200_v48  ;;  %v3245_v51 = vrot.slane %v3243_v55, 5  ;;  %v4643_v20 = vshrl.u32 %v4554_v52, 16  ;;  %v6822_v31 = vld [vmem:[%s8046_s2 + $0x200] sm:$0xff]  }
 0x1e2   : > { %6534 = vmatprep.subr.bf16.mxu0 %v6813_v7  ;;  %v4646_v23 = vshll.u32 %v4554_v52, 16  ;;  %v3224_v1 = vsel %vm6958_vm3, %v3219_v37, %v3223_v18  ;;  %v4635_v16 = vor.u32 %v4634_v40, %v4631_v6  ;;  %v3249_v52 = vshll.u32 %v3140_v12, 16  ;;  %v4824_v18 = vld [vmem:[#allocation2 + $0x10] sm:$0xe]  ;;  %v4825_v12 = vld [vmem:[#allocation2 + $0x18] sm:$0xe] }
 0x1e3   : > { %6393 = vmatpush3.bf16.msra.mxu1 %v6814_v60  ;;  %v4556_v60 = vld [vmem:[#allocation2 + $0x48] sm:$0xf]  ;;  %v4607_v34 = vor.u32 %v4606_v13, %v7781_v26  ;;  %v3231_v26 = vrot.slane %v3229_v59, 5  ;;  %v3205_v36 = vrot.slane %v3204_v53, 4  ;;  %v6821_v13 = vld [vmem:[%s8046_s2 + $0x3b8] sm:$0xff]   ;;  %v4645_v3 = vrot.slane %v4643_v20, 4 }
 0x1e4   : > { %6394 = vmatprep.subr.bf16.mxu1 %v6816_v28  ;;  %v4657_v4 = vshrl.u32 %v4556_v60, 16  ;;  %v4648_v2 = vrot.slane %v4646_v23, 5  ;;  %v4636_v0 = vrot.slane %v4635_v16, 4  ;;  %v3251_v23 = vrot.slane %v3249_v52, 5 }
 0x1e5   : > { %6535 = vmatpush3.bf16.msra.mxu0 %v6813_v7  ;;  %v4617_v7 = vrot.slane %v4615_v21, 4  ;;  %v3209_v21 = vrot.slane %v3207_v49, 5  ;;  %v4608_v48 = vrot.slane %v4607_v34, 4  ;;  %v4638_v49 = vshll.u32 %v7810_v35, 16 }
 0x1e6   : > { %6536 = vmatprep.subr.bf16.mxu0 %v6815_v8  ;;  %v3232_v46 = vor.u32 %v3231_v26, %v3228_v27  ;;  %v4649_v6 = vor.u32 %v4648_v2, %v4645_v3  ;;  %v6825_v26 = vld [vmem:[%s8046_s2 + $0x3c8] sm:$0xff]   ;;  %v6827_v3 = vld [vmem:[%s8046_s2 + $0x3d0] sm:$0xff]   ;;  %v5574_v2 = vcombine.low %v7646_v50, %v7622_v45  ;;  %v6830_v50 = vld [vmem:[%s8046_s2 + $0x3d8] sm:$0xff]  }
 0x1e7   : > { %6395 = vmatpush3.bf16.msra.mxu1 %v6816_v28  ;;  %v3242_v28 = vrot.slane %v3240_v19, 4  ;;  %v4621_v22 = vor.u32 %v4620_v10, %v4617_v7  ;;  %v4659_v19 = vrot.slane %v4657_v4, 4  ;;  %v5563_v7 = vcombine.low %v3182_v30, %v3196_v33 }
 0x1e8   : > { %6396 = vmatprep.subr.bf16.mxu1 %v6818_v25  ;;  %v4612_v10 = vrot.slane %v4610_v47, 5  ;;  %v3210_v58 = vsel %vm6958_vm3, %v3205_v36, %v3209_v21  ;;  %v7840_v47 = vld [vmem:[#allocation2 + $0x4c] sm:$0x1]  ;;  %v3233_v20 = vrot.slane %v3232_v46, 4  ;;  %v4599_v4 = vsel %vm6958_vm3, %v7805_v11, %v7779_v38  ;;  %v6826_v38 = vld [vmem:[%s8046_s2 + $0x210] sm:$0xff]  }
 0x1e9   : > { %6537 = vmatpush3.bf16.msra.mxu0 %v6815_v8  ;;  %v4660_v8 = vshll.u32 %v4556_v60, 16  ;;  %v3246_v32 = vor.u32 %v3245_v51, %v3242_v28  ;;  %v4622_v54 = vrot.slane %v4621_v22, 4  ;;  %v6824_v60 = vld [vmem:[%s8046_s2 + $0x208] sm:$0xff]   ;;  %v5564_v34 = vcombine.low %v3210_v58, %v3224_v1  ;;  %v6835_v58 = vld [vmem:[%s8046_s2 + $0x230] sm:$0xff]  }
 0x1ea   : > { %6538 = vmatprep.subr.bf16.mxu0 %v6817_v44  ;;  %v4613_v53 = vsel %vm6958_vm3, %v4608_v48, %v4612_v10  ;;  %v4666_v40 = vshll.u32 %v7840_v47, 16  ;;  %v4640_v51 = vrot.slane %v4638_v49, 5  ;;  %v4650_v36 = vrot.slane %v4649_v6, 4  ;;  %v6832_v10 = vld [vmem:[%s8046_s2 + $0x3e0] sm:$0xff]  }
 0x1eb   : > { %6397 = vmatpush3.bf16.msra.mxu1 %v6818_v25  ;;  %v4624_v25 = vshll.u32 %v7808_v5, 16  ;;  %v4662_v55 = vrot.slane %v4660_v8, 5  ;;  %v3247_v30 = vrot.slane %v3246_v32, 4  ;;  %v5739_v22 = vcombine.low %v4599_v4, %v4613_v53  ;;  %v4826_v53 = vld [vmem:[#allocation2 + $0x20] sm:$0xe] }
 0x1ec   : > { %6398 = vmatprep.subr.bf16.mxu1 %v6820_v62  ;;  %v4641_v27 = vsel %vm6958_vm3, %v4636_v0, %v4640_v51  ;;  %v5750_v48 = vrot.slane %v4824_v18, 9  ;;  %v4850_v1 = vrot.slane %v7700_v63, 5  ;;  %v4854_v63 = vrot.slane %v7706_v57, 5  ;;  %v6831_v57 = vld [vmem:[%s8046_s2 + $0x220] sm:$0xff]  }
 0x1ed   : > { %6539 = vmatpush3.bf16.msra.mxu0 %v6817_v44  ;;  %v3139_v44 = vld [vmem:[#allocation2 + $0x3c] sm:$0x1]  ;;  %v4626_v59 = vrot.slane %v4624_v25, 5  ;;  %v4663_v37 = vor.u32 %v4662_v55, %v4659_v19  ;;  %v4668_v25 = vrot.slane %v4666_v40, 5  ;;  %v5751_v19 = vrot.slane %v4825_v12, 9  ;;  %v6840_v0 = vld [vmem:[%s8046_s2 + $0x280] sm:$0xff]  }
 0x1ee   : > { %6540 = vmatprep.subr.bf16.mxu0 %v6819_v61  ;;  %v3235_v15 = vshll.u32 %v3139_v44, 16  ;;  %v6829_v44 = vld [vmem:[%s8046_s2 + $0x218] sm:$0xff]   ;;  %v4851_v49 = vsel %vm7390_vm5, %v5750_v48, %v4850_v1  ;;  %v4866_v51 = vrot.slane %v7808_v5, 5  ;;  %v4858_v4 = vrot.slane %v7745_v42, 5  ;;  %v4831_v42 = vld [vmem:[#allocation2 + $0x48] sm:$0xe] }
 0x1ef   : > { %6399 = vmatpush3.bf16.msra.mxu1 %v6820_v62  ;;  %v7835_v62 = vld [vmem:[#allocation2 + $0x44] sm:$0x1]  ;;  %v4627_v28 = vsel %vm6958_vm3, %v4622_v54, %v4626_v59  ;;  %v4664_v21 = vrot.slane %v4663_v37, 4  ;;  %v4855_v45 = vsel %vm7390_vm5, %v5751_v19, %v4854_v63  ;;  %v6834_v59 = vld [vmem:[%s8046_s2 + $0x3e8] sm:$0xff]   ;;  %v4862_v37 = vrot.slane %v7772_v17, 5 }
 0x1f0   : > { %6408 = vmatprep.subr.bf16.mxu1 %v6822_v31  ;;  %v4652_v8 = vshll.u32 %v7835_v62, 16  ;;  %v3237_v33 = vrot.slane %v3235_v15, 5  ;;  %v5740_v11 = vcombine.low %v4627_v28, %v4641_v27  ;;  %v5774_v52 = vcombine.low %v4851_v49, %v4855_v45  ;;  %v4828_v15 = vld [vmem:[#allocation2 + $0x30] sm:$0xe]  ;;  %v4829_v40 = vld [vmem:[#allocation2 + $0x38] sm:$0xe] }
 0x1f1   : > { %6541 = vmatpush3.bf16.msra.mxu0 %v6819_v61  ;;  %v6823_v61 = vld [vmem:[%s8046_s2 + $0x3c0] sm:$0xff]   ;;  %v4669_v54 = vsel %vm6958_vm3, %v4664_v21, %v4668_v25  ;;  %v5754_v28 = vrot.slane %v4828_v15, 9  ;;  %v5576_v17 = vcombine.low %v7755_v39, %v7741_v24  ;;  %v5755_v18 = vrot.slane %v4829_v40, 9  ;;  %v6844_v24 = vld [vmem:[%s8046_s2 + $0x290] sm:$0xff]   ;;  %v6846_v21 = vld [vmem:[%s8046_s2 + $0x298] sm:$0xff]  }
 0x1f2   : > { %6542 = vmatprep.subr.bf16.mxu0 %v6821_v13  ;;  %6401 = vmatmul.mubr.bf16.vlgmr.msra.gmra.mrb[16].mxu1 %v5563_v7  ;;  %v4654_v32 = vrot.slane %v4652_v8, 5  ;;  %v6833_v7 = vld [vmem:[%s8046_s2 + $0x228] sm:$0xff]   ;;  %v6845_v25 = vld [vmem:[#allocation2 + $0x10] ss:$8 sps:$4 sm:$0xff]   ;;  %v6852_v63 = vld [vmem:[%s8046_s2 + $0x2c0] sm:$0xff]  }
 0x1f3   : > { %6404 = vmatprep.mubr.bf16.mxu1 %v5564_v34  ;;  %6409 = vmatpush3.bf16.msra.mxu1 %v6822_v31  ;;  %v3252_v31 = vsel %vm6958_vm3, %v3247_v30, %v3251_v23  ;;  %v4827_v34 = vld [vmem:[#allocation2 + $0x28] sm:$0xe]  ;;  %v6838_v30 = vld [vmem:[%s8046_s2 + $0x3f8] sm:$0xff]   ;;  %v5752_v23 = vrot.slane %v4826_v53, 9  ;;  %v3708_v49 = vld [vmem:[#allocation2 + $0x14] sm:$0x1] }
 0x1f4   : > { %6410 = vmatprep.subr.bf16.mxu1 %v6824_v60  ;;  %v4655_v55 = vsel %vm6958_vm3, %v4650_v36, %v4654_v32  ;;  %v5753_v6 = vrot.slane %v4827_v34, 9  ;;  %v6842_v8 = vld [vmem:[%s8046_s2 + $0x288] sm:$0xff]   ;;  %v5577_v36 = vcombine.low %v7789_v43, %v7783_v14  ;;  %v6847_v14 = vld [vmem:[%s8046_s2 + $0x2a0] sm:$0xff]   ;;  %v3709_v48 = vld [vmem:[#allocation2 + $0x18] sm:$0xf] }
 0x1f5   : > { %6543 = vmatpush3.bf16.msra.mxu0 %v6821_v13  ;;  %v3238_v13 = vsel %vm6958_vm3, %v3233_v20, %v3237_v33  ;;  %v5741_v46 = vcombine.low %v4655_v55, %v4669_v54  ;;  %v5575_v20 = vcombine.low %v7688_v9, %v7721_v56  ;;  %v4830_v9 = vld [vmem:[#allocation2 + $0x40] sm:$0xe]  ;;  %v4867_v56 = vsel %vm7390_vm5, %v5754_v28, %v4866_v51  ;;  %v6850_v32 = vld [vmem:[%s8046_s2 + $0x2b8] sm:$0xff]   ;;  %v3713_v40 = vld [vmem:[#allocation2 + $0x28] sm:$0xf] }
 0x1f6   : > { %6552 = vmatprep.subr.bf16.mxu0 %v6823_v61  ;;  %v5565_v16 = vcombine.low %v3238_v13, %v3252_v31  ;;  %v4863_v5 = vsel %vm7390_vm5, %v5753_v6, %v4862_v37  ;;  %v4859_v27 = vsel %vm7390_vm5, %v5752_v23, %v4858_v4  ;;  %v4874_v31 = vrot.slane %v7835_v62, 5  ;;  %v3707_v13 = vld [vmem:[#allocation2 + $0x10] sm:$0xf]  ;;  %v3710_v45 = vld [vmem:[#allocation2 + $0x1c] sm:$0x1]  ;;  %v6858_v51 = vld [vmem:[%s8046_s2 + $0x2e0] sm:$0xff]  }
 0x1f7   : > { %6411 = vmatpush3.bf16.msra.mxu1 %v6824_v60  ;;  %v6837_v60 = vld [vmem:[%s8046_s2 + $0x238] sm:$0xff]   ;;  %v5775_v39 = vcombine.low %v4859_v27, %v4863_v5  ;;  %v3724_v1 = vshrl.u32 %v3707_v13, 16  ;;  %v3715_v28 = vld [vmem:[#allocation2 + $0x30] sm:$0xf]  ;;  %v3766_v23 = vshrl.u32 %v3713_v40, 16  ;;  %v3769_v4 = vshll.u32 %v3713_v40, 16 }
 0x1f8   : > { %6545 = vmatmul.mubr.bf16.vlgmr.msra.gmra.mrb[16].mxu0 %v5739_v22  ;;  %6412 = vmatprep.subr.bf16.mxu1 %v6826_v38  ;;  %v4870_v22 = vrot.slane %v7810_v35, 5  ;;  %v6857_v6 = vld [vmem:[%s8046_s2 + $0x2d8] sm:$0xff]  }
 0x1f9   : > { %6548 = vmatprep.mubr.bf16.mxu0 %v5740_v11  ;;  %6553 = vmatpush3.bf16.msra.mxu0 %v6823_v61  ;;  %v6836_v61 = vld [vmem:[%s8046_s2 + $0x3f0] sm:$0xff]   ;;  %v4878_v11 = vrot.slane %v7840_v47, 5  ;;  %v6848_v47 = vld [vmem:[%s8046_s2 + $0x2a8] sm:$0xff]  }
 0x1fa   : > { %6554 = vmatprep.subr.bf16.mxu0 %v6825_v26  ;;  %6405 = vmatmul.mubr.bf16.gmra.mrb[20].mxu1 %v5565_v16  ;;  %v4871_v35 = vsel %vm7390_vm5, %v5755_v18, %v4870_v22  ;;  %v3727_v16 = vshll.u32 %v3707_v13, 16  ;;  %v3783_v18 = vshll.u32 %v3715_v28, 16 }
 0x1fb   : > { %6413 = vmatpush3.bf16.msra.mxu1 %v6826_v38  ;;  %6424 = vmatprep.mubr.bf16.mxu1 %v5574_v2  ;;  %v5776_v33 = vcombine.low %v4867_v56, %v4871_v35  ;;  %v5757_v38 = vrot.slane %v4831_v42, 9  ;;  %v3726_v2 = vrot.slane %v3724_v1, 4  ;;  %v3768_v56 = vrot.slane %v3766_v23, 4 }
 0x1fc   : > { %6414 = vmatprep.subr.bf16.mxu1 %v6829_v44  ;;  %v3729_v19 = vrot.slane %v3727_v16, 5  ;;  %v3771_v42 = vrot.slane %v3769_v4, 5  ;;  %v3785_v35 = vrot.slane %v3783_v18, 5 }
 0x1fd   : > { %6555 = vmatpush3.bf16.msra.mxu0 %v6825_v26  ;;  %v5756_v26 = vrot.slane %v4830_v9, 9  ;;  %v4879_v62 = vsel %vm7390_vm5, %v5757_v38, %v4878_v11  ;;  %v6859_v9 = vld [vmem:[%s8046_s2 + $0x2e8] sm:$0xff]  }
 0x1fe   : > { %6556 = vmatprep.subr.bf16.mxu0 %v6827_v3 }
 0x1ff   : > { %6415 = vmatpush3.bf16.msra.mxu1 %v6829_v44  ;;  %v4875_v12 = vsel %vm7390_vm5, %v5756_v26, %v4874_v31  ;;  %v3738_v44 = vshrl.u32 %v3709_v48, 16  ;;  %v3719_v26 = vld [vmem:[#allocation2 + $0x40] sm:$0xf]  ;;  %v3712_v31 = vld [vmem:[#allocation2 + $0x24] sm:$0x1] }
 0x200   : > { %6549 = vmatmul.mubr.bf16.gmra.mrb[20].mxu0 %v5741_v46  ;;  %6416 = vmatprep.subr.bf16.mxu1 %v6831_v57  ;;  %v5777_v43 = vcombine.low %v4875_v12, %v4879_v62  ;;  %v3730_v46 = vor.u32 %v3729_v19, %v3726_v2 }
 0x201   : > { %6557 = vmatpush3.bf16.msra.mxu0 %v6827_v3  ;;  %6568 = vmatprep.mubr.bf16.mxu0 %v5774_v52  ;;  %v3741_v3 = vshll.u32 %v3709_v48, 16  ;;  %v3740_v55 = vrot.slane %v3738_v44, 4  ;;  %v3733_v52 = vshll.u32 %v3708_v49, 16  ;;  %v6861_v44 = vld [vmem:[%s8046_s2 + $0x2f8] sm:$0xff]  }
 0x202   : > { %6558 = vmatprep.subr.bf16.mxu0 %v6830_v50 }
 0x203   : > { %6417 = vmatpush3.bf16.msra.mxu1 %v6831_v57  ;;  %v3743_v54 = vrot.slane %v3741_v3, 5  ;;  %v6854_v57 = vld [vmem:[%s8046_s2 + $0x2c8] sm:$0xff]   ;;  %v3761_v3 = vshll.u32 %v3712_v31, 16 }
 0x204   : > { %6418 = vmatprep.subr.bf16.mxu1 %v6833_v7 }
 0x205   : > { %6559 = vmatpush3.bf16.msra.mxu0 %v6830_v50  ;;  %v6851_v50 = vld [vmem:[#allocation2 + $0x20] ss:$8 sps:$4 sm:$0xff]  }
 0x206   : > { %6560 = vmatprep.subr.bf16.mxu0 %v6832_v10 }
 0x207   : > { %6419 = vmatpush3.bf16.msra.mxu1 %v6833_v7  ;;  %v3744_v7 = vor.u32 %v3743_v54, %v3740_v55 }
 0x208   : > { %6420 = vmatprep.subr.bf16.mxu1 %v6835_v58 }
 0x209   : > { %6561 = vmatpush3.bf16.msra.mxu0 %v6832_v10  ;;  %v6853_v10 = vld [vmem:[#allocation2 + $0x30] ss:$8 sps:$4 sm:$0xff]   ;;  %v3745_v34 = vrot.slane %v3744_v7, 4 }
 0x20a   : > { %6562 = vmatprep.subr.bf16.mxu0 %v6834_v59 }
 0x20b   : > { %6421 = vmatpush3.bf16.msra.mxu1 %v6835_v58  ;;  %v3731_v58 = vrot.slane %v3730_v46, 4 }
 0x20c   : > { %6422 = vmatprep.subr.bf16.mxu1 %v6837_v60 }
 0x20d   : > { %6563 = vmatpush3.bf16.msra.mxu0 %v6834_v59  ;;  %v3747_v59 = vshll.u32 %v3710_v45, 16 }
 0x20e   : > { %6564 = vmatprep.subr.bf16.mxu0 %v6836_v61 }
 0x20f   : > { %6423 = vmatpush3.bf16.msra.mxu1 %v6837_v60  ;;  %v6856_v60 = vld [vmem:[%s8046_s2 + $0x2d0] sm:$0xff]   ;;  %v3749_v15 = vrot.slane %v3747_v59, 5 }
 0x210   : > { %6432 = vmatprep.subr.bf16.mxu1 %v6840_v0 }
 0x211   : > { %6565 = vmatpush3.bf16.msra.mxu0 %v6836_v61  ;;  %v3735_v61 = vrot.slane %v3733_v52, 5  ;;  %v3750_v53 = vsel %vm6958_vm3, %v3745_v34, %v3749_v15 }
 0x212   : > { %6566 = vmatprep.subr.bf16.mxu0 %v6838_v30  ;;  %6425 = vmatmul.mubr.bf16.vlgmr.msra.gmra.mrb[16].mxu1 %v5575_v20  ;;  %v3711_v20 = vld [vmem:[#allocation2 + $0x20] sm:$0xf] }
 0x213   : > { %6428 = vmatprep.mubr.bf16.mxu1 %v5576_v17  ;;  %6433 = vmatpush3.bf16.msra.mxu1 %v6840_v0  ;;  %v3736_v0 = vsel %vm6958_vm3, %v3731_v58, %v3735_v61  ;;  %v3780_v17 = vshrl.u32 %v3715_v28, 16  ;;  %v3752_v22 = vshrl.u32 %v3711_v20, 16  ;;  %v3755_v5 = vshll.u32 %v3711_v20, 16 }
 0x214   : > { %6434 = vmatprep.subr.bf16.mxu1 %v6842_v8  ;;  %v5630_v37 = vcombine.low %v3736_v0, %v3750_v53 }
 0x215   : > { %6567 = vmatpush3.bf16.msra.mxu0 %v6838_v30  ;;  %v6855_v30 = vld [vmem:[#allocation2 + $0x40] ss:$8 sps:$4 sm:$0xff]   ;;  %v3754_v38 = vrot.slane %v3752_v22, 4  ;;  %v3757_v11 = vrot.slane %v3755_v5, 5 }
 0x217   : > { %6435 = vmatpush3.bf16.msra.mxu1 %v6842_v8  ;;  %v3717_v8 = vld [vmem:[#allocation2 + $0x38] sm:$0xf]  ;;  %v3758_v1 = vor.u32 %v3757_v11, %v3754_v38 }
 0x218   : > { %6569 = vmatmul.mubr.bf16.vlgmr.msra.gmra.mrb[16].mxu0 %v5775_v39  ;;  %6436 = vmatprep.subr.bf16.mxu1 %v6844_v24  ;;  %v3794_v27 = vshrl.u32 %v3717_v8, 16  ;;  %v3782_v39 = vrot.slane %v3780_v17, 4 }
 0x219   : > { %6572 = vmatprep.mubr.bf16.mxu0 %v5776_v33  ;;  %v3721_v33 = vld [vmem:[#allocation2 + $0x48] sm:$0xf]  ;;  %v3759_v52 = vrot.slane %v3758_v1, 4 }
 0x21a   : > { %6429 = vmatmul.mubr.bf16.gmra.mrb[20].mxu1 %v5577_v36  ;;  %v6860_v36 = vld [vmem:[%s8046_s2 + $0x2f0] sm:$0xff]   ;;  %v3796_v12 = vrot.slane %v3794_v27, 4  ;;  %v3822_v13 = vshrl.u32 %v3721_v33, 16  ;;  %v3786_v48 = vor.u32 %v3785_v35, %v3782_v39 }
 0x21b   : > { %6437 = vmatpush3.bf16.msra.mxu1 %v6844_v24  ;;  %6448 = vmatprep.mubr.bf16.mxu1 %v6845_v25  ;;  %v3797_v24 = vshll.u32 %v3717_v8, 16  ;;  %v3772_v25 = vor.u32 %v3771_v42, %v3768_v56 }
 0x21c   : > { %6438 = vmatprep.subr.bf16.mxu1 %v6846_v21  ;;  %v3824_v49 = vrot.slane %v3822_v13, 4  ;;  %v3787_v45 = vrot.slane %v3786_v48, 4 }
 0x21d   : > { %v3799_v62 = vrot.slane %v3797_v24, 5  ;;  %v3773_v2 = vrot.slane %v3772_v25, 4 }
 0x21f   : > { %6439 = vmatpush3.bf16.msra.mxu1 %v6846_v21  ;;  %v3714_v21 = vld [vmem:[#allocation2 + $0x2c] sm:$0x1] }
 0x220   : > { %6573 = vmatmul.mubr.bf16.gmra.mrb[20].mxu0 %v5777_v43  ;;  %6440 = vmatprep.subr.bf16.mxu1 %v6847_v14  ;;  %v3808_v43 = vshrl.u32 %v3719_v26, 16  ;;  %v3775_v16 = vshll.u32 %v3714_v21, 16 }
 0x222   : > { %v3810_v55 = vrot.slane %v3808_v43, 4  ;;  %v3777_v7 = vrot.slane %v3775_v16, 5 }
 0x223   : > { %6441 = vmatpush3.bf16.msra.mxu1 %v6847_v14  ;;  %v3716_v14 = vld [vmem:[#allocation2 + $0x34] sm:$0x1] }
 0x224   : > { %6442 = vmatprep.subr.bf16.mxu1 %v6848_v47  ;;  %v3789_v19 = vshll.u32 %v3716_v14, 16  ;;  %v3778_v61 = vsel %vm6958_vm3, %v3773_v2, %v3777_v7 }
 0x226   : > { %v3791_v58 = vrot.slane %v3789_v19, 5 }
 0x227   : > { %6443 = vmatpush3.bf16.msra.mxu1 %v6848_v47  ;;  %v3811_v47 = vshll.u32 %v3719_v26, 16 }
 0x228   : > { %6444 = vmatprep.subr.bf16.mxu1 %v6849_v41 }
 0x229   : > { %v3813_v54 = vrot.slane %v3811_v47, 5 }
 0x22b   : > { %6445 = vmatpush3.bf16.msra.mxu1 %v6849_v41  ;;  %v3825_v41 = vshll.u32 %v3721_v33, 16  ;;  %v3814_v34 = vor.u32 %v3813_v54, %v3810_v55 }
 0x22c   : > { %6446 = vmatprep.subr.bf16.mxu1 %v6850_v32 }
 0x22d   : > { %v3827_v46 = vrot.slane %v3825_v41, 5  ;;  %v3815_v20 = vrot.slane %v3814_v34, 4 }
 0x22f   : > { %6447 = vmatpush3.bf16.msra.mxu1 %v6850_v32  ;;  %v3718_v32 = vld [vmem:[#allocation2 + $0x3c] sm:$0x1]  ;;  %v3828_v0 = vor.u32 %v3827_v46, %v3824_v49 }
 0x230   : > { %6456 = vmatprep.subr.bf16.mxu1 %v6852_v63 }
 0x231   : > { %v3829_v23 = vrot.slane %v3828_v0, 4 }
 0x232   : > { %6449 = vmatmul.mubr.bf16.vlgmr.msra.gmra.mrb[16].mxu1 %v6851_v50  ;;  %v3803_v50 = vshll.u32 %v3718_v32, 16 }
 0x233   : > { %6452 = vmatprep.mubr.bf16.mxu1 %v6853_v10  ;;  %6457 = vmatpush3.bf16.msra.mxu1 %v6852_v63  ;;  %v3800_v63 = vor.u32 %v3799_v62, %v3796_v12  ;;  %v3763_v10 = vrot.slane %v3761_v3, 5 }
 0x234   : > { %6458 = vmatprep.subr.bf16.mxu1 %v6854_v57  ;;  %v3805_v53 = vrot.slane %v3803_v50, 5 }
 0x235   : > { %v3801_v59 = vrot.slane %v3800_v63, 4 }
 0x237   : > { %6459 = vmatpush3.bf16.msra.mxu1 %v6854_v57  ;;  %v3722_v57 = vld [vmem:[#allocation2 + $0x4c] sm:$0x1]  ;;  %v3806_v28 = vsel %vm6958_vm3, %v3801_v59, %v3805_v53 }
 0x238   : > { %6460 = vmatprep.subr.bf16.mxu1 %v6856_v60  ;;  %v3831_v15 = vshll.u32 %v3722_v57, 16 }
 0x23a   : > { %6453 = vmatmul.mubr.bf16.gmra.mrb[20].mxu1 %v6855_v30  ;;  %v3792_v30 = vsel %vm6958_vm3, %v3787_v45, %v3791_v58  ;;  %v3833_v4 = vrot.slane %v3831_v15, 5 }
 0x23b   : > { %6461 = vmatpush3.bf16.msra.mxu1 %v6856_v60  ;;  %6472 = vmatprep.mubr.bf16.mxu1 %v5630_v37  ;;  %v3720_v60 = vld [vmem:[#allocation2 + $0x44] sm:$0x1] }
 0x23c   : > { %6462 = vmatprep.subr.bf16.mxu1 %v6857_v6  ;;  %v3817_v37 = vshll.u32 %v3720_v60, 16  ;;  %v3834_v18 = vsel %vm6958_vm3, %v3829_v23, %v3833_v4 }
 0x23e   : > { %v3819_v8 = vrot.slane %v3817_v37, 5 }
 0x23f   : > { %6463 = vmatpush3.bf16.msra.mxu1 %v6857_v6  ;;  %v3764_v6 = vsel %vm6958_vm3, %v3759_v52, %v3763_v10 }
 0x240   : > { %6464 = vmatprep.subr.bf16.mxu1 %v6858_v51  ;;  %v5631_v40 = vcombine.low %v3764_v6, %v3778_v61  ;;  %v3820_v17 = vsel %vm6958_vm3, %v3815_v20, %v3819_v8 }
 0x241   : > { %v5633_v22 = vcombine.low %v3820_v17, %v3834_v18 }
 0x243   : > { %6465 = vmatpush3.bf16.msra.mxu1 %v6858_v51  ;;  %v5632_v51 = vcombine.low %v3792_v30, %v3806_v28 }
 0x244   : > { %6466 = vmatprep.subr.bf16.mxu1 %v6859_v9 }
 0x247   : > { %6467 = vmatpush3.bf16.msra.mxu1 %v6859_v9 }
 0x248   : > { %6468 = vmatprep.subr.bf16.mxu1 %v6860_v36 }
 0x24b   : > { %6469 = vmatpush3.bf16.msra.mxu1 %v6860_v36 }
 0x24c   : > { %6470 = vmatprep.subr.bf16.mxu1 %v6861_v44 }
 0x24f   : > { %6471 = vmatpush3.bf16.msra.mxu1 %v6861_v44 }
 0x252   : > { %6473 = vmatmul.mubr.bf16.vlgmr.msra.gmra.mrb[16].mxu1 %v5631_v40 }
 0x253   : > { %6476 = vmatprep.mubr.bf16.mxu1 %v5632_v51 }
 0x25a   : > { %6477 = vmatmul.mubr.bf16.gmra.mrb[20].mxu1 %v5633_v22 }
 0x26b   : > { %v6378_v5 = vpop.f32.mrb[8].mxu0 }
 0x26c   : > { %v2992_v9 = vpop.f32.mrb[9].mxu0 }
 0x26d   : > { %v6379_v56 = vpop.f32.mrb[10].mxu0 }
 0x26e   : > { %v2995_v42 = vpop.f32.mrb[11].mxu0 }
 0x273   : > { %v7997_v27 = vpop.f32.mrb[12].mxu0 }
 0x274   : > { %v7999_v24 = vpop.f32.mrb[13].mxu0 }
 0x275   : > { %v8001_v39 = vpop.f32.mrb[14].mxu0 }
 0x276   : > { %v8003_v35 = vpop.f32.mrb[15].mxu0 }
 0x285   : > { %v6282_v26 = vpop.f32.mrb[0].mxu1 }
 0x286   : > { %v1945_v33 = vpop.f32.mrb[1].mxu1  ;;  %v2040_v12 = vmul.f32 %v6282_v26, %v6282_v26 }
 0x287   : > { %v6283_v29 = vpop.f32.mrb[2].mxu1  ;;  %v2038_v11 = vmul.f32 %v1945_v33, %v1945_v33 }
 0x288   : > { %v5853_v31 = vpack.c.bf16 %v6283_v29, %v6282_v26  ;;  %v1948_v38 = vpop.f32.mrb[3].mxu1  ;;  %v2041_v43 = vmul.f32 %v6283_v29, %v6283_v29 }
 0x289   : > { %v5848_v36 = vpack.c.bf16 %v1948_v38, %v1945_v33  ;;  %v2024_v21 = vadd.f32 %v1948_v38, %v1945_v33  ;;  %v2039_v25 = vmul.f32 %v1948_v38, %v1948_v38 }
 0x28a   : > { %5925 = vst [vmem:[%s8009_s24 + $0x8] sm:$0xff] %v5853_v31  }
 0x28b   : > { %5849 = vst [vmem:[%s8009_s24] sm:$0xff] %v5848_v36   ;;  %v2025_v62 = vadd.f32 %v6282_v26, %v2024_v21  ;;  %v2046_v14 = vadd.f32 %v2039_v25, %v2038_v11 }
 0x28d   : > { %v2047_v47 = vadd.f32 %v2046_v14, %v2040_v12  ;;  %v6286_v13 = vpop.f32.mrb[4].mxu1  ;;  %v2026_v41 = vadd.f32 %v6283_v29, %v2025_v62 }
 0x28e   : > { %v1961_v48 = vpop.f32.mrb[5].mxu1  ;;  %v2044_v49 = vmul.f32 %v6286_v13, %v6286_v13 }
 0x28f   : > { %v2027_v1 = vadd.f32 %v2026_v41, %v1961_v48  ;;  %v2042_v16 = vmul.f32 %v1961_v48, %v1961_v48  ;;  %v2048_v32 = vadd.f32 %v2047_v47, %v2041_v43  ;;  %v6287_v44 = vpop.f32.mrb[6].mxu1 }
 0x290   : > { %v5863_v3 = vpack.c.bf16 %v6287_v44, %v6286_v13  ;;  %v1964_v2 = vpop.f32.mrb[7].mxu1  ;;  %v2045_v50 = vmul.f32 %v6287_v44, %v6287_v44 }
 0x291   : > { %v2049_v19 = vadd.f32 %v2048_v32, %v2042_v16  ;;  %v5858_v63 = vpack.c.bf16 %v1964_v2, %v1961_v48  ;;  %v2028_v55 = vadd.f32 %v2027_v1, %v1964_v2  ;;  %v2043_v54 = vmul.f32 %v1964_v2, %v1964_v2 }
 0x292   : > { %5927 = vst [vmem:[%s8009_s24 + $0x18] sm:$0xff] %v5863_v3  }
 0x293   : > { %5926 = vst [vmem:[%s8009_s24 + $0x10] sm:$0xff] %v5858_v63   ;;  %v2029_v46 = vadd.f32 %v6286_v13, %v2028_v55  ;;  %v2050_v45 = vadd.f32 %v2049_v19, %v2043_v54 }
 0x295   : > { %v2030_v57 = vadd.f32 %v6287_v44, %v2029_v46  ;;  %v2051_v52 = vadd.f32 %v2050_v45, %v2044_v49 }
 0x297   : > { %v2052_v7 = vadd.f32 %v2051_v52, %v2045_v50  ;;  %v2031_v4 = vrot.slane %v2030_v57, 4 }
 0x299   : > { %v2032_v36 = vadd.f32 %v2031_v4, %v2030_v57 }
 0x29b   : > { %v2033_v13 = vrot.slane %v2032_v36, 2 }
 0x2a5   : > { %v6306_v10 = vpop.f32.mrb[8].mxu1 }
 0x2a6   : > { %v6576_v58 = vadd.f32 %v6378_v5, %v6306_v10  ;;  %v2379_v59 = vpop.f32.mrb[9].mxu1 }
 0x2a7   : > { %v6577_v60 = vadd.f32 %v2992_v9, %v2379_v59  ;;  %v6307_v61 = vpop.f32.mrb[10].mxu1 }
 0x2a8   : > { %v6578_v34 = vadd.f32 %v6379_v56, %v6307_v61  ;;  %v2382_v0 = vpop.f32.mrb[11].mxu1  ;;  %v3088_v28 = vmul.f32 %v6576_v58, %v6576_v58 }
 0x2a9   : > { %v6579_v15 = vadd.f32 %v2995_v42, %v2382_v0  ;;  %v3086_v53 = vmul.f32 %v6577_v60, %v6577_v60  ;;  %v2053_v42 = vrot.slane %v2052_v7, 4 }
 0x2aa   : > { %v5873_v30 = vpack.c.bf16 %v6578_v34, %v6576_v58  ;;  %v3089_v18 = vmul.f32 %v6578_v34, %v6578_v34 }
 0x2ab   : > { %v5868_v6 = vpack.c.bf16 %v6579_v15, %v6577_v60  ;;  %v3072_v37 = vadd.f32 %v6579_v15, %v6577_v60  ;;  %v3087_v40 = vmul.f32 %v6579_v15, %v6579_v15 }
 0x2ac   : > { %5929 = vst [vmem:[%s8009_s24 + $0x28] sm:$0xff] %v5873_v30  }
 0x2ad   : > { %5928 = vst [vmem:[%s8009_s24 + $0x20] sm:$0xff] %v5868_v6   ;;  %v3073_v51 = vadd.f32 %v6576_v58, %v3072_v37  ;;  %v3094_v20 = vadd.f32 %v3087_v40, %v3086_v53  ;;  %v6310_v23 = vpop.f32.mrb[12].mxu1 }
 0x2ae   : > { %v6580_v8 = vadd.f32 %v7997_v27, %v6310_v23  ;;  %v2395_v17 = vpop.f32.mrb[13].mxu1 }
 0x2af   : > { %v3095_v22 = vadd.f32 %v3094_v20, %v3088_v28  ;;  %v6581_v5 = vadd.f32 %v7999_v24, %v2395_v17  ;;  %v3074_v9 = vadd.f32 %v6578_v34, %v3073_v51  ;;  %v6311_v56 = vpop.f32.mrb[14].mxu1  ;;  %v2054_v24 = vadd.f32 %v2053_v42, %v2052_v7 }
 0x2b0   : > { %v6582_v26 = vadd.f32 %v8001_v39, %v6311_v56  ;;  %v2398_v33 = vpop.f32.mrb[15].mxu1  ;;  %v3092_v14 = vmul.f32 %v6580_v8, %v6580_v8 }
 0x2b1   : > { %v3075_v29 = vadd.f32 %v6581_v5, %v3074_v9  ;;  %v3090_v31 = vmul.f32 %v6581_v5, %v6581_v5  ;;  %v3096_v38 = vadd.f32 %v3095_v22, %v3089_v18  ;;  %v6583_v11 = vadd.f32 %v8003_v35, %v2398_v33 }
 0x2b2   : > { %v5883_v27 = vpack.c.bf16 %v6582_v26, %v6580_v8  ;;  %v3093_v39 = vmul.f32 %v6582_v26, %v6582_v26  ;;  %v2055_v1 = vrot.slane %v2054_v24, 2  ;;  %v2034_v35 = vadd.f32 %v2033_v13, %v2032_v36 }
 0x2b3   : > { %v3097_v21 = vadd.f32 %v3096_v38, %v3090_v31  ;;  %v5878_v25 = vpack.c.bf16 %v6583_v11, %v6581_v5  ;;  %v3076_v12 = vadd.f32 %v6583_v11, %v3075_v29  ;;  %v3091_v62 = vmul.f32 %v6583_v11, %v6583_v11 }
 0x2b4   : > { %5931 = vst [vmem:[%s8009_s24 + $0x38] sm:$0xff] %v5883_v27   ;;  %v2056_v2 = vadd.f32 %v2055_v1, %v2054_v24  ;;  %v2035_v55 = vrot.slane %v2034_v35, 1 }
 0x2b5   : > { %5930 = vst [vmem:[%s8009_s24 + $0x30] sm:$0xff] %v5878_v25   ;;  %v3077_v43 = vadd.f32 %v6580_v8, %v3076_v12  ;;  %v3098_v47 = vadd.f32 %v3097_v21, %v3091_v62 }
 0x2b6   : > { %v2057_v46 = vrot.slane %v2056_v2, 1  ;;  %v2036_v57 = vadd.f32 %v2035_v55, %v2034_v35 }
 0x2b7   : > { %v3078_v41 = vadd.f32 %v6582_v26, %v3077_v43  ;;  %v3099_v48 = vadd.f32 %v3098_v47, %v3092_v14 }
 0x2b8   : > { %v2058_v10 = vadd.f32 %v2057_v46, %v2056_v2 }
 0x2b9   : > { %v3079_v16 = vrot.slane %v3078_v41, 4  ;;  %v3100_v32 = vadd.f32 %v3099_v48, %v3093_v39 }
 0x2bb   : > { %v3080_v44 = vadd.f32 %v3079_v16, %v3078_v41  ;;  %v3101_v3 = vrot.slane %v3100_v32, 4 }
 0x2bd   : > { %v3081_v19 = vrot.slane %v3080_v44, 2  ;;  %v3102_v63 = vadd.f32 %v3101_v3, %v3100_v32 }
 0x2bf   : > { %v3082_v54 = vadd.f32 %v3081_v19, %v3080_v44  ;;  %v3103_v49 = vrot.slane %v3102_v63, 2 }
 0x2c1   : > { %v3083_v45 = vrot.slane %v3082_v54, 1  ;;  %v3104_v50 = vadd.f32 %v3103_v49, %v3102_v63 }
 0x2c3   : > { %v3084_v52 = vadd.f32 %v3083_v45, %v3082_v54  ;;  %v3105_v7 = vrot.slane %v3104_v50, 1 }
 0x2c5   : > { %v3106_v58 = vadd.f32 %v3105_v7, %v3104_v50  ;;  %v8023_v59 = vadd.f32 %v3084_v52, %v2036_v57 }
 0x2c7   : > { %v8025_v60 = vadd.f32 %v3106_v58, %v2058_v10 }
 0x2eb   : > { %v6570_v61 = vpop.f32.mrb[16].mxu0 }
 0x2ec   : > { %v4995_v34 = vpop.f32.mrb[17].mxu0  ;;  %v5091_v28 = vmul.f32 %v6570_v61, %v6570_v61 }
 0x2ed   : > { %v6571_v0 = vpop.f32.mrb[18].mxu0  ;;  %v5089_v53 = vmul.f32 %v4995_v34, %v4995_v34 }
 0x2ee   : > { %v5913_v15 = vpack.c.bf16 %v6571_v0, %v6570_v61  ;;  %v4998_v30 = vpop.f32.mrb[19].mxu0  ;;  %v5092_v23 = vmul.f32 %v6571_v0, %v6571_v0 }
 0x2ef   : > { %v5908_v6 = vpack.c.bf16 %v4998_v30, %v4995_v34  ;;  %v5075_v37 = vadd.f32 %v4998_v30, %v4995_v34  ;;  %v5090_v40 = vmul.f32 %v4998_v30, %v4998_v30 }
 0x2f0   : > { %5937 = vst [vmem:[%s8009_s24 + $0x68] sm:$0xff] %v5913_v15  }
 0x2f1   : > { %5936 = vst [vmem:[%s8009_s24 + $0x60] sm:$0xff] %v5908_v6   ;;  %v5076_v51 = vadd.f32 %v6570_v61, %v5075_v37  ;;  %v5097_v20 = vadd.f32 %v5090_v40, %v5089_v53 }
 0x2f3   : > { %v5098_v4 = vadd.f32 %v5097_v20, %v5091_v28  ;;  %v6574_v8 = vpop.f32.mrb[20].mxu0  ;;  %v5077_v17 = vadd.f32 %v6571_v0, %v5076_v51 }
 0x2f4   : > { %v5011_v18 = vpop.f32.mrb[21].mxu0  ;;  %v5095_v11 = vmul.f32 %v6574_v8, %v6574_v8 }
 0x2f5   : > { %v5078_v22 = vadd.f32 %v5077_v17, %v5011_v18  ;;  %v5093_v5 = vmul.f32 %v5011_v18, %v5011_v18  ;;  %v5099_v9 = vadd.f32 %v5098_v4, %v5092_v23  ;;  %v6575_v56 = vpop.f32.mrb[22].mxu0 }
 0x2f6   : > { %v5923_v42 = vpack.c.bf16 %v6575_v56, %v6574_v8  ;;  %v5014_v26 = vpop.f32.mrb[23].mxu0  ;;  %v5096_v21 = vmul.f32 %v6575_v56, %v6575_v56 }
 0x2f7   : > { %v5100_v33 = vadd.f32 %v5099_v9, %v5093_v5  ;;  %v5918_v29 = vpack.c.bf16 %v5014_v26, %v5011_v18  ;;  %v5079_v31 = vadd.f32 %v5078_v22, %v5014_v26  ;;  %v5094_v38 = vmul.f32 %v5014_v26, %v5014_v26 }
 0x2f8   : > { %5939 = vst [vmem:[%s8009_s24 + $0x78] sm:$0xff] %v5923_v42  }
 0x2f9   : > { %5938 = vst [vmem:[%s8009_s24 + $0x70] sm:$0xff] %v5918_v29   ;;  %v5080_v36 = vadd.f32 %v6574_v8, %v5079_v31  ;;  %v5101_v27 = vadd.f32 %v5100_v33, %v5094_v38 }
 0x2fb   : > { %v5081_v25 = vadd.f32 %v6575_v56, %v5080_v36  ;;  %v5102_v12 = vadd.f32 %v5101_v27, %v5095_v11 }
 0x2fd   : > { %v5103_v62 = vadd.f32 %v5102_v12, %v5096_v21  ;;  %v5082_v55 = vrot.slane %v5081_v25, 4 }
 0x2ff   : > { %v5104_v50 = vrot.slane %v5103_v62, 4  ;;  %v5083_v34 = vadd.f32 %v5082_v55, %v5081_v25 }
 0x301   : > { %v5105_v53 = vadd.f32 %v5104_v50, %v5103_v62  ;;  %v5084_v28 = vrot.slane %v5083_v34, 2 }
 0x303   : > { %v5106_v23 = vrot.slane %v5105_v53, 2  ;;  %v5085_v17 = vadd.f32 %v5084_v28, %v5083_v34 }
 0x305   : > { %v5107_v5 = vadd.f32 %v5106_v23, %v5105_v53  ;;  %v5086_v42 = vrot.slane %v5085_v17, 1 }
 0x307   : > { %v5108_v29 = vrot.slane %v5107_v5, 1  ;;  %v5087_v11 = vadd.f32 %v5086_v42, %v5085_v17 }
 0x309   : > { %v5109_v21 = vadd.f32 %v5108_v29, %v5107_v5 }
 0x325   : > { %v6474_v24 = vpop.f32.mrb[16].mxu1 }
 0x326   : > { %v3950_v14 = vpop.f32.mrb[17].mxu1  ;;  %v4046_v16 = vmul.f32 %v6474_v24, %v6474_v24 }
 0x327   : > { %v6475_v43 = vpop.f32.mrb[18].mxu1  ;;  %v4044_v39 = vmul.f32 %v3950_v14, %v3950_v14 }
 0x328   : > { %v5893_v47 = vpack.c.bf16 %v6475_v43, %v6474_v24  ;;  %v3953_v13 = vpop.f32.mrb[19].mxu1  ;;  %v4047_v44 = vmul.f32 %v6475_v43, %v6475_v43 }
 0x329   : > { %v5888_v41 = vpack.c.bf16 %v3953_v13, %v3950_v14  ;;  %v4030_v48 = vadd.f32 %v3953_v13, %v3950_v14  ;;  %v4045_v1 = vmul.f32 %v3953_v13, %v3953_v13 }
 0x32a   : > { %5933 = vst [vmem:[%s8009_s24 + $0x48] sm:$0xff] %v5893_v47  }
 0x32b   : > { %5932 = vst [vmem:[%s8009_s24 + $0x40] sm:$0xff] %v5888_v41   ;;  %v4031_v32 = vadd.f32 %v6474_v24, %v4030_v48  ;;  %v4052_v35 = vadd.f32 %v4045_v1, %v4044_v39 }
 0x32d   : > { %v4053_v3 = vadd.f32 %v4052_v35, %v4046_v16  ;;  %v6478_v2 = vpop.f32.mrb[20].mxu1  ;;  %v4032_v19 = vadd.f32 %v6475_v43, %v4031_v32 }
 0x32e   : > { %v3966_v63 = vpop.f32.mrb[21].mxu1  ;;  %v4050_v0 = vmul.f32 %v6478_v2, %v6478_v2 }
 0x32f   : > { %v4033_v54 = vadd.f32 %v4032_v19, %v3966_v63  ;;  %v4048_v49 = vmul.f32 %v3966_v63, %v3966_v63  ;;  %v4054_v46 = vadd.f32 %v4053_v3, %v4047_v44  ;;  %v6479_v45 = vpop.f32.mrb[22].mxu1 }
 0x330   : > { %v5903_v57 = vpack.c.bf16 %v6479_v45, %v6478_v2  ;;  %v3969_v52 = vpop.f32.mrb[23].mxu1  ;;  %v4051_v6 = vmul.f32 %v6479_v45, %v6479_v45 }
 0x331   : > { %v4055_v7 = vadd.f32 %v4054_v46, %v4048_v49  ;;  %v5898_v10 = vpack.c.bf16 %v3969_v52, %v3966_v63  ;;  %v4034_v58 = vadd.f32 %v4033_v54, %v3969_v52  ;;  %v4049_v61 = vmul.f32 %v3969_v52, %v3969_v52 }
 0x332   : > { %5935 = vst [vmem:[%s8009_s24 + $0x58] sm:$0xff] %v5903_v57  }
 0x333   : > { %5934 = vst [vmem:[%s8009_s24 + $0x50] sm:$0xff] %v5898_v10   ;;  %v4035_v15 = vadd.f32 %v6478_v2, %v4034_v58  ;;  %v4056_v30 = vadd.f32 %v4055_v7, %v4049_v61 }
 0x335   : > { %v4036_v37 = vadd.f32 %v6479_v45, %v4035_v15  ;;  %v4057_v40 = vadd.f32 %v4056_v30, %v4050_v0 }
 0x337   : > { %v4037_v51 = vrot.slane %v4036_v37, 4  ;;  %v4058_v20 = vadd.f32 %v4057_v40, %v4051_v6 }
 0x339   : > { %v4038_v4 = vadd.f32 %v4037_v51, %v4036_v37  ;;  %v4059_v8 = vrot.slane %v4058_v20, 4 }
 0x33b   : > { %v4039_v18 = vrot.slane %v4038_v4, 2  ;;  %v4060_v22 = vadd.f32 %v4059_v8, %v4058_v20 }
 0x33d   : > { %v4040_v9 = vadd.f32 %v4039_v18, %v4038_v4  ;;  %v4061_v56 = vrot.slane %v4060_v22, 2 }
 0x33f   : > { %v4041_v26 = vrot.slane %v4040_v9, 1  ;;  %v4062_v33 = vadd.f32 %v4061_v56, %v4060_v22 }
 0x341   : > { %v4042_v31 = vadd.f32 %v4041_v26, %v4040_v9  ;;  %v4063_v38 = vrot.slane %v4062_v33, 1 }
 0x343   : > { %v4043_v36 = vadd.f32 %v4042_v31, %v8023_v59  ;;  %v4064_v27 = vadd.f32 %v4063_v38, %v4062_v33 }
 0x345   : > { %v4065_v25 = vadd.f32 %v4064_v27, %v8025_v60  ;;  %v5088_v12 = vadd.f32 %v5087_v11, %v4043_v36 }
 0x347   : > { %v5110_v62 = vadd.f32 %v5109_v21, %v4065_v25  ;;  %5111 = vst [vmem:[%s208_s28] sm:$0x1] %v5088_v12 }
 0x349   : > { %5112 = vst [vmem:[%s208_s28 + $0x1] sm:$0x1] %v5110_v62 }
 0x34a PF: > { %s15_s15 = sadd.s32 1, %s6876_s15  }
 0x34b   : > { %p12_p4 = scmp.ge.s32.totalorder %s15_s15, 4  }
 0x34d   :  { %14 = sbr.rel (!%p12_p4) target bundleno = 1 (0x1), region = 98 }

</bundles_post_ra>
